<compile_context>
chip_gen: v7x
topology: tpu7x:2x2x1
jax: 0.10.0
libtpu: 0.0.40
codegen_flags: <defaults>
</compile_context>

<pallas_src>
import functools
import math

import jax
import jax.numpy as jnp
from jax.experimental import pallas as pl
from jax.experimental.pallas import tpu as pltpu


def _round_up(x, m):
    return ((x + m - 1) // m) * m


def _vmem_capacity_bytes():
    try:
        info = pltpu.get_tpu_info()
        cap = getattr(info, "vmem_capacity_bytes", None)
        if cap:
            return int(cap)
    except Exception:
        pass
    return 64 << 20  # v7x-safe fallback


def _largest_seq_tile(S, target):
    """Largest multiple-of-8 divisor of S that is <= target (assumes S % 8 == 0)."""
    best = 8
    t = 8
    cap = min(S, max(8, int(target)))
    while t <= cap:
        if S % t == 0:
            best = t
        t += 8
    return best


# --------------------- kernel 1: LayerNorm + fused QKV projections ---------------------

def _ln_qkv_kernel(k_ref, q_ref, v_ref, g_ref, b2_ref,
                   wq_ref, wk_ref, wv_ref, bq_ref, bk_ref, bv_ref,
                   qo_ref, ko_ref, vo_ref, vn_ref, *, eps, approx):
    def norm(x):
        x = x.astype(jnp.float32)
        d = x.shape[-1]
        mean = jnp.mean(x, axis=-1, keepdims=True)
        c = x - mean
        var = jnp.sum(c * c, axis=-1, keepdims=True) * (1.0 / (d - 1))   # torch unbiased std
        inv = pl.reciprocal(jnp.sqrt(var) + eps, approx=approx)
        return c * inv                                                    # affine folded into W/b

    kn = norm(k_ref[...])
    qn = norm(q_ref[...])
    vn = norm(v_ref[...])

    wdt = wq_ref.dtype
    # torch quirk: query = linears[0](LN(k)); key = linears[1](LN(q)); value = linears[2](LN(v))
    qo_ref[...] = (jnp.dot(kn.astype(wdt), wq_ref[...],
                           preferred_element_type=jnp.float32) + bq_ref[...]).astype(qo_ref.dtype)
    ko_ref[...] = (jnp.dot(qn.astype(wdt), wk_ref[...],
                           preferred_element_type=jnp.float32) + bk_ref[...]).astype(ko_ref.dtype)
    vo_ref[...] = (jnp.dot(vn.astype(wdt), wv_ref[...],
                           preferred_element_type=jnp.float32) + bv_ref[...]).astype(vo_ref.dtype)
    # Residual operand: full LayerNorm(v) = gamma * vn + beta, kept in f32.
    vn_ref[...] = (g_ref[...] * vn + b2_ref[...]).astype(vn_ref.dtype)


# ------ kernel 2: flash attention (heads packed in D) + output projection + residual ------

def _flash_attn_proj_kernel(q_ref, k_ref, v_ref, vn_ref, wo_ref, bo_ref, o_ref,
                            m_sc, l_sc, acc_sc, *, scale, h, d_k, residual, approx):
    # TODO(synk): the optional attention mask (masked_fill(mask==0, -1e9)) is not implemented;
    # this is the mask=None forward path.  Training-mode dropout on p_attn is also omitted
    # (identity in eval).
    ki = pl.program_id(2)

    @pl.when(ki == 0)
    def _():
        m_sc[...] = jnp.full_like(m_sc, -jnp.inf)
        l_sc[...] = jnp.zeros_like(l_sc)
        acc_sc[...] = jnp.zeros_like(acc_sc)

    q = q_ref[...]     # (tq, D) lane-dense block in concat-head layout
    k = k_ref[...]     # (tkv, D)
    v = v_ref[...]     # (tkv, D)

    for head in range(h):          # static unroll; slices are lane-aligned when d_k >= 128
        lo = head * d_k
        hi = lo + d_k
        qh = q[:, lo:hi]
        kh = k[:, lo:hi]
        vh = v[:, lo:hi]
        s = jnp.einsum('qd,kd->qk', qh, kh,
                       preferred_element_type=jnp.float32) * scale        # (tq, tkv) f32
        m_prev = m_sc[head]                                               # (tq, 1)
        m_new = jnp.maximum(m_prev, jnp.max(s, axis=-1, keepdims=True))
        alpha = jnp.exp(m_prev - m_new)
        p = jnp.exp(s - m_new)
        l_sc[head] = alpha * l_sc[head] + jnp.sum(p, axis=-1, keepdims=True)
        pv = jnp.dot(p.astype(vh.dtype), vh,
                     preferred_element_type=jnp.float32)                  # (tq, d_k)
        acc_sc[:, lo:hi] = alpha * acc_sc[:, lo:hi] + pv
        m_sc[head] = m_new

    @pl.when(ki == pl.num_programs(2) - 1)
    def _():
        parts = []
        for head in range(h):
            lo = head * d_k
            inv = pl.reciprocal(l_sc[head], approx=approx)                # (tq, 1)
            parts.append(acc_sc[:, lo:lo + d_k] * inv)
        x = parts[0] if h == 1 else jnp.concatenate(parts, axis=-1)       # (tq, D) concat layout
        y = jnp.dot(x.astype(wo_ref.dtype), wo_ref[...],
                    preferred_element_type=jnp.float32) + bo_ref[...]     # output projection
        if residual:
            y = y + vn_ref[...]                                           # + LayerNorm(v), f32
        o_ref[...] = y.astype(o_ref.dtype)


# --------------------- wrapper ---------------------

def _forward(k, q, v, params, *, h, eps, temperature, residual, compute_dtype,
             tm, tq, tkv, single_buffer_consts):
    B, S, D = q.shape
    assert k.shape == q.shape == v.shape
    assert D % h == 0, "d_model must be divisible by h"
    assert S % 8 == 0, "seq len must be a multiple of 8 for this kernel"
    d_k = D // h
    out_dtype = q.dtype
    cd = jnp.dtype(compute_dtype).itemsize
    out_bytes = jnp.dtype(out_dtype).itemsize
    approx = jnp.dtype(compute_dtype) != jnp.dtype(jnp.float32)

    gamma = params["gamma"].astype(jnp.float32).reshape(1, D)
    beta = params["beta"].astype(jnp.float32).reshape(1, D)

    # Fold the LayerNorm affine into the QKV projections (wrapper-side, one-time):
    #   LN(x) @ W + b = (c/(std+eps)) @ (diag(gamma) @ W) + (beta @ W + b)
    def fold(w, b):
        w = w.astype(jnp.float32)
        wf = (gamma.reshape(D, 1) * w).astype(compute_dtype)
        bf = beta @ w + b.astype(jnp.float32).reshape(1, D)
        return wf, bf

    wq_f, bq_f = fold(params["wq"], params["bq"])
    wk_f, bk_f = fold(params["wk"], params["bk"])
    wv_f, bv_f = fold(params["wv"], params["bv"])
    wo = params["wo"].astype(compute_dtype)
    bo = params["bo"].astype(jnp.float32).reshape(1, D)
    # TODO(synk): self-attention fast path (k is q is v): compute LN once and use a single fused
    # (D, 3D) projection; not exercised by the general k != q != v call path here.

    vmem_cap = _vmem_capacity_bytes()
    budget = min(int(vmem_cap * 0.7), 96 << 20)

    def const_spec(shape, index_map):
        if single_buffer_consts:
            return pl.BlockSpec(shape, index_map, pipeline_mode=pl.Buffered(1))
        return pl.BlockSpec(shape, index_map)

    # ---------------- kernel 1: LayerNorm + QKV projections over rows of (M, D) ----------------
    M = B * S
    w_bytes = 2 * 3 * D * D * cd + 2 * 6 * D * 4                   # weights + small vectors
    per_row = D * (2 * 3 * 4 + 2 * (3 * cd + 4))                   # dbl-buffered in/out per row
    tm_cap = max(64, (budget - w_bytes - (4 << 20)) // per_row)
    tm_eff = tm if tm is not None else 512
    tm_eff = int(min(tm_eff, tm_cap))
    tm_eff = max(8, min(tm_eff, _round_up(M, 8)))
    if M > 8:
        tm_eff = min(tm_eff, _round_up((M + 1) // 2, 8))           # >= 2 steps for v7x megacore
    tm_eff = max(8, (tm_eff // 8) * 8)
    M_pad = _round_up(M, tm_eff)

    def flat_pad(x):
        x = x.reshape(M, D)
        if M_pad != M:
            x = jnp.pad(x, ((0, M_pad - M), (0, 0)))
        return x

    k2, q2, v2 = flat_pad(k), flat_pad(q), flat_pad(v)

    row_spec = pl.BlockSpec((tm_eff, D), lambda i: (i, 0))
    vec_spec = const_spec((1, D), lambda i: (0, 0))
    mat_spec = const_spec((D, D), lambda i: (0, 0))

    vmem1 = int(2 * 3 * tm_eff * D * 4 + 2 * (3 * cd + 4) * tm_eff * D + w_bytes)
    ce1 = pl.CostEstimate(
        flops=int(6 * M_pad * D * D),
        transcendentals=int(6 * M_pad),
        bytes_accessed=int(3 * M_pad * D * 4 + 3 * D * D * cd + (3 * cd + 4) * M_pad * D),
    )
    query, key, value, vnorm = pl.pallas_call(
        functools.partial(_ln_qkv_kernel, eps=eps, approx=approx),
        out_shape=(
            jax.ShapeDtypeStruct((M_pad, D), compute_dtype),   # query = lin0(LN(k))
            jax.ShapeDtypeStruct((M_pad, D), compute_dtype),   # key   = lin1(LN(q))
            jax.ShapeDtypeStruct((M_pad, D), compute_dtype),   # value = lin2(LN(v))
            jax.ShapeDtypeStruct((M_pad, D), jnp.float32),     # LayerNorm(v) for the residual
        ),
        grid_spec=pltpu.PrefetchScalarGridSpec(
            num_scalar_prefetch=0,
            grid=(M_pad // tm_eff,),
            in_specs=[row_spec, row_spec, row_spec,            # k, q, v rows
                      vec_spec, vec_spec,                      # gamma, beta (residual LN)
                      mat_spec, mat_spec, mat_spec,            # folded Wq, Wk, Wv
                      vec_spec, vec_spec, vec_spec],           # folded bq, bk, bv (f32)
            out_specs=[row_spec, row_spec, row_spec, row_spec],
        ),
        compiler_params=pltpu.CompilerParams(
            dimension_semantics=("parallel",),
            vmem_limit_bytes=int(min(max(vmem1 + (16 << 20), 32 << 20), int(vmem_cap * 0.9))),
        ),
        cost_estimate=ce1,
    )(k2, q2, v2, gamma, beta, wq_f, wk_f, wv_f, bq_f, bk_f, bv_f)

    # -------- kernel 2: flash attention + output projection + residual, no XLA transposes -------
    def k2_bytes(tq_, tkv_):
        io = 2 * (tq_ * D * cd + 2 * tkv_ * D * cd + tq_ * D * 4 + tq_ * D * out_bytes)
        wo_b = 2 * (D * D * cd + D * 4)
        scratch = tq_ * D * 4 + 2 * h * tq_ * 4 * 128
        transient = 6 * tq_ * tkv_ * 4
        return io + wo_b + scratch + transient

    tq_eff = tq if tq is not None else _largest_seq_tile(S, 256)
    tkv_eff = tkv if tkv is not None else _largest_seq_tile(S, 512)
    assert S % tq_eff == 0 and S % tkv_eff == 0
    while k2_bytes(tq_eff, tkv_eff) > budget and (tq_eff > 8 or tkv_eff > 8):
        if tkv_eff >= tq_eff and tkv_eff > 8:
            tkv_eff = _largest_seq_tile(S, tkv_eff // 2)
        else:
            tq_eff = _largest_seq_tile(S, tq_eff // 2)

    nq = S // tq_eff
    nkv = S // tkv_eff
    scale = float(temperature) / math.sqrt(d_k)

    # Blocks stay in the flattened, lane-dense (M, D) concat-head layout; per-head d_k column
    # slabs are sliced in-kernel.  Row offset for (batch b, q-tile qi) is b*S + qi*tq.
    q_spec = pl.BlockSpec((tq_eff, D), lambda b, qi, ki: (b * nq + qi, 0))
    kv_spec = pl.BlockSpec((tkv_eff, D), lambda b, qi, ki: (b * nkv + ki, 0))
    vn_spec = pl.BlockSpec((tq_eff, D), lambda b, qi, ki: (b * nq + qi, 0))
    wo_spec = const_spec((D, D), lambda b, qi, ki: (0, 0))
    bo_spec = const_spec((1, D), lambda b, qi, ki: (0, 0))
    o_spec = pl.BlockSpec((tq_eff, D), lambda b, qi, ki: (b * nq + qi, 0))

    ce2 = pl.CostEstimate(
        flops=int(4 * B * S * S * D + 2 * M * D * D),
        transcendentals=int(B * h * S * S),
        bytes_accessed=int((3 * cd + 4) * M * D + D * D * cd + M * D * out_bytes),
    )
    out = pl.pallas_call(
        functools.partial(_flash_attn_proj_kernel, scale=scale, h=h, d_k=d_k,
                          residual=residual, approx=approx),
        out_shape=jax.ShapeDtypeStruct((M, D), out_dtype),
        grid_spec=pltpu.PrefetchScalarGridSpec(
            num_scalar_prefetch=0,
            grid=(B, nq, nkv),
            in_specs=[q_spec, kv_spec, kv_spec, vn_spec, wo_spec, bo_spec],
            out_specs=o_spec,
            scratch_shapes=[
                pltpu.VMEM((h, tq_eff, 1), jnp.float32),   # running max per head
                pltpu.VMEM((h, tq_eff, 1), jnp.float32),   # running denom per head
                pltpu.VMEM((tq_eff, D), jnp.float32),      # concat-layout accumulator
            ],
        ),
        compiler_params=pltpu.CompilerParams(
            dimension_semantics=("parallel", "parallel", "arbitrary"),
            vmem_limit_bytes=int(min(max(k2_bytes(tq_eff, tkv_eff) + (16 << 20), 32 << 20),
                                     int(vmem_cap * 0.9))),
        ),
        cost_estimate=ce2,
    )(query, key, value, vnorm, wo, bo)

    return out.reshape(B, S, D)


def multi_head_attention(k, q, v, params, *, h, eps=1e-6, temperature=1.0, residual=True,
                         compute_dtype=jnp.bfloat16, tm=None, tq=None, tkv=None):
    """Pallas TPU forward of MultiHeadedAttention (layernorm, scaled-dot, eval dropout)."""
    kwargs = dict(h=h, eps=eps, temperature=temperature, residual=residual,
                  compute_dtype=compute_dtype, tm=tm, tq=tq, tkv=tkv)
    if hasattr(pl, "Buffered"):
        try:
            return _forward(k, q, v, params, single_buffer_consts=True, **kwargs)
        except Exception:
            # pipeline_mode=pl.Buffered(1) not supported by this pallas_call lowering;
            # fall back to default double-buffered constant weight blocks.
            pass
    return _forward(k, q, v, params, single_buffer_consts=False, **kwargs)


# --------------------- pure-JAX reference (identical semantics) ---------------------

def multi_head_attention_ref(k, q, v, params, *, h, eps=1e-6, temperature=1.0, residual=True):
    B, S, D = q.shape
    d_k = D // h
    hp = jax.lax.Precision.HIGHEST

    def ln(x):
        mean = jnp.mean(x, -1, keepdims=True)
        c = x - mean
        std = jnp.sqrt(jnp.sum(c * c, -1, keepdims=True) / (D - 1))
        return params["gamma"] * c / (std + eps) + params["beta"]

    kn, qn, vn = ln(k), ln(q), ln(v)
    query = jnp.einsum('bsd,de->bse', kn, params["wq"], precision=hp) + params["bq"]
    key = jnp.einsum('bsd,de->bse', qn, params["wk"], precision=hp) + params["bk"]
    value = jnp.einsum('bsd,de->bse', vn, params["wv"], precision=hp) + params["bv"]

    def split(x):
        return x.reshape(B, S, h, d_k).transpose(0, 2, 1, 3)

    Q, K, V = split(query), split(key), split(value)
    scores = jnp.einsum('bhqd,bhkd->bhqk', Q, K, precision=hp) / math.sqrt(d_k)
    p = jax.nn.softmax(scores * temperature, axis=-1)
    x = jnp.einsum('bhqk,bhkd->bhqd', p, V, precision=hp)
    x = x.transpose(0, 2, 1, 3).reshape(B, S, D)
    out = jnp.einsum('bsd,de->bse', x, params["wo"], precision=hp) + params["bo"]
    return out + vn if residual else out


if __name__ == "__main__":
    # Small, lane-dense shapes: d_model is a multiple of 128 and h is chosen so d_k = 128,
    # keeping every per-head column slab vreg/lane aligned (per perf review).
    B, S = 2, 16
    h = 2
    d_model = 256

    keys = jax.random.split(jax.random.PRNGKey(0), 13)
    kk = jax.random.normal(keys[0], (B, S, d_model), jnp.float32)
    qq = jax.random.normal(keys[1], (B, S, d_model), jnp.float32)
    vv = jax.random.normal(keys[2], (B, S, d_model), jnp.float32)

    def lin_w(key):
        return jax.random.normal(key, (d_model, d_model), jnp.float32) / math.sqrt(d_model)

    params = {
        "gamma": 1.0 + 0.1 * jax.random.normal(keys[3], (d_model,), jnp.float32),
        "beta": 0.05 * jax.random.normal(keys[4], (d_model,), jnp.float32),
        "wq": lin_w(keys[5]), "bq": 0.01 * jax.random.normal(keys[6], (d_model,), jnp.float32),
        "wk": lin_w(keys[7]), "bk": 0.01 * jax.random.normal(keys[8], (d_model,), jnp.float32),
        "wv": lin_w(keys[9]), "bv": 0.01 * jax.random.normal(keys[10], (d_model,), jnp.float32),
        "wo": lin_w(keys[11]), "bo": 0.01 * jax.random.normal(keys[12], (d_model,), jnp.float32),
    }

    ref = multi_head_attention_ref(kk, qq, vv, params, h=h)

    # f32 end-to-end (tight check; exact reciprocals, f32 MXU accumulation).
    out_f32 = jax.block_until_ready(
        multi_head_attention(kk, qq, vv, params, h=h, compute_dtype=jnp.float32))
    err_f32 = float(jnp.max(jnp.abs(out_f32 - ref)))
    assert jnp.allclose(out_f32, ref, atol=2e-3, rtol=2e-3), f"f32 mismatch, max abs err {err_f32}"

    # bf16 weights / MXU inputs, f32 LN / softmax / accumulation / residual (perf path).
    out_bf16 = jax.block_until_ready(
        multi_head_attention(kk, qq, vv, params, h=h, compute_dtype=jnp.bfloat16))
    err_bf16 = float(jnp.max(jnp.abs(out_bf16 - ref)))
    assert jnp.allclose(out_bf16, ref, atol=1e-1, rtol=1e-1), f"bf16 mismatch, max abs err {err_bf16}"

    print("KERNEL_OK")
</pallas_src>

<mosaic_0001>
module attributes {stable_mosaic.version = 11 : i64} {
  func.func @_ln_qkv_kernel(%arg0: i32, %arg1: memref<16x256xf32, #tpu.memory_space<vmem>>, %arg2: memref<16x256xf32, #tpu.memory_space<vmem>>, %arg3: memref<16x256xf32, #tpu.memory_space<vmem>>, %arg4: memref<1x256xf32, #tpu.memory_space<vmem>>, %arg5: memref<1x256xf32, #tpu.memory_space<vmem>>, %arg6: memref<256x256xf32, #tpu.memory_space<vmem>>, %arg7: memref<256x256xf32, #tpu.memory_space<vmem>>, %arg8: memref<256x256xf32, #tpu.memory_space<vmem>>, %arg9: memref<1x256xf32, #tpu.memory_space<vmem>>, %arg10: memref<1x256xf32, #tpu.memory_space<vmem>>, %arg11: memref<1x256xf32, #tpu.memory_space<vmem>>, %arg12: memref<16x256xf32, #tpu.memory_space<vmem>>, %arg13: memref<16x256xf32, #tpu.memory_space<vmem>>, %arg14: memref<16x256xf32, #tpu.memory_space<vmem>>, %arg15: memref<16x256xf32, #tpu.memory_space<vmem>>) attributes {dimension_semantics = [#tpu.dimension_semantics<parallel>], iteration_bounds = array<i64: 2>, scalar_prefetch = 0 : i64, scratch_operands = 0 : i64, tpu.core_type = #tpu.core_type<tc>, window_params = [{transform_indices = @transform_0, window_bounds = array<i64: 16, 256>}, {transform_indices = @transform_1, window_bounds = array<i64: 16, 256>}, {transform_indices = @transform_2, window_bounds = array<i64: 16, 256>}, {pipeline_mode = #tpu.pipeline_mode<synchronous>, transform_indices = @transform_3, window_bounds = array<i64: 1, 256>}, {pipeline_mode = #tpu.pipeline_mode<synchronous>, transform_indices = @transform_4, window_bounds = array<i64: 1, 256>}, {pipeline_mode = #tpu.pipeline_mode<synchronous>, transform_indices = @transform_5, window_bounds = array<i64: 256, 256>}, {pipeline_mode = #tpu.pipeline_mode<synchronous>, transform_indices = @transform_6, window_bounds = array<i64: 256, 256>}, {pipeline_mode = #tpu.pipeline_mode<synchronous>, transform_indices = @transform_7, window_bounds = array<i64: 256, 256>}, {pipeline_mode = #tpu.pipeline_mode<synchronous>, transform_indices = @transform_8, window_bounds = array<i64: 1, 256>}, {pipeline_mode = #tpu.pipeline_mode<synchronous>, transform_indices = @transform_9, window_bounds = array<i64: 1, 256>}, {pipeline_mode = #tpu.pipeline_mode<synchronous>, transform_indices = @transform_10, window_bounds = array<i64: 1, 256>}, {transform_indices = @transform_11, window_bounds = array<i64: 16, 256>}, {transform_indices = @transform_12, window_bounds = array<i64: 16, 256>}, {transform_indices = @transform_13, window_bounds = array<i64: 16, 256>}, {transform_indices = @transform_14, window_bounds = array<i64: 16, 256>}]} {
    %c0 = arith.constant 0 : index
    %c0_0 = arith.constant 0 : index
    %0 = vector.load %arg1[%c0, %c0_0] : memref<16x256xf32, #tpu.memory_space<vmem>>, vector<16x256xf32>
    %cst = arith.constant dense<0.000000e+00> : vector<16xf32>
    %1 = vector.multi_reduction <add>, %0, %cst [1] : vector<16x256xf32> to vector<16xf32>
    %2 = vector.shape_cast %1 : vector<16xf32> to vector<16x1xf32>
    %cst_1 = arith.constant 2.560000e+02 : f32
    %3 = vector.broadcast %cst_1 : f32 to vector<16x1xf32>
    %4 = arith.divf %2, %3 : vector<16x1xf32>
    %5 = vector.broadcast %4 : vector<16x1xf32> to vector<16x256xf32>
    %6 = arith.subf %0, %5 : vector<16x256xf32>
    %7 = arith.mulf %6, %6 : vector<16x256xf32>
    %cst_2 = arith.constant dense<0.000000e+00> : vector<16xf32>
    %8 = vector.multi_reduction <add>, %7, %cst_2 [1] : vector<16x256xf32> to vector<16xf32>
    %9 = vector.shape_cast %8 : vector<16xf32> to vector<16x1xf32>
    %cst_3 = arith.constant 0.00392156886 : f32
    %10 = vector.broadcast %cst_3 : f32 to vector<16x1xf32>
    %11 = arith.mulf %9, %10 : vector<16x1xf32>
    %12 = math.sqrt %11 : vector<16x1xf32>
    %cst_4 = arith.constant 9.99999997E-7 : f32
    %13 = vector.broadcast %cst_4 : f32 to vector<16x1xf32>
    %14 = arith.addf %12, %13 : vector<16x1xf32>
    %15 = tpu.reciprocal %14 : vector<16x1xf32> -> vector<16x1xf32>
    %16 = vector.broadcast %15 : vector<16x1xf32> to vector<16x256xf32>
    %17 = arith.mulf %6, %16 : vector<16x256xf32>
    %c0_5 = arith.constant 0 : index
    %c0_6 = arith.constant 0 : index
    %18 = vector.load %arg2[%c0_5, %c0_6] : memref<16x256xf32, #tpu.memory_space<vmem>>, vector<16x256xf32>
    %cst_7 = arith.constant dense<0.000000e+00> : vector<16xf32>
    %19 = vector.multi_reduction <add>, %18, %cst_7 [1] : vector<16x256xf32> to vector<16xf32>
    %20 = vector.shape_cast %19 : vector<16xf32> to vector<16x1xf32>
    %cst_8 = arith.constant 2.560000e+02 : f32
    %21 = vector.broadcast %cst_8 : f32 to vector<16x1xf32>
    %22 = arith.divf %20, %21 : vector<16x1xf32>
    %23 = vector.broadcast %22 : vector<16x1xf32> to vector<16x256xf32>
    %24 = arith.subf %18, %23 : vector<16x256xf32>
    %25 = arith.mulf %24, %24 : vector<16x256xf32>
    %cst_9 = arith.constant dense<0.000000e+00> : vector<16xf32>
    %26 = vector.multi_reduction <add>, %25, %cst_9 [1] : vector<16x256xf32> to vector<16xf32>
    %27 = vector.shape_cast %26 : vector<16xf32> to vector<16x1xf32>
    %cst_10 = arith.constant 0.00392156886 : f32
    %28 = vector.broadcast %cst_10 : f32 to vector<16x1xf32>
    %29 = arith.mulf %27, %28 : vector<16x1xf32>
    %30 = math.sqrt %29 : vector<16x1xf32>
    %cst_11 = arith.constant 9.99999997E-7 : f32
    %31 = vector.broadcast %cst_11 : f32 to vector<16x1xf32>
    %32 = arith.addf %30, %31 : vector<16x1xf32>
    %33 = tpu.reciprocal %32 : vector<16x1xf32> -> vector<16x1xf32>
    %34 = vector.broadcast %33 : vector<16x1xf32> to vector<16x256xf32>
    %35 = arith.mulf %24, %34 : vector<16x256xf32>
    %c0_12 = arith.constant 0 : index
    %c0_13 = arith.constant 0 : index
    %36 = vector.load %arg3[%c0_12, %c0_13] : memref<16x256xf32, #tpu.memory_space<vmem>>, vector<16x256xf32>
    %cst_14 = arith.constant dense<0.000000e+00> : vector<16xf32>
    %37 = vector.multi_reduction <add>, %36, %cst_14 [1] : vector<16x256xf32> to vector<16xf32>
    %38 = vector.shape_cast %37 : vector<16xf32> to vector<16x1xf32>
    %cst_15 = arith.constant 2.560000e+02 : f32
    %39 = vector.broadcast %cst_15 : f32 to vector<16x1xf32>
    %40 = arith.divf %38, %39 : vector<16x1xf32>
    %41 = vector.broadcast %40 : vector<16x1xf32> to vector<16x256xf32>
    %42 = arith.subf %36, %41 : vector<16x256xf32>
    %43 = arith.mulf %42, %42 : vector<16x256xf32>
    %cst_16 = arith.constant dense<0.000000e+00> : vector<16xf32>
    %44 = vector.multi_reduction <add>, %43, %cst_16 [1] : vector<16x256xf32> to vector<16xf32>
    %45 = vector.shape_cast %44 : vector<16xf32> to vector<16x1xf32>
    %cst_17 = arith.constant 0.00392156886 : f32
    %46 = vector.broadcast %cst_17 : f32 to vector<16x1xf32>
    %47 = arith.mulf %45, %46 : vector<16x1xf32>
    %48 = math.sqrt %47 : vector<16x1xf32>
    %cst_18 = arith.constant 9.99999997E-7 : f32
    %49 = vector.broadcast %cst_18 : f32 to vector<16x1xf32>
    %50 = arith.addf %48, %49 : vector<16x1xf32>
    %51 = tpu.reciprocal %50 : vector<16x1xf32> -> vector<16x1xf32>
    %52 = vector.broadcast %51 : vector<16x1xf32> to vector<16x256xf32>
    %53 = arith.mulf %42, %52 : vector<16x256xf32>
    %c0_19 = arith.constant 0 : index
    %c0_20 = arith.constant 0 : index
    %54 = vector.load %arg6[%c0_19, %c0_20] : memref<256x256xf32, #tpu.memory_space<vmem>>, vector<256x256xf32>
    %cst_21 = arith.constant dense<0.000000e+00> : vector<16x256xf32>
    %55 = tpu.matmul %17, %54, %cst_21 {dimension_numbers = #tpu.dot_dimension_numbers<[1], [0], [0], [1], [0, 0, 1, 1], [], []>} : vector<16x256xf32>, vector<256x256xf32>, vector<16x256xf32> -> vector<16x256xf32>
    %c0_22 = arith.constant 0 : index
    %c0_23 = arith.constant 0 : index
    %56 = vector.load %arg9[%c0_22, %c0_23] : memref<1x256xf32, #tpu.memory_space<vmem>>, vector<1x256xf32>
    %57 = vector.broadcast %56 : vector<1x256xf32> to vector<16x256xf32>
    %58 = arith.addf %55, %57 : vector<16x256xf32>
    %c0_24 = arith.constant 0 : index
    %c0_25 = arith.constant 0 : index
    %59 = vector.load %arg12[%c0_24, %c0_25] : memref<16x256xf32, #tpu.memory_space<vmem>>, vector<16x256xf32>
    tpu.vector_store %arg12[%c0_24, %c0_25], %58 {strides = array<i32>} : memref<16x256xf32, #tpu.memory_space<vmem>>, vector<16x256xf32>,
    %c0_26 = arith.constant 0 : index
    %c0_27 = arith.constant 0 : index
    %60 = vector.load %arg7[%c0_26, %c0_27] : memref<256x256xf32, #tpu.memory_space<vmem>>, vector<256x256xf32>
    %cst_28 = arith.constant dense<0.000000e+00> : vector<16x256xf32>
    %61 = tpu.matmul %35, %60, %cst_28 {dimension_numbers = #tpu.dot_dimension_numbers<[1], [0], [0], [1], [0, 0, 1, 1], [], []>} : vector<16x256xf32>, vector<256x256xf32>, vector<16x256xf32> -> vector<16x256xf32>
    %c0_29 = arith.constant 0 : index
    %c0_30 = arith.constant 0 : index
    %62 = vector.load %arg10[%c0_29, %c0_30] : memref<1x256xf32, #tpu.memory_space<vmem>>, vector<1x256xf32>
    %63 = vector.broadcast %62 : vector<1x256xf32> to vector<16x256xf32>
    %64 = arith.addf %61, %63 : vector<16x256xf32>
    %c0_31 = arith.constant 0 : index
    %c0_32 = arith.constant 0 : index
    %65 = vector.load %arg13[%c0_31, %c0_32] : memref<16x256xf32, #tpu.memory_space<vmem>>, vector<16x256xf32>
    tpu.vector_store %arg13[%c0_31, %c0_32], %64 {strides = array<i32>} : memref<16x256xf32, #tpu.memory_space<vmem>>, vector<16x256xf32>,
    %c0_33 = arith.constant 0 : index
    %c0_34 = arith.constant 0 : index
    %66 = vector.load %arg8[%c0_33, %c0_34] : memref<256x256xf32, #tpu.memory_space<vmem>>, vector<256x256xf32>
    %cst_35 = arith.constant dense<0.000000e+00> : vector<16x256xf32>
    %67 = tpu.matmul %53, %66, %cst_35 {dimension_numbers = #tpu.dot_dimension_numbers<[1], [0], [0], [1], [0, 0, 1, 1], [], []>} : vector<16x256xf32>, vector<256x256xf32>, vector<16x256xf32> -> vector<16x256xf32>
    %c0_36 = arith.constant 0 : index
    %c0_37 = arith.constant 0 : index
    %68 = vector.load %arg11[%c0_36, %c0_37] : memref<1x256xf32, #tpu.memory_space<vmem>>, vector<1x256xf32>
    %69 = vector.broadcast %68 : vector<1x256xf32> to vector<16x256xf32>
    %70 = arith.addf %67, %69 : vector<16x256xf32>
    %c0_38 = arith.constant 0 : index
    %c0_39 = arith.constant 0 : index
    %71 = vector.load %arg14[%c0_38, %c0_39] : memref<16x256xf32, #tpu.memory_space<vmem>>, vector<16x256xf32>
    tpu.vector_store %arg14[%c0_38, %c0_39], %70 {strides = array<i32>} : memref<16x256xf32, #tpu.memory_space<vmem>>, vector<16x256xf32>,
    %c0_40 = arith.constant 0 : index
    %c0_41 = arith.constant 0 : index
    %72 = vector.load %arg4[%c0_40, %c0_41] : memref<1x256xf32, #tpu.memory_space<vmem>>, vector<1x256xf32>
    %73 = vector.broadcast %72 : vector<1x256xf32> to vector<16x256xf32>
    %74 = arith.mulf %73, %53 : vector<16x256xf32>
    %c0_42 = arith.constant 0 : index
    %c0_43 = arith.constant 0 : index
    %75 = vector.load %arg5[%c0_42, %c0_43] : memref<1x256xf32, #tpu.memory_space<vmem>>, vector<1x256xf32>
    %76 = vector.broadcast %75 : vector<1x256xf32> to vector<16x256xf32>
    %77 = arith.addf %74, %76 : vector<16x256xf32>
    %c0_44 = arith.constant 0 : index
    %c0_45 = arith.constant 0 : index
    %78 = vector.load %arg15[%c0_44, %c0_45] : memref<16x256xf32, #tpu.memory_space<vmem>>, vector<16x256xf32>
    tpu.vector_store %arg15[%c0_44, %c0_45], %77 {strides = array<i32>} : memref<16x256xf32, #tpu.memory_space<vmem>>, vector<16x256xf32>,
    return
  }
  func.func @transform_0(%arg0: i32) -> (i32, i32) {
    %c0_i32 = arith.constant 0 : i32
    %c0_i32_0 = arith.constant 0 : i32
    return %arg0, %c0_i32 : i32, i32
  }
  func.func @transform_1(%arg0: i32) -> (i32, i32) {
    %c0_i32 = arith.constant 0 : i32
    %c0_i32_0 = arith.constant 0 : i32
    return %arg0, %c0_i32 : i32, i32
  }
  func.func @transform_2(%arg0: i32) -> (i32, i32) {
    %c0_i32 = arith.constant 0 : i32
    %c0_i32_0 = arith.constant 0 : i32
    return %arg0, %c0_i32 : i32, i32
  }
  func.func @transform_3(%arg0: i32) -> (i32, i32) {
    %c0_i32 = arith.constant 0 : i32
    %c0_i32_0 = arith.constant 0 : i32
    %c0_i32_1 = arith.constant 0 : i32
    return %c0_i32, %c0_i32_0 : i32, i32
  }
  func.func @transform_4(%arg0: i32) -> (i32, i32) {
    %c0_i32 = arith.constant 0 : i32
    %c0_i32_0 = arith.constant 0 : i32
    %c0_i32_1 = arith.constant 0 : i32
    return %c0_i32, %c0_i32_0 : i32, i32
  }
  func.func @transform_5(%arg0: i32) -> (i32, i32) {
    %c0_i32 = arith.constant 0 : i32
    %c0_i32_0 = arith.constant 0 : i32
    %c0_i32_1 = arith.constant 0 : i32
    return %c0_i32, %c0_i32_0 : i32, i32
  }
  func.func @transform_6(%arg0: i32) -> (i32, i32) {
    %c0_i32 = arith.constant 0 : i32
    %c0_i32_0 = arith.constant 0 : i32
    %c0_i32_1 = arith.constant 0 : i32
    return %c0_i32, %c0_i32_0 : i32, i32
  }
  func.func @transform_7(%arg0: i32) -> (i32, i32) {
    %c0_i32 = arith.constant 0 : i32
    %c0_i32_0 = arith.constant 0 : i32
    %c0_i32_1 = arith.constant 0 : i32
    return %c0_i32, %c0_i32_0 : i32, i32
  }
  func.func @transform_8(%arg0: i32) -> (i32, i32) {
    %c0_i32 = arith.constant 0 : i32
    %c0_i32_0 = arith.constant 0 : i32
    %c0_i32_1 = arith.constant 0 : i32
    return %c0_i32, %c0_i32_0 : i32, i32
  }
  func.func @transform_9(%arg0: i32) -> (i32, i32) {
    %c0_i32 = arith.constant 0 : i32
    %c0_i32_0 = arith.constant 0 : i32
    %c0_i32_1 = arith.constant 0 : i32
    return %c0_i32, %c0_i32_0 : i32, i32
  }
  func.func @transform_10(%arg0: i32) -> (i32, i32) {
    %c0_i32 = arith.constant 0 : i32
    %c0_i32_0 = arith.constant 0 : i32
    %c0_i32_1 = arith.constant 0 : i32
    return %c0_i32, %c0_i32_0 : i32, i32
  }
  func.func @transform_11(%arg0: i32) -> (i32, i32) {
    %c0_i32 = arith.constant 0 : i32
    %c0_i32_0 = arith.constant 0 : i32
    return %arg0, %c0_i32 : i32, i32
  }
  func.func @transform_12(%arg0: i32) -> (i32, i32) {
    %c0_i32 = arith.constant 0 : i32
    %c0_i32_0 = arith.constant 0 : i32
    return %arg0, %c0_i32 : i32, i32
  }
  func.func @transform_13(%arg0: i32) -> (i32, i32) {
    %c0_i32 = arith.constant 0 : i32
    %c0_i32_0 = arith.constant 0 : i32
    return %arg0, %c0_i32 : i32, i32
  }
  func.func @transform_14(%arg0: i32) -> (i32, i32) {
    %c0_i32 = arith.constant 0 : i32
    %c0_i32_0 = arith.constant 0 : i32
    return %arg0, %c0_i32 : i32, i32
  }
}

module attributes {stable_mosaic.version = 11 : i64} {
  func.func @_ln_qkv_kernel(%arg0: i32, %arg1: memref<16x256xf32, #tpu.memory_space<vmem>>, %arg2: memref<16x256xf32, #tpu.memory_space<vmem>>, %arg3: memref<16x256xf32, #tpu.memory_space<vmem>>, %arg4: memref<1x256xf32, #tpu.memory_space<vmem>>, %arg5: memref<1x256xf32, #tpu.memory_space<vmem>>, %arg6: memref<256x256xf32, #tpu.memory_space<vmem>>, %arg7: memref<256x256xf32, #tpu.memory_space<vmem>>, %arg8: memref<256x256xf32, #tpu.memory_space<vmem>>, %arg9: memref<1x256xf32, #tpu.memory_space<vmem>>, %arg10: memref<1x256xf32, #tpu.memory_space<vmem>>, %arg11: memref<1x256xf32, #tpu.memory_space<vmem>>, %arg12: memref<16x256xf32, #tpu.memory_space<vmem>>, %arg13: memref<16x256xf32, #tpu.memory_space<vmem>>, %arg14: memref<16x256xf32, #tpu.memory_space<vmem>>, %arg15: memref<16x256xf32, #tpu.memory_space<vmem>>) attributes {dimension_semantics = [#tpu.dimension_semantics<parallel>], iteration_bounds = array<i64: 2>, scalar_prefetch = 0 : i64, scratch_operands = 0 : i64, tpu.core_type = #tpu.core_type<tc>, window_params = [{transform_indices = @transform_0, window_bounds = array<i64: 16, 256>}, {transform_indices = @transform_1, window_bounds = array<i64: 16, 256>}, {transform_indices = @transform_2, window_bounds = array<i64: 16, 256>}, {pipeline_mode = #tpu.pipeline_mode<synchronous>, transform_indices = @transform_3, window_bounds = array<i64: 1, 256>}, {pipeline_mode = #tpu.pipeline_mode<synchronous>, transform_indices = @transform_4, window_bounds = array<i64: 1, 256>}, {pipeline_mode = #tpu.pipeline_mode<synchronous>, transform_indices = @transform_5, window_bounds = array<i64: 256, 256>}, {pipeline_mode = #tpu.pipeline_mode<synchronous>, transform_indices = @transform_6, window_bounds = array<i64: 256, 256>}, {pipeline_mode = #tpu.pipeline_mode<synchronous>, transform_indices = @transform_7, window_bounds = array<i64: 256, 256>}, {pipeline_mode = #tpu.pipeline_mode<synchronous>, transform_indices = @transform_8, window_bounds = array<i64: 1, 256>}, {pipeline_mode = #tpu.pipeline_mode<synchronous>, transform_indices = @transform_9, window_bounds = array<i64: 1, 256>}, {pipeline_mode = #tpu.pipeline_mode<synchronous>, transform_indices = @transform_10, window_bounds = array<i64: 1, 256>}, {transform_indices = @transform_11, window_bounds = array<i64: 16, 256>}, {transform_indices = @transform_12, window_bounds = array<i64: 16, 256>}, {transform_indices = @transform_13, window_bounds = array<i64: 16, 256>}, {transform_indices = @transform_14, window_bounds = array<i64: 16, 256>}]} {
    %c0 = arith.constant 0 : index
    %c0_0 = arith.constant 0 : index
    %0 = vector.load %arg1[%c0, %c0_0] : memref<16x256xf32, #tpu.memory_space<vmem>>, vector<16x256xf32>
    %cst = arith.constant dense<0.000000e+00> : vector<16xf32>
    %1 = vector.multi_reduction <add>, %0, %cst [1] : vector<16x256xf32> to vector<16xf32>
    %2 = vector.shape_cast %1 : vector<16xf32> to vector<16x1xf32>
    %cst_1 = arith.constant 2.560000e+02 : f32
    %3 = vector.broadcast %cst_1 : f32 to vector<16x1xf32>
    %4 = arith.divf %2, %3 : vector<16x1xf32>
    %5 = vector.broadcast %4 : vector<16x1xf32> to vector<16x256xf32>
    %6 = arith.subf %0, %5 : vector<16x256xf32>
    %7 = arith.mulf %6, %6 : vector<16x256xf32>
    %cst_2 = arith.constant dense<0.000000e+00> : vector<16xf32>
    %8 = vector.multi_reduction <add>, %7, %cst_2 [1] : vector<16x256xf32> to vector<16xf32>
    %9 = vector.shape_cast %8 : vector<16xf32> to vector<16x1xf32>
    %cst_3 = arith.constant 0.00392156886 : f32
    %10 = vector.broadcast %cst_3 : f32 to vector<16x1xf32>
    %11 = arith.mulf %9, %10 : vector<16x1xf32>
    %12 = math.sqrt %11 : vector<16x1xf32>
    %cst_4 = arith.constant 9.99999997E-7 : f32
    %13 = vector.broadcast %cst_4 : f32 to vector<16x1xf32>
    %14 = arith.addf %12, %13 : vector<16x1xf32>
    %15 = tpu.reciprocal %14 : vector<16x1xf32> -> vector<16x1xf32>
    %16 = vector.broadcast %15 : vector<16x1xf32> to vector<16x256xf32>
    %17 = arith.mulf %6, %16 : vector<16x256xf32>
    %c0_5 = arith.constant 0 : index
    %c0_6 = arith.constant 0 : index
    %18 = vector.load %arg2[%c0_5, %c0_6] : memref<16x256xf32, #tpu.memory_space<vmem>>, vector<16x256xf32>
    %cst_7 = arith.constant dense<0.000000e+00> : vector<16xf32>
    %19 = vector.multi_reduction <add>, %18, %cst_7 [1] : vector<16x256xf32> to vector<16xf32>
    %20 = vector.shape_cast %19 : vector<16xf32> to vector<16x1xf32>
    %cst_8 = arith.constant 2.560000e+02 : f32
    %21 = vector.broadcast %cst_8 : f32 to vector<16x1xf32>
    %22 = arith.divf %20, %21 : vector<16x1xf32>
    %23 = vector.broadcast %22 : vector<16x1xf32> to vector<16x256xf32>
    %24 = arith.subf %18, %23 : vector<16x256xf32>
    %25 = arith.mulf %24, %24 : vector<16x256xf32>
    %cst_9 = arith.constant dense<0.000000e+00> : vector<16xf32>
    %26 = vector.multi_reduction <add>, %25, %cst_9 [1] : vector<16x256xf32> to vector<16xf32>
    %27 = vector.shape_cast %26 : vector<16xf32> to vector<16x1xf32>
    %cst_10 = arith.constant 0.00392156886 : f32
    %28 = vector.broadcast %cst_10 : f32 to vector<16x1xf32>
    %29 = arith.mulf %27, %28 : vector<16x1xf32>
    %30 = math.sqrt %29 : vector<16x1xf32>
    %cst_11 = arith.constant 9.99999997E-7 : f32
    %31 = vector.broadcast %cst_11 : f32 to vector<16x1xf32>
    %32 = arith.addf %30, %31 : vector<16x1xf32>
    %33 = tpu.reciprocal %32 : vector<16x1xf32> -> vector<16x1xf32>
    %34 = vector.broadcast %33 : vector<16x1xf32> to vector<16x256xf32>
    %35 = arith.mulf %24, %34 : vector<16x256xf32>
    %c0_12 = arith.constant 0 : index
    %c0_13 = arith.constant 0 : index
    %36 = vector.load %arg3[%c0_12, %c0_13] : memref<16x256xf32, #tpu.memory_space<vmem>>, vector<16x256xf32>
    %cst_14 = arith.constant dense<0.000000e+00> : vector<16xf32>
    %37 = vector.multi_reduction <add>, %36, %cst_14 [1] : vector<16x256xf32> to vector<16xf32>
    %38 = vector.shape_cast %37 : vector<16xf32> to vector<16x1xf32>
    %cst_15 = arith.constant 2.560000e+02 : f32
    %39 = vector.broadcast %cst_15 : f32 to vector<16x1xf32>
    %40 = arith.divf %38, %39 : vector<16x1xf32>
    %41 = vector.broadcast %40 : vector<16x1xf32> to vector<16x256xf32>
    %42 = arith.subf %36, %41 : vector<16x256xf32>
    %43 = arith.mulf %42, %42 : vector<16x256xf32>
    %cst_16 = arith.constant dense<0.000000e+00> : vector<16xf32>
    %44 = vector.multi_reduction <add>, %43, %cst_16 [1] : vector<16x256xf32> to vector<16xf32>
    %45 = vector.shape_cast %44 : vector<16xf32> to vector<16x1xf32>
    %cst_17 = arith.constant 0.00392156886 : f32
    %46 = vector.broadcast %cst_17 : f32 to vector<16x1xf32>
    %47 = arith.mulf %45, %46 : vector<16x1xf32>
    %48 = math.sqrt %47 : vector<16x1xf32>
    %cst_18 = arith.constant 9.99999997E-7 : f32
    %49 = vector.broadcast %cst_18 : f32 to vector<16x1xf32>
    %50 = arith.addf %48, %49 : vector<16x1xf32>
    %51 = tpu.reciprocal %50 : vector<16x1xf32> -> vector<16x1xf32>
    %52 = vector.broadcast %51 : vector<16x1xf32> to vector<16x256xf32>
    %53 = arith.mulf %42, %52 : vector<16x256xf32>
    %c0_19 = arith.constant 0 : index
    %c0_20 = arith.constant 0 : index
    %54 = vector.load %arg6[%c0_19, %c0_20] : memref<256x256xf32, #tpu.memory_space<vmem>>, vector<256x256xf32>
    %cst_21 = arith.constant dense<0.000000e+00> : vector<16x256xf32>
    %55 = tpu.matmul %17, %54, %cst_21 {dimension_numbers = #tpu.dot_dimension_numbers<[1], [0], [0], [1], [0, 0, 1, 1], [], []>} : vector<16x256xf32>, vector<256x256xf32>, vector<16x256xf32> -> vector<16x256xf32>
    %c0_22 = arith.constant 0 : index
    %c0_23 = arith.constant 0 : index
    %56 = vector.load %arg9[%c0_22, %c0_23] : memref<1x256xf32, #tpu.memory_space<vmem>>, vector<1x256xf32>
    %57 = vector.broadcast %56 : vector<1x256xf32> to vector<16x256xf32>
    %58 = arith.addf %55, %57 : vector<16x256xf32>
    %c0_24 = arith.constant 0 : index
    %c0_25 = arith.constant 0 : index
    %59 = vector.load %arg12[%c0_24, %c0_25] : memref<16x256xf32, #tpu.memory_space<vmem>>, vector<16x256xf32>
    tpu.vector_store %arg12[%c0_24, %c0_25], %58 {strides = array<i32>} : memref<16x256xf32, #tpu.memory_space<vmem>>, vector<16x256xf32>,
    %c0_26 = arith.constant 0 : index
    %c0_27 = arith.constant 0 : index
    %60 = vector.load %arg7[%c0_26, %c0_27] : memref<256x256xf32, #tpu.memory_space<vmem>>, vector<256x256xf32>
    %cst_28 = arith.constant dense<0.000000e+00> : vector<16x256xf32>
    %61 = tpu.matmul %35, %60, %cst_28 {dimension_numbers = #tpu.dot_dimension_numbers<[1], [0], [0], [1], [0, 0, 1, 1], [], []>} : vector<16x256xf32>, vector<256x256xf32>, vector<16x256xf32> -> vector<16x256xf32>
    %c0_29 = arith.constant 0 : index
    %c0_30 = arith.constant 0 : index
    %62 = vector.load %arg10[%c0_29, %c0_30] : memref<1x256xf32, #tpu.memory_space<vmem>>, vector<1x256xf32>
    %63 = vector.broadcast %62 : vector<1x256xf32> to vector<16x256xf32>
    %64 = arith.addf %61, %63 : vector<16x256xf32>
    %c0_31 = arith.constant 0 : index
    %c0_32 = arith.constant 0 : index
    %65 = vector.load %arg13[%c0_31, %c0_32] : memref<16x256xf32, #tpu.memory_space<vmem>>, vector<16x256xf32>
    tpu.vector_store %arg13[%c0_31, %c0_32], %64 {strides = array<i32>} : memref<16x256xf32, #tpu.memory_space<vmem>>, vector<16x256xf32>,
    %c0_33 = arith.constant 0 : index
    %c0_34 = arith.constant 0 : index
    %66 = vector.load %arg8[%c0_33, %c0_34] : memref<256x256xf32, #tpu.memory_space<vmem>>, vector<256x256xf32>
    %cst_35 = arith.constant dense<0.000000e+00> : vector<16x256xf32>
    %67 = tpu.matmul %53, %66, %cst_35 {dimension_numbers = #tpu.dot_dimension_numbers<[1], [0], [0], [1], [0, 0, 1, 1], [], []>} : vector<16x256xf32>, vector<256x256xf32>, vector<16x256xf32> -> vector<16x256xf32>
    %c0_36 = arith.constant 0 : index
    %c0_37 = arith.constant 0 : index
    %68 = vector.load %arg11[%c0_36, %c0_37] : memref<1x256xf32, #tpu.memory_space<vmem>>, vector<1x256xf32>
    %69 = vector.broadcast %68 : vector<1x256xf32> to vector<16x256xf32>
    %70 = arith.addf %67, %69 : vector<16x256xf32>
    %c0_38 = arith.constant 0 : index
    %c0_39 = arith.constant 0 : index
    %71 = vector.load %arg14[%c0_38, %c0_39] : memref<16x256xf32, #tpu.memory_space<vmem>>, vector<16x256xf32>
    tpu.vector_store %arg14[%c0_38, %c0_39], %70 {strides = array<i32>} : memref<16x256xf32, #tpu.memory_space<vmem>>, vector<16x256xf32>,
    %c0_40 = arith.constant 0 : index
    %c0_41 = arith.constant 0 : index
    %72 = vector.load %arg4[%c0_40, %c0_41] : memref<1x256xf32, #tpu.memory_space<vmem>>, vector<1x256xf32>
    %73 = vector.broadcast %72 : vector<1x256xf32> to vector<16x256xf32>
    %74 = arith.mulf %73, %53 : vector<16x256xf32>
    %c0_42 = arith.constant 0 : index
    %c0_43 = arith.constant 0 : index
    %75 = vector.load %arg5[%c0_42, %c0_43] : memref<1x256xf32, #tpu.memory_space<vmem>>, vector<1x256xf32>
    %76 = vector.broadcast %75 : vector<1x256xf32> to vector<16x256xf32>
    %77 = arith.addf %74, %76 : vector<16x256xf32>
    %c0_44 = arith.constant 0 : index
    %c0_45 = arith.constant 0 : index
    %78 = vector.load %arg15[%c0_44, %c0_45] : memref<16x256xf32, #tpu.memory_space<vmem>>, vector<16x256xf32>
    tpu.vector_store %arg15[%c0_44, %c0_45], %77 {strides = array<i32>} : memref<16x256xf32, #tpu.memory_space<vmem>>, vector<16x256xf32>,
    return
  }
  func.func @transform_0(%arg0: i32) -> (i32, i32) {
    %c0_i32 = arith.constant 0 : i32
    %c0_i32_0 = arith.constant 0 : i32
    return %arg0, %c0_i32 : i32, i32
  }
  func.func @transform_1(%arg0: i32) -> (i32, i32) {
    %c0_i32 = arith.constant 0 : i32
    %c0_i32_0 = arith.constant 0 : i32
    return %arg0, %c0_i32 : i32, i32
  }
  func.func @transform_2(%arg0: i32) -> (i32, i32) {
    %c0_i32 = arith.constant 0 : i32
    %c0_i32_0 = arith.constant 0 : i32
    return %arg0, %c0_i32 : i32, i32
  }
  func.func @transform_3(%arg0: i32) -> (i32, i32) {
    %c0_i32 = arith.constant 0 : i32
    %c0_i32_0 = arith.constant 0 : i32
    %c0_i32_1 = arith.constant 0 : i32
    return %c0_i32, %c0_i32_0 : i32, i32
  }
  func.func @transform_4(%arg0: i32) -> (i32, i32) {
    %c0_i32 = arith.constant 0 : i32
    %c0_i32_0 = arith.constant 0 : i32
    %c0_i32_1 = arith.constant 0 : i32
    return %c0_i32, %c0_i32_0 : i32, i32
  }
  func.func @transform_5(%arg0: i32) -> (i32, i32) {
    %c0_i32 = arith.constant 0 : i32
    %c0_i32_0 = arith.constant 0 : i32
    %c0_i32_1 = arith.constant 0 : i32
    return %c0_i32, %c0_i32_0 : i32, i32
  }
  func.func @transform_6(%arg0: i32) -> (i32, i32) {
    %c0_i32 = arith.constant 0 : i32
    %c0_i32_0 = arith.constant 0 : i32
    %c0_i32_1 = arith.constant 0 : i32
    return %c0_i32, %c0_i32_0 : i32, i32
  }
  func.func @transform_7(%arg0: i32) -> (i32, i32) {
    %c0_i32 = arith.constant 0 : i32
    %c0_i32_0 = arith.constant 0 : i32
    %c0_i32_1 = arith.constant 0 : i32
    return %c0_i32, %c0_i32_0 : i32, i32
  }
  func.func @transform_8(%arg0: i32) -> (i32, i32) {
    %c0_i32 = arith.constant 0 : i32
    %c0_i32_0 = arith.constant 0 : i32
    %c0_i32_1 = arith.constant 0 : i32
    return %c0_i32, %c0_i32_0 : i32, i32
  }
  func.func @transform_9(%arg0: i32) -> (i32, i32) {
    %c0_i32 = arith.constant 0 : i32
    %c0_i32_0 = arith.constant 0 : i32
    %c0_i32_1 = arith.constant 0 : i32
    return %c0_i32, %c0_i32_0 : i32, i32
  }
  func.func @transform_10(%arg0: i32) -> (i32, i32) {
    %c0_i32 = arith.constant 0 : i32
    %c0_i32_0 = arith.constant 0 : i32
    %c0_i32_1 = arith.constant 0 : i32
    return %c0_i32, %c0_i32_0 : i32, i32
  }
  func.func @transform_11(%arg0: i32) -> (i32, i32) {
    %c0_i32 = arith.constant 0 : i32
    %c0_i32_0 = arith.constant 0 : i32
    return %arg0, %c0_i32 : i32, i32
  }
  func.func @transform_12(%arg0: i32) -> (i32, i32) {
    %c0_i32 = arith.constant 0 : i32
    %c0_i32_0 = arith.constant 0 : i32
    return %arg0, %c0_i32 : i32, i32
  }
  func.func @transform_13(%arg0: i32) -> (i32, i32) {
    %c0_i32 = arith.constant 0 : i32
    %c0_i32_0 = arith.constant 0 : i32
    return %arg0, %c0_i32 : i32, i32
  }
  func.func @transform_14(%arg0: i32) -> (i32, i32) {
    %c0_i32 = arith.constant 0 : i32
    %c0_i32_0 = arith.constant 0 : i32
    return %arg0, %c0_i32 : i32, i32
  }
}

</mosaic_0001>

<bundles_post_ra>
// kernel: tpu_custom_call.1
= control target key start
LH: loop header
LB: loop body
LE: loop exit
PB: predicated region body
PF: predicated region fallthrough
CT: control target
= control target key end

     0   :  { %s3109_s0 = inlined_call_operand.hbm [shape: f32[32,256], index: 0, kind: input, shape index: {}]   ;;  %s3110_s1 = inlined_call_operand.hbm [shape: f32[32,256], index: 1, kind: input, shape index: {}]   ;;  %s3111_s2 = inlined_call_operand.hbm [shape: f32[32,256], index: 2, kind: input, shape index: {}]   ;;  %s3112_s3 = inlined_call_operand.vmem [shape: f32[1,256], index: 3, kind: input, shape index: {}]   ;;  %s3113_s4 = inlined_call_operand.vmem [shape: f32[1,256], index: 4, kind: input, shape index: {}]   ;;  %s3114_s5 = inlined_call_operand.hbm [shape: f32[256,256], index: 5, kind: input, shape index: {}]   ;;  %s3115_s6 = inlined_call_operand.hbm [shape: f32[256,256], index: 6, kind: input, shape index: {}]   ;;  %s3116_s7 = inlined_call_operand.hbm [shape: f32[256,256], index: 7, kind: input, shape index: {}]   ;;  %s3117_s8 = inlined_call_operand.vmem [shape: f32[1,256], index: 8, kind: input, shape index: {}]   ;;  %s3118_s9 = inlined_call_operand.vmem [shape: f32[1,256], index: 9, kind: input, shape index: {}]   ;;  %s3119_s10 = inlined_call_operand.vmem [shape: f32[1,256], index: 10, kind: input, shape index: {}]   ;;  %s3120_s11 = inlined_call_operand.hbm [shape: f32[32,256], index: 11, kind: output, shape index: {0}]   ;;  %s3121_s12 = inlined_call_operand.hbm [shape: f32[32,256], index: 12, kind: output, shape index: {1}]   ;;  %s3122_s13 = inlined_call_operand.hbm [shape: f32[32,256], index: 13, kind: output, shape index: {2}]   ;;  %s3123_s14 = inlined_call_operand.hbm [shape: f32[32,256], index: 14, kind: output, shape index: {3}]  }
   0x1   :  { %3154 = sst [smem:[#allocation32_spill]] %s3110_s1 }
   0x2   :  { %3155 = sst [smem:[#allocation33_spill]] %s3112_s3 }
   0x3   :  { %3156 = sst [smem:[#allocation34_spill]] %s3113_s4 }
   0x4   :  { %3157 = sst [smem:[#allocation35_spill]] %s3114_s5 }
   0x5   :  { %3158 = sst [smem:[#allocation36_spill]] %s3117_s8 }
   0x6   :  { %3159 = sst [smem:[#allocation37_spill]] %s3118_s9 }
   0x7   :  { %3160 = sst [smem:[#allocation38_spill]] %s3119_s10 }
   0x8   :  { %3161 = sst [smem:[#allocation39_spill]] %s3120_s11 }
   0x9   :  { %3162 = sst [smem:[#allocation40_spill]] %s3121_s12 }
   0xa   :  { %3163 = sst [smem:[#allocation41_spill]] %s3122_s13 }
   0xb   :  { %3164 = sst [smem:[#allocation42_spill]] %s3123_s14 }
   0xc   :  { %20 = vsyncpa [#allocation3], 0 }
   0xd   :  { %22 = vsyncpa [#allocation3 + $0x1], 0 }
   0xe   :  { %23 = vsyncpa [#allocation6], 0 }
   0xf   :  { %25 = vsyncpa [#allocation6 + $0x1], 0 }
  0x10   :  { %26 = vsyncpa [#allocation9], 0 }
  0x11   :  { %27 = vsyncpa [#allocation12], 0 }
  0x12   :  { %28 = vsyncpa [#allocation4], 0 }
  0x13   :  { %30 = vsyncpa [#allocation4 + $0x1], 0 }
  0x14   :  { %31 = vsyncpa [#allocation15], 0 }
  0x15   :  { %33 = vsyncpa [#allocation15 + $0x1], 0 }
  0x16   :  { %34 = vsyncpa [#allocation18], 0 }
  0x17   :  { %36 = vsyncpa [#allocation18 + $0x1], 0  ;;  %s2472_s29 = smov 0   ;;  %s2474_s30 = smov 0  }
  0x18   :  { %s2476_s15 = smov 0   ;;  %s2478_s16 = smov 0  }
  0x19 LB: > { %3165 = sst [smem:[#allocation26_spill]] %s2369_s29  ;;  %s2493_s17 = sadd.s32 4294967295, %s2381_s16   ;;  %s2381_s16 = sphi %s2478_s16, %s3214_s16   ;;  %s2377_s15 = sphi %s2476_s15, %s3218_s15   ;;  %s2373_s30 = sphi %s2474_s30, %s3217_s30   ;;  %s2369_s29 = sphi %s2472_s29, %s3216_s29  }
  0x1a   : > { %3166 = sst [smem:[#allocation27_spill]] %s2381_s16  ;;  %s3124_s18 = sadd.s32 4294967294, %s2381_s16  }
  0x1b   : > { %s2497_s19 = sadd.s32 1, %s2381_s16   ;;  %s49_s20 = sadd.s32 1, %s2377_s15 }
  0x1c   : > { %3167 = sst [smem:[#allocation28_spill]] %s2497_s19  ;;  %s46_s21 = ssub.s32 %s2381_s16, %s2497_s19 }
  0x1d   : > { %p56_p0 = scmp.ne.s32.totalorder %s2377_s15, %s2373_s30  ;;  %p47_p1 = scmp.eq.s32.totalorder %s46_s21, 0 }
  0x1e   : > { %p57_p2 = scmp.eq.s32.totalorder %s2381_s16, 0  ;;  %p62_p3 = scmp.ne.s32.totalorder %s2373_s30, %s2369_s29 }
  0x1f   : > { %p3132_p4 = scmp.eq.s32.totalorder %s2493_s17, 0  ;;  %p306_p7 = scmp.eq.s32.totalorder %s2493_s17, 1 }
  0x20   : > { %s2509_s22 = scalar_select %p47_p1, %s2377_s15, %s49_s20  }
  0x21   : > { %p2511_p5 = por %p57_p2, %p56_p0  ;;  %p2517_p6 = por %p3132_p4, %p62_p3 }
  0x22   : > { %3168 = sst [smem:[#allocation29_spill]] %s2509_s22  ;;  %p312_p8 = scmp.eq.s32.totalorder %s3124_s18, 1 }
  0x23   : > { %s3169_s23 = scalar_select %p2511_p5, 1, 0 }
  0x24   : > { %s3170_s24 = scalar_select %p2517_p6, 1, 0 }
  0x25   : > { %p1623_p9 = scmp.ge.s32.totalorder %s2381_s16, 1  ;;  %p397_p10 = scmp.lt.s32.totalorder %s2381_s16, 3 }
  0x26   : > { %p2526_p11 = por %p306_p7, %p56_p0  ;;  %p2530_p12 = por %p312_p8, %p62_p3 }
  0x27   : > { %p2534_p13 = pnand %p1623_p9, %p397_p10  ;;  %s2383_s28 = smov [#allocation8]  }
  0x28   : > { %s3171_s25 = scalar_select %p2526_p11, 1, 0 }
  0x29   : > { %s3173_s26 = scalar_select %p2530_p12, 1, 0 }
  0x2a   : > { %3172 = sst [smem:[#allocation30_spill]] %s3171_s25  ;;  %p1933_p1 = pneg %p2534_p13 }
  0x2b   : > { %3174 = sst [smem:[#allocation31_spill]] %s3173_s26  ;;  %s415_s20 = sshll.u32 %s2383_s28, 4  ;;  %s416_s20 = int_to_ptr.vmem [resolvable:$true] %s415_s20 }
  0x2c   : > { %s3175_s27 = scalar_select %p2534_p13, 1, 0 }
  0x2d   : > { %p2542_p2 = pnand %p1933_p1, %p3132_p4  ;;  %s3131_s18 = sand.u32 1, %s2377_s15  }
  0x2e   : > { %s2551_s22 = sshll.u32 %s3131_s18, 5  ;;  %s3177_s5 = sld [smem:[#allocation35_spill]] }
  0x2f   : > { %s3176_s21 = scalar_select %p2542_p2, 1, 0 }
  0x30   : > { %p2561_p8 = pneg %p2542_p2 }
  0x32   : > { %s3178_s28 = scalar_select %p2561_p8, 1, 0 }
  0x34   : > { %s2037_s29 = scalar_lea.hbm %s3177_s5, 8192 }
  0x35   : > { %p2038_p7 = scmp.ne.s32.totalorder %s3177_s5, %s2037_s29  ;;  %p2044_p1 = scmp.lt.u32.totalorder %s2037_s29, %s3177_s5 }
  0x37   : > { %p2040_p9 = pnand %p2561_p8, %p2038_p7 }
  0x39   : > { %p2041_p10 = pneg %p2040_p9 }
  0x3b   : > { %p2046_p0 = pnand %p2044_p1, %p2041_p10 }
  0x3d   : > { %2049 = shalt.err (!%p2046_p0)
}
  0x3e   : > { %s2050_s19 = scalar_lea.vmem %s416_s20, 8192  ;;  %p2058_p11 = scmp.lt.s32.totalorder %s416_s20, %s416_s20 }
  0x3f   : > { %p2051_p4 = scmp.ne.s32.totalorder %s416_s20, %s2050_s19  ;;  %p2059_p6 = scmp.lt.s32.totalorder %s2050_s19, %s2050_s19 }
  0x41   : > { %p2053_p3 = pnand %p2051_p4, %p2561_p8  ;;  %p2060_p13 = por %p2059_p6, %p2058_p11 }
  0x43   : > { %p2054_p12 = pneg %p2053_p3 }
  0x45   : > { %p2061_p5 = pnand %p2060_p13, %p2054_p12 }
  0x47   : > { %2064 = shalt.err (!%p2061_p5)
}
  0x48   : > { %s3137_s10 = smov 256   ;;  %s3139_s12 = smov 16  }
  0x49   : > { %1936 = dma.hbm_to_vmem [thread:$0]  (!%p2542_p2), %s3177_s5, 8192, %s416_s20, [#allocation9], %s3137_s10, %s3137_s10, %s3139_s12  }
  0x4a   : > { %s2581_s18 = sshll.u32 %s2381_s16, 9  ;;  %p3179_p4 = scmp.ne.s32.totalorder %s3169_s23, 0 }
  0x4b   : > { %p3180_p5 = scmp.lt.s32.totalorder %s2381_s16, 2  ;;  %s486_s19 = sand.u32 1, %s2381_s16  }
  0x4c   : > { %s3182_s1 = sld [smem:[#allocation32_spill]]  ;;  %s490_s20 = scalar_lea.vmem [#allocation5], %s2551_s22 }
  0x4d   : > { %p2587_p6 = pnand %p3180_p5, %p3179_p4  ;;  %s498_s13 = sshll.u32 %s490_s20, 4  ;;  %s2599_s13 = int_to_ptr.vmem [resolvable:$true] %s498_s13 }
  0x4e   : > { %s2601_s23 = scalar_lea.sflag [#allocation6], %s486_s19 }
  0x4f   : > { %s3181_s26 = scalar_select %p2587_p6, 1, 0 }
  0x50   : > { %p2607_p12 = pneg %p2587_p6 }
  0x52   : > { %s2596_s8 = scalar_lea.hbm %s3182_s1, %s2581_s18  ;;  %s2070_s12 = scalar_lea.hbm %s3182_s1, 1024 }
  0x53   : > { %s2065_s29 = scalar_lea.hbm %s2596_s8, 512  ;;  %p2071_p3 = scmp.lt.u32.totalorder %s2596_s8, %s3182_s1 }
  0x54   : > { %p2066_p11 = scmp.ne.s32.totalorder %s2596_s8, %s2065_s29  ;;  %p2072_p7 = scmp.lt.u32.totalorder %s2070_s12, %s2065_s29 }
  0x55   : > { %s3183_s10 = scalar_select %p2607_p12, 1, 0 }
  0x56   : > { %p2068_p13 = pnand %p2607_p12, %p2066_p11  ;;  %p2073_p9 = por %p2072_p7, %p2071_p3 }
  0x57   : > { %p2074_p10 = scmp.lt.u32.totalorder %s2065_s29, %s2596_s8 }
  0x58   : > { %p2069_p0 = pneg %p2068_p13 }
  0x59   : > { %p2075_p1 = por %p2074_p10, %p2073_p9 }
  0x5b   : > { %p2076_p4 = pnand %p2075_p1, %p2069_p0 }
  0x5d   : > { %2079 = shalt.err (!%p2076_p4)
}
  0x5e   : > { %s2080_s19 = scalar_lea.vmem %s2599_s13, 512  ;;  %s2386_s9 = smov [#allocation5]  }
  0x5f   : > { %p2081_p5 = scmp.ne.s32.totalorder %s2599_s13, %s2080_s19  ;;  %s2085_s11 = sshll.u32 %s2386_s9, 4  ;;  %s2086_s11 = int_to_ptr.vmem [resolvable:$false] %s2085_s11 }
  0x60   : > { %s2087_s5 = scalar_lea.vmem %s2086_s11, 1024  ;;  %p2088_p2 = scmp.lt.s32.totalorder %s2599_s13, %s2086_s11 }
  0x61   : > { %p2083_p11 = pnand %p2081_p5, %p2607_p12  ;;  %p2089_p8 = scmp.lt.s32.totalorder %s2087_s5, %s2080_s19 }
  0x63   : > { %p2084_p13 = pneg %p2083_p11  ;;  %p2090_p3 = por %p2089_p8, %p2088_p2 }
  0x65   : > { %p2091_p7 = pnand %p2090_p3, %p2084_p13 }
  0x67   : > { %2094 = shalt.err (!%p2091_p7)
}
  0x68   : > { %s3184_s12 = smov 16   ;;  %s3185_s29 = smov 256  }
  0x69   : > { %1949 = dma.hbm_to_vmem [thread:$0]  (!%p2587_p6), %s2596_s8, 512, %s2599_s13, %s2601_s23, %s3185_s29, %s3185_s29, %s3184_s12  }
  0x6a   : > { %s2387_s20 = smov [#allocation10]   ;;  %s2388_s9 = smov [#allocation11]  }
  0x6b   : > { %s428_s1 = sshll.u32 %s2387_s20, 4  ;;  %s441_s16 = sshll.u32 %s2388_s9, 4  ;;  %s429_s1 = int_to_ptr.vmem [resolvable:$true] %s428_s1  ;;  %s442_s16 = int_to_ptr.vmem [resolvable:$true] %s441_s16 }
  0x6c   : > { %s2095_s5 = scalar_lea.hbm %s3115_s6, 8192  ;;  %p3186_p8 = scmp.ne.s32.totalorder %s3178_s28, 0 }
  0x6d   : > { %p2096_p2 = scmp.ne.s32.totalorder %s3115_s6, %s2095_s5  ;;  %p2102_p10 = scmp.lt.u32.totalorder %s2095_s5, %s3115_s6 }
  0x6f   : > { %p2098_p0 = pnand %p2096_p2, %p3186_p8 }
  0x71   : > { %p2099_p9 = pneg %p2098_p0 }
  0x73   : > { %p2104_p1 = pnand %p2102_p10, %p2099_p9 }
  0x75   : > { %2107 = shalt.err (!%p2104_p1)
}
  0x76   : > { %s2108_s8 = scalar_lea.vmem %s429_s1, 8192  ;;  %p2116_p13 = scmp.lt.s32.totalorder %s429_s1, %s429_s1 }
  0x77   : > { %p2109_p4 = scmp.ne.s32.totalorder %s429_s1, %s2108_s8  ;;  %p2117_p3 = scmp.lt.s32.totalorder %s2108_s8, %s2108_s8 }
  0x79   : > { %p2111_p5 = pnand %p2109_p4, %p3186_p8  ;;  %p2118_p7 = por %p2117_p3, %p2116_p13 }
  0x7b   : > { %p2112_p11 = pneg %p2111_p5 }
  0x7d   : > { %p2119_p6 = pnand %p2118_p7, %p2112_p11 }
  0x7f   : > { %2122 = shalt.err (!%p2119_p6)
}
  0x80   : > { %p3187_p2 = scmp.ne.s32.totalorder %s3176_s21, 0  ;;  %s2123_s13 = scalar_lea.hbm %s3116_s7, 8192 }
  0x81   : > { %p2124_p0 = scmp.ne.s32.totalorder %s3116_s7, %s2123_s13  ;;  %p2130_p10 = scmp.lt.u32.totalorder %s2123_s13, %s3116_s7 }
  0x82   : > { %1939 = dma.hbm_to_vmem [thread:$0]  (!%p3187_p2), %s3115_s6, 8192, %s429_s1, [#allocation9], %s3185_s29, %s3185_s29, %s3184_s12  }
  0x83   : > { %p2126_p6 = pnand %p2124_p0, %p3186_p8 }
  0x85   : > { %p2127_p9 = pneg %p2126_p6 }
  0x87   : > { %p2132_p1 = pnand %p2130_p10, %p2127_p9 }
  0x89   : > { %2135 = shalt.err (!%p2132_p1)
}
  0x8a   : > { %s2136_s5 = scalar_lea.vmem %s442_s16, 8192  ;;  %p2144_p13 = scmp.lt.s32.totalorder %s442_s16, %s442_s16 }
  0x8b   : > { %p2137_p4 = scmp.ne.s32.totalorder %s442_s16, %s2136_s5  ;;  %p2145_p3 = scmp.lt.s32.totalorder %s2136_s5, %s2136_s5 }
  0x8d   : > { %p2139_p5 = pnand %p2137_p4, %p3186_p8  ;;  %p2146_p7 = por %p2145_p3, %p2144_p13 }
  0x8f   : > { %p2140_p11 = pneg %p2139_p5 }
  0x91   : > { %p2147_p12 = pnand %p2146_p7, %p2140_p11 }
  0x93   : > { %2150 = shalt.err (!%p2147_p12)
}
  0x94   : > { %1942 = dma.hbm_to_vmem [thread:$0]  (!%p3187_p2), %s3116_s7, 8192, %s442_s16, [#allocation12], %s3185_s29, %s3185_s29, %s3184_s12  }
  0x95   : > { %s2680_s4 = scalar_lea.hbm %s3109_s0, %s2581_s18  ;;  %s468_s21 = scalar_lea.vmem [#allocation2], %s2551_s22 }
  0x96   : > { %s476_s14 = sshll.u32 %s468_s21, 4  ;;  %s2689_s20 = scalar_lea.hbm %s3111_s2, %s2581_s18  ;;  %s2683_s14 = int_to_ptr.vmem [resolvable:$true] %s476_s14 }
  0x97   : > { %s3188_s9 = sand.u32 1, %s2377_s15   ;;  %s2151_s11 = scalar_lea.hbm %s2680_s4, 512 }
  0x98   : > { %s2693_s16 = scalar_lea.sflag [#allocation3], %s3188_s9  ;;  %p2152_p12 = scmp.ne.s32.totalorder %s2680_s4, %s2151_s11 }
  0x99   : > { %p3189_p8 = scmp.ne.s32.totalorder %s3183_s10, 0  ;;  %s2156_s1 = scalar_lea.hbm %s3109_s0, 1024 }
  0x9a   : > { %p2157_p6 = scmp.lt.u32.totalorder %s2680_s4, %s3109_s0  ;;  %p2158_p9 = scmp.lt.u32.totalorder %s2156_s1, %s2151_s11 }
  0x9b   : > { %p2154_p2 = pnand %p2152_p12, %p3189_p8  ;;  %p2160_p1 = scmp.lt.u32.totalorder %s2151_s11, %s2680_s4 }
  0x9c   : > { %p2159_p10 = por %p2158_p9, %p2157_p6 }
  0x9d   : > { %p2155_p0 = pneg %p2154_p2 }
  0x9e   : > { %p2161_p4 = por %p2160_p1, %p2159_p10 }
  0xa0   : > { %p2162_p5 = pnand %p2161_p4, %p2155_p0 }
  0xa2   : > { %2165 = shalt.err (!%p2162_p5)
}
  0xa3   : > { %s2166_s18 = scalar_lea.vmem %s2683_s14, 512  ;;  %s2389_s3 = smov [#allocation2]  }
  0xa4   : > { %p2167_p11 = scmp.ne.s32.totalorder %s2683_s14, %s2166_s18  ;;  %s2171_s21 = sshll.u32 %s2389_s3, 4  ;;  %s2172_s21 = int_to_ptr.vmem [resolvable:$false] %s2171_s21 }
  0xa5   : > { %s2173_s25 = scalar_lea.vmem %s2172_s21, 1024  ;;  %p2174_p7 = scmp.lt.s32.totalorder %s2683_s14, %s2172_s21 }
  0xa6   : > { %p2169_p13 = pnand %p2167_p11, %p3189_p8  ;;  %p2175_p12 = scmp.lt.s32.totalorder %s2173_s25, %s2166_s18 }
  0xa8   : > { %p2170_p3 = pneg %p2169_p13  ;;  %p2176_p2 = por %p2175_p12, %p2174_p7 }
  0xaa   : > { %p2177_p6 = pnand %p2176_p2, %p2170_p3 }
  0xac   : > { %2180 = shalt.err (!%p2177_p6)
}
  0xad   : > { %p3190_p0 = scmp.ne.s32.totalorder %s3181_s26, 0  ;;  %s512_s13 = scalar_lea.vmem [#allocation7], %s2551_s22 }
  0xae   : > { %s520_s9 = sshll.u32 %s512_s13, 4  ;;  %s2181_s11 = scalar_lea.hbm %s2689_s20, 512  ;;  %s2721_s9 = int_to_ptr.vmem [resolvable:$true] %s520_s9 }
  0xaf   : > { %1946 = dma.hbm_to_vmem [thread:$0]  (!%p3190_p0), %s2680_s4, 512, %s2683_s14, %s2693_s16, %s3185_s29, %s3185_s29, %s3184_s12  }
  0xb0   : > { %p2182_p9 = scmp.ne.s32.totalorder %s2689_s20, %s2181_s11  ;;  %s2186_s1 = scalar_lea.hbm %s3111_s2, 1024 }
  0xb1   : > { %p2187_p4 = scmp.lt.u32.totalorder %s2689_s20, %s3111_s2  ;;  %p2188_p5 = scmp.lt.u32.totalorder %s2186_s1, %s2181_s11 }
  0xb2   : > { %p2184_p10 = pnand %p2182_p9, %p3189_p8  ;;  %p2190_p13 = scmp.lt.u32.totalorder %s2181_s11, %s2689_s20 }
  0xb3   : > { %p2189_p11 = por %p2188_p5, %p2187_p4 }
  0xb4   : > { %p2185_p1 = pneg %p2184_p10 }
  0xb5   : > { %p2191_p3 = por %p2190_p13, %p2189_p11 }
  0xb7   : > { %p2192_p7 = pnand %p2191_p3, %p2185_p1 }
  0xb9   : > { %2195 = shalt.err (!%p2192_p7)
}
  0xba   : > { %s2196_s22 = scalar_lea.vmem %s2721_s9, 512  ;;  %s2390_s4 = smov [#allocation7]  }
  0xbb   : > { %p2197_p12 = scmp.ne.s32.totalorder %s2721_s9, %s2196_s22  ;;  %s2201_s14 = sshll.u32 %s2390_s4, 4  ;;  %s2202_s14 = int_to_ptr.vmem [resolvable:$false] %s2201_s14 }
  0xbc   : > { %s2203_s16 = scalar_lea.vmem %s2202_s14, 1024  ;;  %p2204_p9 = scmp.lt.s32.totalorder %s2721_s9, %s2202_s14 }
  0xbd   : > { %p2199_p2 = pnand %p2197_p12, %p3189_p8  ;;  %p2205_p10 = scmp.lt.s32.totalorder %s2203_s16, %s2196_s22 }
  0xbf   : > { %p2200_p6 = pneg %p2199_p2  ;;  %p2206_p4 = por %p2205_p10, %p2204_p9 }
  0xc1   : > { %p2207_p5 = pnand %p2206_p4, %p2200_p6 }
  0xc3   : > { %2210 = shalt.err (!%p2207_p5)
}
  0xc4   : > { %1952 = dma.hbm_to_vmem [thread:$0]  (!%p3190_p0), %s2689_s20, 512, %s2721_s9, %s2601_s23, %s3185_s29, %s3185_s29, %s3184_s12  }
  0xc5   : > { %p3191_p8 = scmp.ne.s32.totalorder %s3175_s27, 0 }
  0xc6   : > { %s2751_s10 = sand.u32 (!%p3191_p8), 1, %s2373_s30   ;;  %p3192_p1 = scmp.ne.s32.totalorder (!%p3191_p8), %s3170_s24, 0 }
  0xc7   : > { %532 = sbr.rel (%p3191_p8) target bundleno = 841 (0x349), region = 64  ;;  %s2754_s18 = sshll.u32 (!%p3191_p8), %s2751_s10, 5 }
  0xc8   : > { %s535_s26 = scalar_lea.sflag (!%p3191_p8), [#allocation3], %s2751_s10  ;;  %s538_s3 = scalar_lea.vmem (!%p3191_p8), [#allocation2], %s2754_s18 }
  0xce   : > { %2340 = dma.done.wait (%p3192_p1), %s535_s26, 512  }
  0xcf   : > { %2342 = vsyncadd (%p3192_p1), %s535_s26, 4294966784  ;;  %s543_s27 = sand.u32 1, %s2493_s17   ;;  %s547_s12 = scalar_lea.vmem [#allocation5], %s2754_s18 }
  0xd0   : > { %s544_s23 = scalar_lea.sflag [#allocation6], %s543_s27 }
  0xd1   : > { %2344 = dma.done.wait (%p3192_p1), %s544_s23, 1024  }
  0xd2   : > { %2346 = vsyncadd (%p3192_p1), %s544_s23, 4294966272  ;;  %s556_s29 = scalar_lea.vmem [#allocation7], %s2754_s18  ;;  %p3193_p0 = scmp.eq.s32.totalorder %s2493_s17, 0 }
  0xd4   : > { %2348 = dma.done.wait (%p3193_p0), [#allocation9], 16384   ;;  %p3194_p11 = pmov %p3193_p0 }
  0xd5   : > { %p3195_p13 = pmov %p3193_p0 }
  0xd6   : > { %2350 = vsyncadd (%p3194_p11), [#allocation9], 4294950912 }
  0xd7   : > { %2352 = dma.done.wait (%p3195_p13), [#allocation12], 8192   ;;  %p3196_p3 = pmov %p3193_p0 }
  0xd8   : > { %v2779_v0 = vld [vmem:[%s538_s3] sm:$0xff]  ;;  %v2781_v1 = vld [vmem:[%s538_s3 + $0x8] sm:$0xff]  ;;  %v2783_v2 = vld [vmem:[%s538_s3 + $0x10] sm:$0xff]  ;;  %s3197_s21 = sld [smem:[#allocation33_spill]]  ;;  %s3198_s9 = sld [smem:[#allocation34_spill]] }
  0xd9   : > { %2354 = vsyncadd (%p3196_p3), [#allocation12], 4294959104  ;;  %v649_v3 = vadd.f32 %v2781_v1, %v2779_v0  ;;  %v2787_v4 = vld [vmem:[%s538_s3 + $0x18] sm:$0xff]  ;;  %v2789_v5 = vld [vmem:[%s547_s12] sm:$0xff]  ;;  %s2912_s11 = scalar_lea.vmem [#allocation17], %s2754_s18  ;;  %s3199_s19 = sld [smem:[#allocation30_spill]] }
  0xda   : > { %v2791_v6 = vld [vmem:[%s547_s12 + $0x8] sm:$0xff]  ;;  %v652_v7 = vadd.f32 %v2787_v4, %v2783_v2  ;;  %v2795_v8 = vld [vmem:[%s547_s12 + $0x10] sm:$0xff]  ;;  %v2797_v9 = vld [vmem:[%s547_s12 + $0x18] sm:$0xff]  ;;  %s2921_s5 = sshll.u32 %s2493_s17, 9  ;;  %s3200_s28 = sld [smem:[#allocation42_spill]] }
  0xdb   : > { %650 = vadd.xlane.f32.xlu0 %v649_v3  ;;  %v700_v10 = vadd.f32 %v2791_v6, %v2789_v5  ;;  %v703_v11 = vadd.f32 %v2797_v9, %v2795_v8  ;;  %v2803_v12 = vld [vmem:[%s556_s29] sm:$0xff]  ;;  %v2805_v13 = vld [vmem:[%s556_s29 + $0x8] sm:$0xff]  ;;  %v2807_v14 = vld [vmem:[%s556_s29 + $0x10] sm:$0xff]  ;;  %s1384_s4 = sshll.u32 %s2912_s11, 4  ;;  %s1319_s14 = scalar_lea.sflag [#allocation18], %s2751_s10  ;;  %s2930_s4 = int_to_ptr.vmem [resolvable:$true] %s1384_s4 }
  0xdc   : > { %653 = vadd.xlane.f32.xlu1 %v652_v7  ;;  %v2809_v15 = vld [vmem:[%s556_s29 + $0x18] sm:$0xff]  ;;  %v750_v16 = vadd.f32 %v2805_v13, %v2803_v12  ;;  %v797_v18 = vld [vmem:[#allocation8 + $0x8] sm:$0xff]  ;;  %v796_v20 = vld [vmem:[#allocation8] sm:$0xff]  ;;  %s2211_s16 = scalar_lea.vmem %s2930_s4, 512  ;;  %s2391_s26 = smov [#allocation17]  }
  0xdd   : > { %v753_v17 = vadd.f32 %v2809_v15, %v2807_v14  ;;  %v799_v19 = vld [vmem:[#allocation8 + $0x18] sm:$0xff]  ;;  %v798_v22 = vld [vmem:[#allocation8 + $0x10] sm:$0xff]  ;;  %v801_v23 = vld [vmem:[#allocation8 + $0x28] sm:$0xff]  ;;  %p2212_p7 = scmp.ne.s32.totalorder %s2930_s4, %s2211_s16  ;;  %s2215_s3 = sshll.u32 %s2391_s26, 4  ;;  %s2216_s3 = int_to_ptr.vmem [resolvable:$false] %s2215_s3 }
  0xde   : > { %v1683_v21 = vpack.c.bf16 %v799_v19, %v797_v18  ;;  %v803_v24 = vld [vmem:[#allocation8 + $0x38] sm:$0xff]  ;;  %v1685_v25 = vpack.c.bf16 %v798_v22, %v796_v20  ;;  %v954_v27 = vld [vmem:[#allocation10 + $0x8] sm:$0xff]  ;;  %v800_v29 = vld [vmem:[#allocation8 + $0x20] sm:$0xff]  ;;  %s2217_s23 = scalar_lea.vmem %s2216_s3, 1024  ;;  %p2218_p9 = scmp.lt.s32.totalorder %s2930_s4, %s2216_s3 }
  0xdf   : > { %701 = vadd.xlane.f32.xlu0 %v700_v10  ;;  %v1687_v26 = vpack.c.bf16 %v803_v24, %v801_v23  ;;  %v956_v28 = vld [vmem:[#allocation10 + $0x18] sm:$0xff]  ;;  %v802_v31 = vld [vmem:[#allocation8 + $0x30] sm:$0xff]  ;;  %v953_v32 = vld [vmem:[#allocation10] sm:$0xff]  ;;  %p3201_p12 = scmp.ne.s32.totalorder %s3199_s19, 0  ;;  %p2219_p10 = scmp.lt.s32.totalorder %s2217_s23, %s2211_s16 }
  0xe0   : > { %704 = vadd.xlane.f32.xlu1 %v703_v11  ;;  %1684 = vmatprep.subr.bf16.mxu0 %v1683_v21  ;;  %v1747_v30 = vpack.c.bf16 %v956_v28, %v954_v27  ;;  %v955_v33 = vld [vmem:[#allocation10 + $0x10] sm:$0xff]  ;;  %v1689_v34 = vpack.c.bf16 %v802_v31, %v800_v29  ;;  %v805_v36 = vld [vmem:[#allocation8 + $0x48] sm:$0xff]  ;;  %v807_v37 = vld [vmem:[#allocation8 + $0x58] sm:$0xff]  ;;  %s2927_s22 = scalar_lea.hbm %s3200_s28, %s2921_s5 }
  0xe1   : > { %1686 = vmatpush1.bf16.msra.mxu0 %v1685_v25  ;;  %v1749_v35 = vpack.c.bf16 %v955_v33, %v953_v32  ;;  %v958_v38 = vld [vmem:[#allocation10 + $0x28] sm:$0xff]  ;;  %v1691_v39 = vpack.c.bf16 %v807_v37, %v805_v36  ;;  %v960_v40 = vld [vmem:[#allocation10 + $0x38] sm:$0xff]  ;;  %v804_v41 = vld [vmem:[#allocation8 + $0x40] sm:$0xff]  ;;  %p2213_p2 = pnand %p2212_p7, %p3201_p12  ;;  %p2220_p4 = por %p2219_p10, %p2218_p9 }
  0xe2   : > { %1688 = vmatprep.subr.bf16.mxu0 %v1687_v26  ;;  %1748 = vmatprep.subr.bf16.mxu1 %v1747_v30  ;;  %v806_v42 = vld [vmem:[#allocation8 + $0x50] sm:$0xff]  ;;  %v1751_v43 = vpack.c.bf16 %v960_v40, %v958_v38  ;;  %v957_v44 = vld [vmem:[#allocation10 + $0x20] sm:$0xff]  ;;  %v809_v46 = vld [vmem:[#allocation8 + $0x68] sm:$0xff] }
  0xe3   : > { %751 = vadd.xlane.f32.xlu0 %v750_v16  ;;  %1750 = vmatpush1.bf16.msra.mxu1 %v1749_v35  ;;  %v959_v45 = vld [vmem:[#allocation10 + $0x30] sm:$0xff]  ;;  %v811_v48 = vld [vmem:[#allocation8 + $0x78] sm:$0xff]  ;;  %v962_v49 = vld [vmem:[#allocation10 + $0x48] sm:$0xff]  ;;  %v1693_v51 = vpack.c.bf16 %v806_v42, %v804_v41  ;;  %p2214_p6 = pneg %p2213_p2 }
  0xe4   : > { %754 = vadd.xlane.f32.xlu1 %v753_v17  ;;  %v1753_v47 = vpack.c.bf16 %v959_v45, %v957_v44  ;;  %v964_v50 = vld [vmem:[#allocation10 + $0x58] sm:$0xff]  ;;  %1752 = vmatprep.subr.bf16.mxu1 %v1751_v43  ;;  %v808_v53 = vld [vmem:[#allocation8 + $0x60] sm:$0xff]  ;;  %v1695_v55 = vpack.c.bf16 %v811_v48, %v809_v46  ;;  %v810_v56 = vld [vmem:[#allocation8 + $0x70] sm:$0xff] }
  0xe5   : > { %1690 = vmatpush1.bf16.msra.mxu0 %v1689_v34  ;;  %v1755_v52 = vpack.c.bf16 %v964_v50, %v962_v49  ;;  %v961_v54 = vld [vmem:[#allocation10 + $0x40] sm:$0xff]  ;;  %v963_v57 = vld [vmem:[#allocation10 + $0x50] sm:$0xff]  ;;  %v813_v58 = vld [vmem:[#allocation8 + $0x88] sm:$0xff]  ;;  %v1697_v10 = vpack.c.bf16 %v810_v56, %v808_v53  ;;  %p2221_p5 = pnand %p2220_p4, %p2214_p6 }
  0xe6   : > { %1692 = vmatprep.subr.bf16.mxu0 %v1691_v39  ;;  %v1757_v59 = vpack.c.bf16 %v963_v57, %v961_v54  ;;  %v815_v60 = vld [vmem:[#allocation8 + $0x98] sm:$0xff]  ;;  %v966_v61 = vld [vmem:[#allocation10 + $0x68] sm:$0xff]  ;;  %v965_v3 = vld [vmem:[#allocation10 + $0x60] sm:$0xff] }
  0xe7   : > { %1754 = vmatpush1.bf16.msra.mxu1 %v1753_v47  ;;  %v968_v62 = vld [vmem:[#allocation10 + $0x78] sm:$0xff]  ;;  %v967_v7 = vld [vmem:[#allocation10 + $0x70] sm:$0xff]  ;;  %v970_v11 = vld [vmem:[#allocation10 + $0x88] sm:$0xff]  ;;  %v1699_v16 = vpack.c.bf16 %v815_v60, %v813_v58 }
  0xe8   : > { %1756 = vmatprep.subr.bf16.mxu1 %v1755_v52  ;;  %v1759_v63 = vpack.c.bf16 %v968_v62, %v966_v61  ;;  %v812_v17 = vld [vmem:[#allocation8 + $0x80] sm:$0xff]  ;;  %v814_v18 = vld [vmem:[#allocation8 + $0x90] sm:$0xff]  ;;  %v972_v19 = vld [vmem:[#allocation10 + $0x98] sm:$0xff]  ;;  %v1761_v20 = vpack.c.bf16 %v967_v7, %v965_v3 }
  0xe9   : > { %1694 = vmatpush1.bf16.msra.mxu0 %v1693_v51  ;;  %v817_v21 = vld [vmem:[#allocation8 + $0xa8] sm:$0xff]  ;;  %v819_v22 = vld [vmem:[#allocation8 + $0xb8] sm:$0xff]  ;;  %v1763_v23 = vpack.c.bf16 %v972_v19, %v970_v11  ;;  %v969_v24 = vld [vmem:[#allocation10 + $0x80] sm:$0xff]  ;;  %v1701_v26 = vpack.c.bf16 %v814_v18, %v812_v17 }
  0xea   : > { %1696 = vmatprep.subr.bf16.mxu0 %v1695_v55  ;;  %v971_v25 = vld [vmem:[#allocation10 + $0x90] sm:$0xff]  ;;  %v974_v27 = vld [vmem:[#allocation10 + $0xa8] sm:$0xff]  ;;  %v976_v28 = vld [vmem:[#allocation10 + $0xb8] sm:$0xff]  ;;  %v1703_v29 = vpack.c.bf16 %v819_v22, %v817_v21 }
  0xeb   : > { %1758 = vmatpush1.bf16.msra.mxu1 %v1757_v59  ;;  %v816_v30 = vld [vmem:[#allocation8 + $0xa0] sm:$0xff]  ;;  %v818_v31 = vld [vmem:[#allocation8 + $0xb0] sm:$0xff]  ;;  %v1765_v32 = vpack.c.bf16 %v971_v25, %v969_v24  ;;  %v821_v33 = vld [vmem:[#allocation8 + $0xc8] sm:$0xff]  ;;  %v1767_v35 = vpack.c.bf16 %v976_v28, %v974_v27 }
  0xec   : > { %1760 = vmatprep.subr.bf16.mxu1 %v1759_v63  ;;  %v823_v34 = vld [vmem:[#allocation8 + $0xd8] sm:$0xff]  ;;  %v973_v36 = vld [vmem:[#allocation10 + $0xa0] sm:$0xff]  ;;  %v975_v37 = vld [vmem:[#allocation10 + $0xb0] sm:$0xff]  ;;  %v1705_v38 = vpack.c.bf16 %v818_v31, %v816_v30 }
  0xed   : > { %1698 = vmatpush1.bf16.msra.mxu0 %v1697_v10  ;;  %v978_v39 = vld [vmem:[#allocation10 + $0xc8] sm:$0xff]  ;;  %v980_v40 = vld [vmem:[#allocation10 + $0xd8] sm:$0xff]  ;;  %v1707_v41 = vpack.c.bf16 %v823_v34, %v821_v33  ;;  %v820_v42 = vld [vmem:[#allocation8 + $0xc0] sm:$0xff]  ;;  %v1769_v44 = vpack.c.bf16 %v975_v37, %v973_v36 }
  0xee   : > { %1700 = vmatprep.subr.bf16.mxu0 %v1699_v16  ;;  %v822_v43 = vld [vmem:[#allocation8 + $0xd0] sm:$0xff]  ;;  %v825_v45 = vld [vmem:[#allocation8 + $0xe8] sm:$0xff]  ;;  %v827_v46 = vld [vmem:[#allocation8 + $0xf8] sm:$0xff]  ;;  %v1771_v47 = vpack.c.bf16 %v980_v40, %v978_v39 }
  0xef   : > { %1762 = vmatpush1.bf16.msra.mxu1 %v1761_v20  ;;  %v977_v48 = vld [vmem:[#allocation10 + $0xc0] sm:$0xff]  ;;  %v979_v49 = vld [vmem:[#allocation10 + $0xd0] sm:$0xff]  ;;  %v1709_v50 = vpack.c.bf16 %v822_v43, %v820_v42  ;;  %v1711_v51 = vpack.c.bf16 %v827_v46, %v825_v45  ;;  %v829_v34 = vld [vmem:[#allocation8 + $0x108] sm:$0xff] }
  0xf0   : > { %1764 = vmatprep.subr.bf16.mxu1 %v1763_v23  ;;  %v824_v52 = vld [vmem:[#allocation8 + $0xe0] sm:$0xff]  ;;  %v826_v53 = vld [vmem:[#allocation8 + $0xf0] sm:$0xff]  ;;  %v1773_v54 = vpack.c.bf16 %v979_v49, %v977_v48  ;;  %v982_v36 = vld [vmem:[#allocation10 + $0xe8] sm:$0xff] }
  0xf1   : > { %1702 = vmatpush1.bf16.msra.mxu0 %v1701_v26  ;;  %v1713_v55 = vpack.c.bf16 %v826_v53, %v824_v52  ;;  %v828_v39 = vld [vmem:[#allocation8 + $0x100] sm:$0xff]  ;;  %v830_v40 = vld [vmem:[#allocation8 + $0x110] sm:$0xff]  ;;  %v833_v46 = vld [vmem:[#allocation8 + $0x128] sm:$0xff] }
  0xf2   : > { %1704 = vmatprep.subr.bf16.mxu0 %v1703_v29  ;;  %v1717_v42 = vpack.c.bf16 %v830_v40, %v828_v39  ;;  %v981_v43 = vld [vmem:[#allocation10 + $0xe0] sm:$0xff]  ;;  %v986_v48 = vld [vmem:[#allocation10 + $0x108] sm:$0xff]  ;;  %v834_v52 = vld [vmem:[#allocation8 + $0x130] sm:$0xff] }
  0xf3   : > { %1766 = vmatpush1.bf16.msra.mxu1 %v1765_v32  ;;  %v997_v39 = vld [vmem:[#allocation10 + $0x160] sm:$0xff]  ;;  %v999_v40 = vld [vmem:[#allocation10 + $0x170] sm:$0xff] }
  0xf4   : > { %1768 = vmatprep.subr.bf16.mxu1 %v1767_v35  ;;  %v831_v35 = vld [vmem:[#allocation8 + $0x118] sm:$0xff] }
  0xf5   : > { %1706 = vmatpush1.bf16.msra.mxu0 %v1705_v38  ;;  %v1715_v37 = vpack.c.bf16 %v831_v35, %v829_v34  ;;  %v984_v38 = vld [vmem:[#allocation10 + $0xf8] sm:$0xff]  ;;  %v844_v35 = vld [vmem:[#allocation8 + $0x180] sm:$0xff] }
  0xf6   : > { %1708 = vmatprep.subr.bf16.mxu0 %v1707_v41  ;;  %v1775_v41 = vpack.c.bf16 %v984_v38, %v982_v36  ;;  %v1000_v34 = vld [vmem:[#allocation10 + $0x178] sm:$0xff]  ;;  %v846_v36 = vld [vmem:[#allocation8 + $0x190] sm:$0xff] }
  0xf7   : > { %1770 = vmatpush1.bf16.msra.mxu1 %v1769_v44  ;;  %v983_v44 = vld [vmem:[#allocation10 + $0xf0] sm:$0xff]  ;;  %v1733_v38 = vpack.c.bf16 %v846_v36, %v844_v35 }
  0xf8   : > { %1772 = vmatprep.subr.bf16.mxu1 %v1771_v47  ;;  %v1777_v45 = vpack.c.bf16 %v983_v44, %v981_v43  ;;  %v835_v47 = vld [vmem:[#allocation8 + $0x138] sm:$0xff]  ;;  %v1002_v44 = vld [vmem:[#allocation10 + $0x188] sm:$0xff] }
  0xf9   : > { %1710 = vmatpush1.bf16.msra.mxu0 %v1709_v50  ;;  %v1719_v49 = vpack.c.bf16 %v835_v47, %v833_v46  ;;  %v988_v50 = vld [vmem:[#allocation10 + $0x118] sm:$0xff]  ;;  %v848_v47 = vld [vmem:[#allocation8 + $0x1a0] sm:$0xff] }
  0xfa   : > { %1712 = vmatprep.subr.bf16.mxu0 %v1711_v51  ;;  %v832_v51 = vld [vmem:[#allocation8 + $0x120] sm:$0xff]  ;;  %v1779_v53 = vpack.c.bf16 %v988_v50, %v986_v48  ;;  %v851_v43 = vld [vmem:[#allocation8 + $0x1b8] sm:$0xff]  ;;  %v850_v48 = vld [vmem:[#allocation8 + $0x1b0] sm:$0xff] }
  0xfb   : > { %1774 = vmatpush1.bf16.msra.mxu1 %v1773_v54  ;;  %v1721_v54 = vpack.c.bf16 %v834_v52, %v832_v51  ;;  %v1004_v46 = vld [vmem:[#allocation10 + $0x198] sm:$0xff]  ;;  %v1737_v50 = vpack.c.bf16 %v850_v48, %v848_v47  ;;  %v1001_v51 = vld [vmem:[#allocation10 + $0x180] sm:$0xff]  ;;  %v1003_v52 = vld [vmem:[#allocation10 + $0x190] sm:$0xff] }
  0xfc   : > { %1776 = vmatprep.subr.bf16.mxu1 %v1775_v41  ;;  %v1793_v41 = vpack.c.bf16 %v999_v40, %v997_v39 }
  0xfd   : > { %1714 = vmatpush1.bf16.msra.mxu0 %v1713_v55  ;;  %v985_v55 = vld [vmem:[#allocation10 + $0x100] sm:$0xff] }
  0xfe   : > { %1716 = vmatprep.subr.bf16.mxu0 %v1715_v37 }
  0xff   : > { %1778 = vmatpush1.bf16.msra.mxu1 %v1777_v45 }
 0x100   : > { %1780 = vmatprep.subr.bf16.mxu1 %v1779_v53  ;;  %v1797_v53 = vpack.c.bf16 %v1003_v52, %v1001_v51 }
 0x101   : > { %1718 = vmatpush1.bf16.msra.mxu0 %v1717_v42  ;;  %v849_v42 = vld [vmem:[#allocation8 + $0x1a8] sm:$0xff] }
 0x102   : > { %1720 = vmatprep.subr.bf16.mxu0 %v1719_v49  ;;  %v1735_v45 = vpack.c.bf16 %v851_v43, %v849_v42  ;;  %v1795_v49 = vpack.c.bf16 %v1004_v46, %v1002_v44 }
 0x105   : > { %1722 = vmatpush1.bf16.msra.mxu0 %v1721_v54  ;;  %v853_v54 = vld [vmem:[#allocation8 + $0x1c8] sm:$0xff] }
 0x168   : > { %v651_v56 = vpop.xlane.xlu0 %650 }
 0x169   : > { %v656_v57 = vmul.f32 0.00390625, %v651_v56  ;;  %v654_v58 = vpop.xlane.xlu1 %653  ;;  %v987_v56 = vld [vmem:[#allocation10 + $0x110] sm:$0xff] }
 0x16a   : > { %v657_v59 = vmul.f32 0.00390625, %v654_v58  ;;  %v837_v58 = vld [vmem:[#allocation8 + $0x148] sm:$0xff] }
 0x16b   : > { %v2816_v60 = vsub.f32 %v2779_v0, %v656_v57  ;;  %v2819_v61 = vsub.f32 %v2781_v1, %v656_v57  ;;  %v1781_v57 = vpack.c.bf16 %v987_v56, %v985_v55  ;;  %v855_v55 = vld [vmem:[#allocation8 + $0x1d8] sm:$0xff]  ;;  %v1006_v56 = vld [vmem:[#allocation10 + $0x1a8] sm:$0xff] }
 0x16c   : > { %v2822_v62 = vsub.f32 %v2783_v2, %v657_v59  ;;  %v2825_v63 = vsub.f32 %v2787_v4, %v657_v59  ;;  %v702_v3 = vpop.xlane.xlu0 %701  ;;  %v839_v59 = vld [vmem:[#allocation8 + $0x158] sm:$0xff] }
 0x16d   : > { %v706_v7 = vmul.f32 0.00390625, %v702_v3  ;;  %v705_v10 = vpop.xlane.xlu1 %704  ;;  %v662_v11 = vmul.f32 %v2816_v60, %v2816_v60  ;;  %v663_v16 = vmul.f32 %v2819_v61, %v2819_v61  ;;  %v990_v3 = vld [vmem:[#allocation10 + $0x128] sm:$0xff]  ;;  %1782 = vmatpush1.bf16.msra.mxu1 %v1781_v57  ;;  %v1739_v57 = vpack.c.bf16 %v855_v55, %v853_v54 }
 0x16e   : > { %v707_v0 = vmul.f32 0.00390625, %v705_v10  ;;  %v664_v1 = vmul.f32 %v2822_v62, %v2822_v62  ;;  %v665_v2 = vmul.f32 %v2825_v63, %v2825_v63  ;;  %v992_v10 = vld [vmem:[#allocation10 + $0x138] sm:$0xff] }
 0x16f   : > { %v2836_v17 = vsub.f32 %v2789_v5, %v706_v7  ;;  %v2839_v4 = vsub.f32 %v2791_v6, %v706_v7  ;;  %v666_v18 = vadd.f32 %v663_v16, %v662_v11  ;;  %v1723_v7 = vpack.c.bf16 %v839_v59, %v837_v58  ;;  %v836_v11 = vld [vmem:[#allocation8 + $0x140] sm:$0xff]  ;;  %v838_v16 = vld [vmem:[#allocation8 + $0x150] sm:$0xff]  ;;  %v1008_v58 = vld [vmem:[#allocation10 + $0x1b8] sm:$0xff] }
 0x170   : > { %v2842_v19 = vsub.f32 %v2795_v8, %v707_v0  ;;  %v2845_v20 = vsub.f32 %v2797_v9, %v707_v0  ;;  %v752_v21 = vpop.xlane.xlu0 %751  ;;  %v669_v24 = vadd.f32 %v665_v2, %v664_v1  ;;  %v1783_v0 = vpack.c.bf16 %v992_v10, %v990_v3  ;;  %v989_v2 = vld [vmem:[#allocation10 + $0x120] sm:$0xff]  ;;  %v854_v3 = vld [vmem:[#allocation8 + $0x1d0] sm:$0xff] }
 0x171   : > { %v756_v22 = vmul.f32 0.00390625, %v752_v21  ;;  %667 = vadd.xlane.f32.xlu0 %v666_v18  ;;  %v755_v23 = vpop.xlane.xlu1 %754  ;;  %v712_v25 = vmul.f32 %v2836_v17, %v2836_v17  ;;  %v713_v5 = vmul.f32 %v2839_v4, %v2839_v4  ;;  %v1725_v1 = vpack.c.bf16 %v838_v16, %v836_v11  ;;  %v991_v18 = vld [vmem:[#allocation10 + $0x130] sm:$0xff]  ;;  %1724 = vmatprep.subr.bf16.mxu0 %v1723_v7  ;;  %v852_v59 = vld [vmem:[#allocation8 + $0x1c0] sm:$0xff] }
 0x172   : > { %v757_v6 = vmul.f32 0.00390625, %v755_v23  ;;  %v714_v26 = vmul.f32 %v2842_v19, %v2842_v19  ;;  %v715_v8 = vmul.f32 %v2845_v20, %v2845_v20  ;;  %v1785_v21 = vpack.c.bf16 %v991_v18, %v989_v2  ;;  %1784 = vmatprep.subr.bf16.mxu1 %v1783_v0  ;;  %v843_v23 = vld [vmem:[#allocation8 + $0x178] sm:$0xff]  ;;  %v1005_v11 = vld [vmem:[#allocation10 + $0x1a0] sm:$0xff]  ;;  %v1007_v16 = vld [vmem:[#allocation10 + $0x1b0] sm:$0xff] }
 0x173   : > { %v2856_v9 = vsub.f32 %v2803_v12, %v756_v22  ;;  %v2859_v27 = vsub.f32 %v2805_v13, %v756_v22  ;;  %v716_v28 = vadd.f32 %v713_v5, %v712_v25  ;;  %1726 = vmatpush1.bf16.msra.mxu0 %v1725_v1  ;;  %v841_v22 = vld [vmem:[#allocation8 + $0x168] sm:$0xff]  ;;  %v996_v5 = vld [vmem:[#allocation10 + $0x158] sm:$0xff]  ;;  %v1799_v7 = vpack.c.bf16 %v1008_v58, %v1006_v56 }
 0x174   : > { %v2862_v29 = vsub.f32 %v2807_v14, %v757_v6  ;;  %v2865_v30 = vsub.f32 %v2809_v15, %v757_v6  ;;  %v719_v31 = vadd.f32 %v715_v8, %v714_v26  ;;  %1786 = vmatpush1.bf16.msra.mxu1 %v1785_v21  ;;  %v1727_v25 = vpack.c.bf16 %v843_v23, %v841_v22  ;;  %v840_v6 = vld [vmem:[#allocation8 + $0x160] sm:$0xff]  ;;  %v842_v26 = vld [vmem:[#allocation8 + $0x170] sm:$0xff]  ;;  %v857_v1 = vld [vmem:[#allocation8 + $0x1e8] sm:$0xff] }
 0x175   : > { %670 = vadd.xlane.f32.xlu0 %v669_v24  ;;  %717 = vadd.xlane.f32.xlu1 %v716_v28  ;;  %v762_v32 = vmul.f32 %v2856_v9, %v2856_v9  ;;  %v763_v12 = vmul.f32 %v2859_v27, %v2859_v27  ;;  %v994_v24 = vld [vmem:[#allocation10 + $0x148] sm:$0xff]  ;;  %v1729_v28 = vpack.c.bf16 %v842_v26, %v840_v6  ;;  %v859_v2 = vld [vmem:[#allocation8 + $0x1f8] sm:$0xff]  ;;  %v856_v23 = vld [vmem:[#allocation8 + $0x1e0] sm:$0xff] }
 0x176   : > { %v764_v13 = vmul.f32 %v2862_v29, %v2862_v29  ;;  %v765_v33 = vmul.f32 %v2865_v30, %v2865_v30  ;;  %v1787_v8 = vpack.c.bf16 %v996_v5, %v994_v24  ;;  %1728 = vmatprep.subr.bf16.mxu0 %v1727_v25  ;;  %v1741_v10 = vpack.c.bf16 %v854_v3, %v852_v59  ;;  %v1010_v18 = vld [vmem:[#allocation10 + $0x1c8] sm:$0xff]  ;;  %v1012_v22 = vld [vmem:[#allocation10 + $0x1d8] sm:$0xff]  ;;  %v858_v24 = vld [vmem:[#allocation8 + $0x1f0] sm:$0xff] }
 0x177   : > { %v766_v14 = vadd.f32 %v763_v12, %v762_v32  ;;  %v995_v32 = vld [vmem:[#allocation10 + $0x150] sm:$0xff]  ;;  %1730 = vmatpush1.bf16.msra.mxu0 %v1729_v28  ;;  %v1801_v0 = vpack.c.bf16 %v1007_v16, %v1005_v11  ;;  %v1743_v21 = vpack.c.bf16 %v859_v2, %v857_v1  ;;  %v1803_v25 = vpack.c.bf16 %v1012_v22, %v1010_v18  ;;  %v1009_v6 = vld [vmem:[#allocation10 + $0x1c0] sm:$0xff]  ;;  %v1014_v28 = vld [vmem:[#allocation10 + $0x1e8] sm:$0xff] }
 0x178   : > { %v769_v15 = vadd.f32 %v765_v33, %v764_v13  ;;  %1788 = vmatprep.subr.bf16.mxu1 %v1787_v8  ;;  %v845_v13 = vld [vmem:[#allocation8 + $0x188] sm:$0xff]  ;;  %v847_v33 = vld [vmem:[#allocation8 + $0x198] sm:$0xff]  ;;  %v1745_v5 = vpack.c.bf16 %v858_v24, %v856_v23  ;;  %v1011_v26 = vld [vmem:[#allocation10 + $0x1d0] sm:$0xff]  ;;  %v862_v24 = vlaneseq }
 0x179   : > { %720 = vadd.xlane.f32.xlu1 %v719_v31  ;;  %767 = vadd.xlane.f32.xlu0 %v766_v14  ;;  %v993_v31 = vld [vmem:[#allocation10 + $0x140] sm:$0xff]  ;;  %v998_v14 = vld [vmem:[#allocation10 + $0x168] sm:$0xff]  ;;  %v1805_v8 = vpack.c.bf16 %v1011_v26, %v1009_v6 }
 0x17a   : > { %v1789_v12 = vpack.c.bf16 %v995_v32, %v993_v31  ;;  %v1791_v37 = vpack.c.bf16 %v1000_v34, %v998_v14  ;;  %v1016_v31 = vld [vmem:[#allocation10 + $0x1f8] sm:$0xff]  ;;  %v1111_v32 = vld [vmem:[#allocation11 + $0x8] sm:$0xff]  ;;  %v1015_v14 = vld [vmem:[#allocation10 + $0x1f0] sm:$0xff] }
 0x17c   : > { %1790 = vmatpush1.bf16.msra.mxu1 %v1789_v12  ;;  %v1807_v12 = vpack.c.bf16 %v1016_v31, %v1014_v28 }
 0x17d   : > { %770 = vadd.xlane.f32.xlu1 %v769_v15  ;;  %v1731_v15 = vpack.c.bf16 %v847_v33, %v845_v13  ;;  %1792 = vmatprep.subr.bf16.mxu1 %v1791_v37  ;;  %v1113_v13 = vld [vmem:[#allocation11 + $0x18] sm:$0xff]  ;;  %v1013_v33 = vld [vmem:[#allocation10 + $0x1e0] sm:$0xff] }
 0x17e   : > { %v1809_v34 = vpack.c.bf16 %v1015_v14, %v1013_v33  ;;  %v1112_v33 = vld [vmem:[#allocation11 + $0x10] sm:$0xff] }
 0x17f   : > { %1732 = vmatprep.subr.bf16.mxu0 %v1731_v15  ;;  %v1811_v15 = vpack.c.bf16 %v1113_v13, %v1111_v32  ;;  %v1110_v13 = vld [vmem:[#allocation11] sm:$0xff] }
 0x180   : > { %1734 = vmatpush1.bf16.msra.mxu0 %v1733_v38  ;;  %1794 = vmatpush1.bf16.msra.mxu1 %v1793_v41 }
 0x181   : > { %1736 = vmatprep.subr.bf16.mxu0 %v1735_v45  ;;  %1796 = vmatprep.subr.bf16.mxu1 %v1795_v49 }
 0x184   : > { %1738 = vmatpush1.bf16.msra.mxu0 %v1737_v50  ;;  %1798 = vmatpush1.bf16.msra.mxu1 %v1797_v53 }
 0x185   : > { %1740 = vmatprep.subr.bf16.mxu0 %v1739_v57  ;;  %1800 = vmatprep.subr.bf16.mxu1 %v1799_v7 }
 0x188   : > { %1742 = vmatpush1.bf16.msra.mxu0 %v1741_v10  ;;  %1802 = vmatpush1.bf16.msra.mxu1 %v1801_v0 }
 0x189   : > { %1744 = vmatprep.subr.bf16.mxu0 %v1743_v21  ;;  %1804 = vmatprep.subr.bf16.mxu1 %v1803_v25 }
 0x18c   : > { %1746 = vmatpush1.bf16.msra.mxu0 %v1745_v5  ;;  %1806 = vmatpush1.bf16.msra.mxu1 %v1805_v8 }
 0x18d   : > { %1808 = vmatprep.subr.bf16.mxu1 %v1807_v12  ;;  %1812 = vmatprep.subr.bf16.mxu0 %v1811_v15 }
 0x190   : > { %1810 = vmatpush1.bf16.msra.mxu1 %v1809_v34  ;;  %v1117_v34 = vld [vmem:[#allocation11 + $0x38] sm:$0xff] }
 0x191   : > { %1875 = vmatprep.subr.bf16.mxu1 %v1811_v15  ;;  %v1115_v15 = vld [vmem:[#allocation11 + $0x28] sm:$0xff] }
 0x1fe   : > { %v668_v35 = vpop.xlane.xlu0 %667 }
 0x1ff   : > { %v672_v36 = vmul.f32 0.003921569, %v668_v35 }
 0x201   : > { %2013 = vrsqrt.f32 %v672_v36  ;;  %vm676_vm0 = vcmp.eq.f32.partialorder %v672_v36, inf  ;;  %v679_v49 = vand.u32 2147483648, %v672_v36  ;;  %vm678_vm1 = vcmp.eq.f32.partialorder %v672_v36, 0.0 }
 0x202   : > { %v718_v37 = vpop.xlane.xlu1 %717  ;;  %v671_v38 = vpop.xlane.xlu0 %670 }
 0x203   : > { %v722_v39 = vmul.f32 0.003921569, %v718_v37  ;;  %v673_v40 = vmul.f32 0.003921569, %v671_v38  ;;  %v863_v37 = vshrl.u32 %v862_v24, 7  ;;  %v1129_v24 = vld [vmem:[#allocation11 + $0x98] sm:$0xff] }
 0x205   : > { %2015 = vrsqrt.f32 %v722_v39  ;;  %vm683_vm2 = vcmp.eq.f32.partialorder %v673_v40, inf  ;;  %v686_v54 = vand.u32 2147483648, %v673_v40  ;;  %vm685_vm3 = vcmp.eq.f32.partialorder %v673_v40, 0.0 }
 0x206   : > { %2017 = vrsqrt.f32 %v673_v40  ;;  %v721_v41 = vpop.xlane.xlu1 %720  ;;  %v768_v42 = vpop.xlane.xlu0 %767  ;;  %vm726_vm4 = vcmp.eq.f32.partialorder %v722_v39, inf  ;;  %vm728_vm5 = vcmp.eq.f32.partialorder %v722_v39, 0.0  ;;  %v729_v58 = vand.u32 2147483648, %v722_v39 }
 0x207   : > { %v723_v43 = vmul.f32 0.003921569, %v721_v41  ;;  %v772_v44 = vmul.f32 0.003921569, %v768_v42  ;;  %v1815_v41 = vpack.c.bf16 %v1117_v34, %v1115_v15  ;;  %v1114_v42 = vld [vmem:[#allocation11 + $0x20] sm:$0xff]  ;;  %v1132_v34 = vld [vmem:[#allocation11 + $0xb0] sm:$0xff] }
 0x208   : > { %v1130_v15 = vld [vmem:[#allocation11 + $0xa0] sm:$0xff] }
 0x209   : > { %2019 = vrsqrt.f32 %v723_v43  ;;  %vm733_vm6 = vcmp.eq.f32.partialorder %v723_v43, inf  ;;  %v736_v59 = vand.u32 2147483648, %v723_v43  ;;  %vm776_vm7 = vcmp.eq.f32.partialorder %v772_v44, inf }
 0x20a   : > { %2021 = vrsqrt.f32 %v772_v44  ;;  %v771_v45 = vpop.xlane.xlu1 %770  ;;  %v779_v10 = vand.u32 2147483648, %v772_v44  ;;  %vm735_vm8 = vcmp.eq.f32.partialorder %v723_v43, 0.0  ;;  %vm778_vm9 = vcmp.eq.f32.partialorder %v772_v44, 0.0 }
 0x20b   : > { %v2014_v46 = vpop.eup %2013  ;;  %v773_v47 = vmul.f32 0.003921569, %v771_v45  ;;  %v1119_v45 = vld [vmem:[#allocation11 + $0x48] sm:$0xff] }
 0x20c   : > { %v675_v48 = vmul.f32 %v2014_v46, %v672_v36  ;;  %v1121_v46 = vld [vmem:[#allocation11 + $0x58] sm:$0xff] }
 0x20d   : > { %2023 = vrsqrt.f32 %v773_v47  ;;  %vm783_vm10 = vcmp.eq.f32.partialorder %v773_v47, inf  ;;  %v786_v6 = vand.u32 2147483648, %v773_v47  ;;  %vm785_vm11 = vcmp.eq.f32.partialorder %v773_v47, 0.0 }
 0x20e   : > { %v677_v50 = vsel %vm676_vm0, %v672_v36, %v675_v48  ;;  %v2883_v48 = vsub.s32 1, %v863_v37 }
 0x20f   : > { %v2016_v51 = vpop.eup %2015  ;;  %v680_v52 = vsel %vm678_vm1, %v679_v49, %v677_v50  ;;  %v1267_v50 = vld [vmem:[%s3197_s21] sm:$0x3] }
 0x210   : > { %v2018_v53 = vpop.eup %2017  ;;  %v688_v55 = vadd.f32 1e-06, %v680_v52  ;;  %v725_v56 = vmul.f32 %v2016_v51, %v722_v39  ;;  %v1118_v51 = vld [vmem:[#allocation11 + $0x40] sm:$0xff]  ;;  %v1120_v52 = vld [vmem:[#allocation11 + $0x50] sm:$0xff] }
 0x211   : > { %v682_v57 = vmul.f32 %v2018_v53, %v673_v40 }
 0x212   : > { %2025 = vrcp.f32 %v688_v55  ;;  %v727_v3 = vsel %vm726_vm4, %v722_v39, %v725_v56  ;;  %v1283_v56 = vld [vmem:[%s3198_s9] sm:$0x3] }
 0x213   : > { %v2020_v7 = vpop.eup %2019  ;;  %v684_v11 = vsel %vm683_vm2, %v673_v40, %v682_v57  ;;  %v730_v16 = vsel %vm728_vm5, %v729_v58, %v727_v3  ;;  %v1813_v40 = vpack.c.bf16 %v1112_v33, %v1110_v13  ;;  %v1276_v58 = vrot.slane %v1267_v50, %v2883_v48  ;;  %v1123_v3 = vld [vmem:[#allocation11 + $0x68] sm:$0xff] }
 0x214   : > { %v2022_v0 = vpop.eup %2021  ;;  %v732_v1 = vmul.f32 %v2020_v7, %v723_v43  ;;  %v687_v2 = vsel %vm685_vm3, %v686_v54, %v684_v11  ;;  %v738_v18 = vadd.f32 1e-06, %v730_v16 }
 0x215   : > { %v775_v21 = vmul.f32 %v2022_v0, %v772_v44  ;;  %v689_v22 = vadd.f32 1e-06, %v687_v2 }
 0x216   : > { %2027 = vrcp.f32 %v738_v18  ;;  %v734_v23 = vsel %vm733_vm6, %v723_v43, %v732_v1  ;;  %v1116_v43 = vld [vmem:[#allocation11 + $0x30] sm:$0xff]  ;;  %v1292_v1 = vrot.slane %v1283_v56, %v2883_v48  ;;  %v1122_v18 = vld [vmem:[#allocation11 + $0x60] sm:$0xff] }
 0x217   : > { %v2024_v25 = vpop.eup %2023  ;;  %v777_v5 = vsel %vm776_vm7, %v772_v44, %v775_v21  ;;  %2029 = vrcp.f32 %v689_v22  ;;  %v737_v26 = vsel %vm735_vm8, %v736_v59, %v734_v23  ;;  %v1817_v55 = vpack.c.bf16 %v1116_v43, %v1114_v42  ;;  %v1124_v21 = vld [vmem:[#allocation11 + $0x70] sm:$0xff]  ;;  %v1141_v42 = vld [vmem:[#allocation11 + $0xf8] sm:$0xff] }
 0x218   : > { %v782_v8 = vmul.f32 %v2024_v25, %v773_v47  ;;  %v739_v28 = vadd.f32 1e-06, %v737_v26  ;;  %v780_v31 = vsel %vm778_vm9, %v779_v10, %v777_v5  ;;  %v1821_v59 = vpack.c.bf16 %v1120_v52, %v1118_v51  ;;  %v1142_v51 = vld [vmem:[#allocation11 + $0x100] sm:$0xff]  ;;  %v1144_v52 = vld [vmem:[#allocation11 + $0x110] sm:$0xff] }
 0x219   : > { %v788_v32 = vadd.f32 1e-06, %v780_v31  ;;  %v1126_v31 = vld [vmem:[#allocation11 + $0x80] sm:$0xff] }
 0x21a   : > { %v784_v12 = vsel %vm783_vm10, %v773_v47, %v782_v8  ;;  %2031 = vrcp.f32 %v739_v28  ;;  %v2881_v47 = vsub.s32 0, %v863_v37  ;;  %v1833_v37 = vpack.c.bf16 %v1132_v34, %v1130_v15  ;;  %v1170_v15 = vld [vmem:[#allocation11 + $0x1e0] sm:$0xff]  ;;  %v1172_v34 = vld [vmem:[#allocation11 + $0x1f0] sm:$0xff] }
 0x21b   : > { %v787_v14 = vsel %vm785_vm11, %v786_v6, %v784_v12  ;;  %2033 = vrcp.f32 %v788_v32  ;;  %v1825_v6 = vpack.c.bf16 %v1124_v21, %v1122_v18  ;;  %v1128_v32 = vld [vmem:[#allocation11 + $0x90] sm:$0xff]  ;;  %v1159_v18 = vld [vmem:[#allocation11 + $0x188] sm:$0xff]  ;;  %v1161_v21 = vld [vmem:[#allocation11 + $0x198] sm:$0xff] }
 0x21c   : > { %v2026_v35 = vpop.eup %2025  ;;  %v789_v36 = vadd.f32 1e-06, %v787_v14  ;;  %v1288_v10 = vrot.slane %v1283_v56, %v2881_v47  ;;  %v1829_v33 = vpack.c.bf16 %v1128_v32, %v1126_v31 }
 0x21d   : > { %v693_v38 = vmul.f32 %v2026_v35, %v2819_v61  ;;  %v692_v39 = vmul.f32 %v2026_v35, %v2816_v60  ;;  %v1135_v35 = vld [vmem:[#allocation11 + $0xc8] sm:$0xff] }
 0x21e   : > { %2035 = vrcp.f32 %v789_v36  ;;  %v1137_v36 = vld [vmem:[#allocation11 + $0xd8] sm:$0xff] }
 0x21f   : > { %936 = vmatprep.mubr.f32.mxu0 %v693_v38  ;;  %v1835_v38 = vpack.c.bf16 %v1137_v36, %v1135_v35  ;;  %v1873_v35 = vpack.c.bf16 %v1172_v34, %v1170_v15 }
 0x220   : > { %v2028_v44 = vpop.eup %2027  ;;  %937 = vmatmul.mubr.f32.vlgmr.msra.gmra.mrb[0].mxu0 %v692_v39  ;;  %v1134_v39 = vld [vmem:[#allocation11 + $0xc0] sm:$0xff] }
 0x221   : > { %v2030_v49 = vpop.eup %2029  ;;  %1814 = vmatpush1.bf16.msra.mxu0 %v1813_v40  ;;  %v743_v61 = vmul.f32 %v2028_v44, %v2839_v4  ;;  %v742_v60 = vmul.f32 %v2028_v44, %v2836_v17  ;;  %v1819_v4 = vpack.c.bf16 %v1121_v46, %v1119_v45  ;;  %v1272_v17 = vrot.slane %v1267_v50, %v2881_v47  ;;  %v1138_v45 = vld [vmem:[#allocation11 + $0xe0] sm:$0xff]  ;;  %v1140_v46 = vld [vmem:[#allocation11 + $0xf0] sm:$0xff] }
 0x222   : > { %v695_v53 = vmul.f32 %v2030_v49, %v2825_v63  ;;  %1816 = vmatprep.subr.bf16.mxu0 %v1815_v41  ;;  %v694_v54 = vmul.f32 %v2030_v49, %v2822_v62  ;;  %v1125_v63 = vld [vmem:[#allocation11 + $0x78] sm:$0xff]  ;;  %v1143_v49 = vld [vmem:[#allocation11 + $0x108] sm:$0xff] }
 0x223   : > { %1093 = vmatprep.mubr.f32.mxu1 %v743_v61  ;;  %v1823_v2 = vpack.c.bf16 %v1125_v63, %v1123_v3  ;;  %v1145_v61 = vld [vmem:[#allocation11 + $0x118] sm:$0xff]  ;;  %v1150_v63 = vld [vmem:[#allocation11 + $0x140] sm:$0xff] }
 0x224   : > { %v2032_v57 = vpop.eup %2031  ;;  %942 = vmatprep.mubr.f32.mxu0 %v695_v53  ;;  %1094 = vmatmul.mubr.f32.vlgmr.msra.gmra.mrb[0].mxu1 %v742_v60  ;;  %v1841_v60 = vpack.c.bf16 %v1140_v46, %v1138_v45  ;;  %v1843_v50 = vpack.c.bf16 %v1145_v61, %v1143_v49  ;;  %v1147_v53 = vld [vmem:[#allocation11 + $0x128] sm:$0xff] }
 0x225   : > { %v2034_v7 = vpop.eup %2033  ;;  %943 = vmatmul.mubr.f32.gmra.mrb[2].mxu0 %v694_v54  ;;  %1891 = vmatpush1.bf16.msra.mxu1 %v1813_v40  ;;  %v745_v62 = vmul.f32 %v2032_v57, %v2845_v20  ;;  %v744_v11 = vmul.f32 %v2032_v57, %v2842_v19  ;;  %v1127_v19 = vld [vmem:[#allocation11 + $0x88] sm:$0xff]  ;;  %v1136_v40 = vld [vmem:[#allocation11 + $0xd0] sm:$0xff]  ;;  %v1149_v54 = vld [vmem:[#allocation11 + $0x138] sm:$0xff] }
 0x226   : > { %1818 = vmatpush1.bf16.msra.mxu0 %v1817_v55  ;;  %1876 = vmatprep.subr.bf16.mxu1 %v1815_v41  ;;  %v2901_v16 = vmul.f32 %v2034_v7, %v2856_v9  ;;  %v793_v0 = vmul.f32 %v2034_v7, %v2859_v27  ;;  %v1827_v28 = vpack.c.bf16 %v1129_v24, %v1127_v19  ;;  %v1139_v41 = vld [vmem:[#allocation11 + $0xe8] sm:$0xff]  ;;  %v1148_v57 = vld [vmem:[#allocation11 + $0x130] sm:$0xff] }
 0x227   : > { %1099 = vmatprep.mubr.f32.mxu1 %v745_v62  ;;  %1820 = vmatprep.subr.bf16.mxu0 %v1819_v4  ;;  %v1837_v43 = vpack.c.bf16 %v1136_v40, %v1134_v39  ;;  %v1839_v44 = vpack.c.bf16 %v1141_v42, %v1139_v41  ;;  %v1847_v56 = vpack.c.bf16 %v1149_v54, %v1147_v53  ;;  %v1152_v7 = vld [vmem:[#allocation11 + $0x150] sm:$0xff]  ;;  %v1155_v62 = vld [vmem:[#allocation11 + $0x168] sm:$0xff] }
 0x228   : > { %v2036_v22 = vpop.eup %2035  ;;  %1250 = vmatprep.mubr.f32.mxu0 %v793_v0  ;;  %v1279_v20 = vmul.f32 %v1272_v17, %v2901_v16  ;;  %v1280_v23 = vmul.f32 %v1276_v58, %v793_v0  ;;  %1100 = vmatmul.mubr.f32.gmra.mrb[2].mxu1 %v744_v11  ;;  %v1853_v11 = vpack.c.bf16 %v1152_v7, %v1150_v63  ;;  %v1160_v19 = vld [vmem:[#allocation11 + $0x190] sm:$0xff]  ;;  %v1163_v24 = vld [vmem:[#allocation11 + $0x1a8] sm:$0xff] }
 0x229   : > { %v2907_v9 = vmul.f32 %v2036_v22, %v2862_v29  ;;  %1892 = vmatpush1.bf16.msra.mxu1 %v1817_v55  ;;  %v795_v27 = vmul.f32 %v2036_v22, %v2865_v30  ;;  %v1131_v29 = vld [vmem:[#allocation11 + $0xa8] sm:$0xff]  ;;  %v1133_v30 = vld [vmem:[#allocation11 + $0xb8] sm:$0xff]  ;;  %v1845_v55 = vpack.c.bf16 %v1144_v52, %v1142_v51 }
 0x22a   : > { %v1295_v25 = vadd.f32 %v1288_v10, %v1279_v20  ;;  %v1296_v5 = vadd.f32 %v1292_v1, %v1280_v23  ;;  %1822 = vmatpush1.bf16.msra.mxu0 %v1821_v59  ;;  %1877 = vmatprep.subr.bf16.mxu1 %v1819_v4  ;;  %v1831_v14 = vpack.c.bf16 %v1133_v30, %v1131_v29  ;;  %v1146_v4 = vld [vmem:[#allocation11 + $0x120] sm:$0xff]  ;;  %v1168_v30 = vld [vmem:[#allocation11 + $0x1d0] sm:$0xff] }
 0x22b   : > { %v1281_v26 = vmul.f32 %v1272_v17, %v2907_v9  ;;  %1824 = vmatprep.subr.bf16.mxu0 %v1823_v2  ;;  %1256 = vmatprep.mubr.f32.mxu1 %v795_v27  ;;  %v1282_v8 = vmul.f32 %v1276_v58, %v795_v27  ;;  %v1151_v17 = vld [vmem:[#allocation11 + $0x148] sm:$0xff]  ;;  %v1153_v58 = vld [vmem:[#allocation11 + $0x158] sm:$0xff]  ;;  %v1859_v20 = vpack.c.bf16 %v1161_v21, %v1159_v18  ;;  %v1158_v23 = vld [vmem:[#allocation11 + $0x180] sm:$0xff] }
 0x22c   : > { %1299 = vst [vmem:[%s2912_s11] sm:$0xff] %v1295_v25  ;;  %1300 = vst [vmem:[%s2912_s11 + $0x8] sm:$0xff] %v1296_v5  ;;  %v1851_v3 = vpack.c.bf16 %v1153_v58, %v1151_v17  ;;  %v1165_v27 = vld [vmem:[#allocation11 + $0x1b8] sm:$0xff]  ;;  %v1861_v25 = vpack.c.bf16 %v1160_v19, %v1158_v23  ;;  %v1166_v29 = vld [vmem:[#allocation11 + $0x1c0] sm:$0xff] }
 0x22d   : > { %v1297_v12 = vadd.f32 %v1288_v10, %v1281_v26  ;;  %v1298_v13 = vadd.f32 %v1292_v1, %v1282_v8  ;;  %1893 = vmatpush1.bf16.msra.mxu1 %v1821_v59  ;;  %v1849_v59 = vpack.c.bf16 %v1148_v57, %v1146_v4  ;;  %v1157_v10 = vld [vmem:[#allocation11 + $0x178] sm:$0xff]  ;;  %v1154_v1 = vld [vmem:[#allocation11 + $0x160] sm:$0xff]  ;;  %v1863_v5 = vpack.c.bf16 %v1165_v27, %v1163_v24  ;;  %v1164_v26 = vld [vmem:[#allocation11 + $0x1b0] sm:$0xff] }
 0x22e   : > { %1826 = vmatpush1.bf16.msra.mxu0 %v1825_v6  ;;  %1878 = vmatprep.subr.bf16.mxu1 %v1823_v2  ;;  %v1855_v0 = vpack.c.bf16 %v1157_v10, %v1155_v62  ;;  %v1156_v2 = vld [vmem:[#allocation11 + $0x170] sm:$0xff]  ;;  %v1167_v8 = vld [vmem:[#allocation11 + $0x1c8] sm:$0xff] }
 0x22f   : > { %1301 = vst [vmem:[%s2912_s11 + $0x10] sm:$0xff] %v1297_v12  ;;  %1302 = vst [vmem:[%s2912_s11 + $0x18] sm:$0xff] %v1298_v13  ;;  %1828 = vmatprep.subr.bf16.mxu0 %v1827_v28  ;;  %v1857_v22 = vpack.c.bf16 %v1156_v2, %v1154_v1  ;;  %v1171_v12 = vld [vmem:[#allocation11 + $0x1e8] sm:$0xff]  ;;  %v1173_v13 = vld [vmem:[#allocation11 + $0x1f8] sm:$0xff] }
 0x231   : > { %1894 = vmatpush1.bf16.msra.mxu1 %v1825_v6  ;;  %v1162_v6 = vld [vmem:[#allocation11 + $0x1a0] sm:$0xff] }
 0x232   : > { %1830 = vmatpush1.bf16.msra.mxu0 %v1829_v33  ;;  %1879 = vmatprep.subr.bf16.mxu1 %v1827_v28  ;;  %v1169_v28 = vld [vmem:[#allocation11 + $0x1d8] sm:$0xff]  ;;  %v1865_v31 = vpack.c.bf16 %v1164_v26, %v1162_v6 }
 0x233   : > { %1832 = vmatprep.subr.bf16.mxu0 %v1831_v14  ;;  %v1867_v32 = vpack.c.bf16 %v1169_v28, %v1167_v8 }
 0x235   : > { %1895 = vmatpush1.bf16.msra.mxu1 %v1829_v33  ;;  %v1869_v33 = vpack.c.bf16 %v1168_v30, %v1166_v29 }
 0x236   : > { %1834 = vmatpush1.bf16.msra.mxu0 %v1833_v37  ;;  %1880 = vmatprep.subr.bf16.mxu1 %v1831_v14  ;;  %v1871_v14 = vpack.c.bf16 %v1173_v13, %v1171_v12 }
 0x237   : > { %1836 = vmatprep.subr.bf16.mxu0 %v1835_v38 }
 0x239   : > { %1896 = vmatpush1.bf16.msra.mxu1 %v1833_v37 }
 0x23a   : > { %1838 = vmatpush1.bf16.msra.mxu0 %v1837_v43  ;;  %1881 = vmatprep.subr.bf16.mxu1 %v1835_v38 }
 0x23b   : > { %1840 = vmatprep.subr.bf16.mxu0 %v1839_v44 }
 0x23d   : > { %1897 = vmatpush1.bf16.msra.mxu1 %v1837_v43 }
 0x23e   : > { %1842 = vmatpush1.bf16.msra.mxu0 %v1841_v60  ;;  %1882 = vmatprep.subr.bf16.mxu1 %v1839_v44 }
 0x23f   : > { %1844 = vmatprep.subr.bf16.mxu0 %v1843_v50 }
 0x241   : > { %1898 = vmatpush1.bf16.msra.mxu1 %v1841_v60 }
 0x242   : > { %1846 = vmatpush1.bf16.msra.mxu0 %v1845_v55  ;;  %1883 = vmatprep.subr.bf16.mxu1 %v1843_v50 }
 0x243   : > { %1848 = vmatprep.subr.bf16.mxu0 %v1847_v56 }
 0x245   : > { %1899 = vmatpush1.bf16.msra.mxu1 %v1845_v55 }
 0x246   : > { %1850 = vmatpush1.bf16.msra.mxu0 %v1849_v59  ;;  %1884 = vmatprep.subr.bf16.mxu1 %v1847_v56 }
 0x247   : > { %1852 = vmatprep.subr.bf16.mxu0 %v1851_v3 }
 0x249   : > { %1900 = vmatpush1.bf16.msra.mxu1 %v1849_v59 }
 0x24a   : > { %1854 = vmatpush1.bf16.msra.mxu0 %v1853_v11  ;;  %1885 = vmatprep.subr.bf16.mxu1 %v1851_v3 }
 0x24b   : > { %1856 = vmatprep.subr.bf16.mxu0 %v1855_v0 }
 0x24d   : > { %1901 = vmatpush1.bf16.msra.mxu1 %v1853_v11 }
 0x24e   : > { %1858 = vmatpush1.bf16.msra.mxu0 %v1857_v22  ;;  %1886 = vmatprep.subr.bf16.mxu1 %v1855_v0 }
 0x24f   : > { %1860 = vmatprep.subr.bf16.mxu0 %v1859_v20 }
 0x251   : > { %1902 = vmatpush1.bf16.msra.mxu1 %v1857_v22 }
 0x252   : > { %1862 = vmatpush1.bf16.msra.mxu0 %v1861_v25  ;;  %1887 = vmatprep.subr.bf16.mxu1 %v1859_v20 }
 0x253   : > { %1864 = vmatprep.subr.bf16.mxu0 %v1863_v5 }
 0x255   : > { %1903 = vmatpush1.bf16.msra.mxu1 %v1861_v25 }
 0x256   : > { %1866 = vmatpush1.bf16.msra.mxu0 %v1865_v31  ;;  %1888 = vmatprep.subr.bf16.mxu1 %v1863_v5 }
 0x257   : > { %1868 = vmatprep.subr.bf16.mxu0 %v1867_v32 }
 0x259   : > { %1904 = vmatpush1.bf16.msra.mxu1 %v1865_v31 }
 0x25a   : > { %1870 = vmatpush1.bf16.msra.mxu0 %v1869_v33  ;;  %1889 = vmatprep.subr.bf16.mxu1 %v1867_v32 }
 0x25b   : > { %1872 = vmatprep.subr.bf16.mxu0 %v1871_v14 }
 0x25d   : > { %1905 = vmatpush1.bf16.msra.mxu1 %v1869_v33 }
 0x25e   : > { %1874 = vmatpush1.bf16.msra.mxu0 %v1873_v35  ;;  %1890 = vmatprep.subr.bf16.mxu1 %v1871_v14 }
 0x261   : > { %1251 = vmatmul.mubr.f32.vlgmr.msra.gmra.mrb[4].mxu0 %v2901_v16  ;;  %1906 = vmatpush1.bf16.msra.mxu1 %v1873_v35 }
 0x264   : > { %1257 = vmatmul.mubr.f32.vlgmr.msra.gmra.mrb[4].mxu1 %v2907_v9 }
 0x265   : > { %2224 = shalt.err (!%p2221_p5)
}
 0x266   : > { %s2225_s12 = scalar_lea.hbm %s2927_s22, 512  ;;  %s2229_s20 = scalar_lea.hbm %s3200_s28, 1024 }
 0x267   : > { %p2226_p8 = scmp.ne.s32.totalorder %s2927_s22, %s2225_s12  ;;  %p2230_p11 = scmp.lt.u32.totalorder %s2927_s22, %s3200_s28 }
 0x268   : > { %p2231_p13 = scmp.lt.u32.totalorder %s2229_s20, %s2225_s12  ;;  %p2233_p7 = scmp.lt.u32.totalorder %s2225_s12, %s2927_s22 }
 0x269   : > { %p2227_p1 = pnand %p2226_p8, %p3201_p12 }
 0x26a   : > { %p2232_p3 = por %p2231_p13, %p2230_p11 }
 0x26b   : > { %p2228_p0 = pneg %p2227_p1 }
 0x26c   : > { %p2234_p2 = por %p2233_p7, %p2232_p3 }
 0x26e   : > { %p2235_p6 = pnand %p2234_p2, %p2228_p0 }
 0x270   : > { %2238 = shalt.err (!%p2235_p6)
}
 0x271   : > { %s2392_s13 = smov 256   ;;  %s2393_s9 = smov 16  }
 0x272   : > { %1928 = dma.vmem_to_hbm [thread:$0]  (%p3201_p12), %s2930_s4, 512, %s2927_s22, %s1319_s14, %s2392_s13, %s2392_s13, %s2393_s9  }
 0x273   : > { %s3202_s8 = sld [smem:[#allocation36_spill]]  ;;  %s3203_s3 = sld [smem:[#allocation37_spill]] }
 0x274   : > { %s616_s22 = scalar_lea.vmem [#allocation13], %s2754_s18  ;;  %s2971_s14 = scalar_lea.vmem [#allocation14], %s2754_s18 }
 0x275   : > { %s1333_s4 = sshll.u32 %s616_s22, 4  ;;  %s1350_s23 = sshll.u32 %s2971_s14, 4  ;;  %s2974_s4 = int_to_ptr.vmem [resolvable:$true] %s1333_s4  ;;  %s2983_s23 = int_to_ptr.vmem [resolvable:$true] %s1350_s23 }
 0x276   : > { %s3204_s24 = sld [smem:[#allocation39_spill]]  ;;  %s3205_s11 = sld [smem:[#allocation40_spill]] }
 0x277   : > { %s2239_s16 = scalar_lea.vmem %s2974_s4, 512  ;;  %s2394_s26 = smov [#allocation13]  }
 0x278   : > { %p2240_p9 = scmp.ne.s32.totalorder %s2974_s4, %s2239_s16 }
 0x279   : > { %v860_v16 = vld [vmem:[%s3202_s8] sm:$0x3]  ;;  %s1304_s8 = scalar_lea.sflag [#allocation4], %s2751_s10 }
 0x27a   : > { %v865_v9 = vrot.slane %v860_v16, %v2881_v47  ;;  %v869_v36 = vrot.slane %v860_v16, %v2883_v48  ;;  %v1017_v37 = vld [vmem:[%s3203_s3] sm:$0x3]  ;;  %p2241_p10 = pnand %p2240_p9, %p3201_p12  ;;  %s2243_s3 = sshll.u32 %s2394_s26, 4  ;;  %s2244_s3 = int_to_ptr.vmem [resolvable:$false] %s2243_s3 }
 0x27b   : > { %v1022_v41 = vrot.slane %v1017_v37, %v2881_v47  ;;  %v1026_v43 = vrot.slane %v1017_v37, %v2883_v48  ;;  %s2245_s12 = scalar_lea.vmem %s2244_s3, 1024  ;;  %p2246_p5 = scmp.lt.s32.totalorder %s2974_s4, %s2244_s3 }
 0x27c   : > { %s2981_s20 = scalar_lea.hbm %s3204_s24, %s2921_s5  ;;  %s2990_s1 = scalar_lea.hbm %s3205_s11, %s2921_s5 }
 0x27d   : > { %p2242_p4 = pneg %p2241_p10  ;;  %p2247_p8 = scmp.lt.s32.totalorder %s2245_s12, %s2239_s16 }
 0x27f   : > { %p2248_p1 = por %p2247_p8, %p2246_p5 }
 0x281   : > { %p2249_p0 = pnand %p2248_p1, %p2242_p4 }
 0x2f3   : > { %v938_v38 = vpop.f32.mrb[0].mxu0 }
 0x2f4   : > { %v939_v39 = vadd.f32 %v938_v38, %v865_v9  ;;  %v940_v40 = vpop.f32.mrb[1].mxu0 }
 0x2f5   : > { %v941_v42 = vadd.f32 %v940_v40, %v869_v36 }
 0x2f6   : > { %949 = vst [vmem:[%s616_s22] sm:$0xff] %v939_v39 }
 0x2f7   : > { %950 = vst [vmem:[%s616_s22 + $0x8] sm:$0xff] %v941_v42  ;;  %v1095_v44 = vpop.f32.mrb[0].mxu1 }
 0x2f8   : > { %v944_v45 = vpop.f32.mrb[2].mxu0  ;;  %v1096_v46 = vadd.f32 %v1095_v44, %v1022_v41  ;;  %v1097_v49 = vpop.f32.mrb[1].mxu1 }
 0x2f9   : > { %v945_v61 = vadd.f32 %v944_v45, %v865_v9  ;;  %v946_v60 = vpop.f32.mrb[3].mxu0  ;;  %v1098_v50 = vadd.f32 %v1097_v49, %v1026_v43 }
 0x2fa   : > { %1106 = vst [vmem:[%s2971_s14] sm:$0xff] %v1096_v46  ;;  %v947_v51 = vadd.f32 %v946_v60, %v869_v36 }
 0x2fb   : > { %951 = vst [vmem:[%s616_s22 + $0x10] sm:$0xff] %v945_v61  ;;  %1107 = vst [vmem:[%s2971_s14 + $0x8] sm:$0xff] %v1098_v50  ;;  %v1101_v52 = vpop.f32.mrb[2].mxu1 }
 0x2fc   : > { %952 = vst [vmem:[%s616_s22 + $0x18] sm:$0xff] %v947_v51  ;;  %v1102_v53 = vadd.f32 %v1101_v52, %v1022_v41  ;;  %v1103_v54 = vpop.f32.mrb[3].mxu1 }
 0x2fd   : > { %v1104_v55 = vadd.f32 %v1103_v54, %v1026_v43 }
 0x2fe   : > { %2252 = shalt.err (!%p2249_p0)
}
 0x2ff   : > { %s2253_s22 = scalar_lea.hbm %s2981_s20, 512  ;;  %s2257_s25 = scalar_lea.hbm %s3204_s24, 1024 }
 0x300   : > { %p2254_p11 = scmp.ne.s32.totalorder %s2981_s20, %s2253_s22  ;;  %p2258_p7 = scmp.lt.u32.totalorder %s2981_s20, %s3204_s24 }
 0x301   : > { %p2259_p2 = scmp.lt.u32.totalorder %s2257_s25, %s2253_s22  ;;  %p2261_p9 = scmp.lt.u32.totalorder %s2253_s22, %s2981_s20 }
 0x302   : > { %p2255_p13 = pnand %p2254_p11, %p3201_p12 }
 0x303   : > { %p2260_p6 = por %p2259_p2, %p2258_p7 }
 0x304   : > { %p2256_p3 = pneg %p2255_p13 }
 0x305   : > { %p2262_p10 = por %p2261_p9, %p2260_p6 }
 0x307   : > { %p2263_p4 = pnand %p2262_p10, %p2256_p3 }
 0x309   : > { %2266 = shalt.err (!%p2263_p4)
}
 0x30a   : > { %1925 = dma.vmem_to_hbm [thread:$0]  (%p3201_p12), %s2974_s4, 512, %s2981_s20, %s1304_s8, %s2392_s13, %s2392_s13, %s2393_s9  }
 0x30b   : > { %1108 = vst [vmem:[%s2971_s14 + $0x10] sm:$0xff] %v1102_v53  ;;  %1109 = vst [vmem:[%s2971_s14 + $0x18] sm:$0xff] %v1104_v55  ;;  %s3023_s16 = scalar_lea.sflag [#allocation15], %s543_s27  ;;  %s2267_s12 = scalar_lea.vmem %s2983_s23, 512 }
 0x30c   : > { %p2268_p5 = scmp.ne.s32.totalorder %s2983_s23, %s2267_s12  ;;  %s2395_s10 = smov [#allocation14]  }
 0x30d   : > { %s2271_s22 = sshll.u32 %s2395_s10, 4  ;;  %s2272_s22 = int_to_ptr.vmem [resolvable:$false] %s2271_s22 }
 0x30e   : > { %p2269_p8 = pnand %p2268_p5, %p3201_p12  ;;  %s2273_s29 = scalar_lea.vmem %s2272_s22, 1024 }
 0x30f   : > { %p2274_p0 = scmp.lt.s32.totalorder %s2983_s23, %s2272_s22  ;;  %p2275_p11 = scmp.lt.s32.totalorder %s2273_s29, %s2267_s12 }
 0x310   : > { %p2270_p1 = pneg %p2269_p8 }
 0x311   : > { %p2276_p13 = por %p2275_p11, %p2274_p0 }
 0x313   : > { %p2277_p3 = pnand %p2276_p13, %p2270_p1 }
 0x315   : > { %2280 = shalt.err (!%p2277_p3)
}
 0x316   : > { %s2281_s17 = scalar_lea.hbm %s2990_s1, 512  ;;  %s2285_s14 = scalar_lea.hbm %s3205_s11, 1024 }
 0x317   : > { %p2282_p7 = scmp.ne.s32.totalorder %s2990_s1, %s2281_s17  ;;  %p2286_p9 = scmp.lt.u32.totalorder %s2990_s1, %s3205_s11 }
 0x318   : > { %p2287_p10 = scmp.lt.u32.totalorder %s2285_s14, %s2281_s17  ;;  %p2289_p5 = scmp.lt.u32.totalorder %s2281_s17, %s2990_s1 }
 0x319   : > { %p2283_p2 = pnand %p2282_p7, %p3201_p12 }
 0x31a   : > { %p2288_p4 = por %p2287_p10, %p2286_p9 }
 0x31b   : > { %p2284_p6 = pneg %p2283_p2 }
 0x31c   : > { %p2290_p8 = por %p2289_p5, %p2288_p4 }
 0x31e   : > { %p2291_p1 = pnand %p2290_p8, %p2284_p6 }
 0x320   : > { %2294 = shalt.err (!%p2291_p1)
}
 0x321   : > { %1926 = dma.vmem_to_hbm [thread:$0]  (%p3201_p12), %s2983_s23, 512, %s2990_s1, %s3023_s16, %s2392_s13, %s2392_s13, %s2393_s9  }
 0x322   : > { %s3206_s26 = sld [smem:[#allocation38_spill]]  ;;  %s630_s3 = scalar_lea.vmem [#allocation16], %s2754_s18 }
 0x323   : > { %s1367_s12 = sshll.u32 %s630_s3, 4  ;;  %s3207_s10 = sld [smem:[#allocation41_spill]]  ;;  %s3056_s12 = int_to_ptr.vmem [resolvable:$true] %s1367_s12 }
 0x324   : > { %s2295_s18 = scalar_lea.vmem %s3056_s12, 512  ;;  %s2396_s29 = smov [#allocation16]  }
 0x325   : > { %p2296_p0 = scmp.ne.s32.totalorder %s3056_s12, %s2295_s18  ;;  %s2299_s17 = sshll.u32 %s2396_s29, 4  ;;  %s2300_s17 = int_to_ptr.vmem [resolvable:$false] %s2299_s17 }
 0x326   : > { %s2301_s27 = scalar_lea.vmem %s2300_s17, 1024  ;;  %p2302_p3 = scmp.lt.s32.totalorder %s3056_s12, %s2300_s17 }
 0x327   : > { %p2297_p11 = pnand %p2296_p0, %p3201_p12  ;;  %p2303_p7 = scmp.lt.s32.totalorder %s2301_s27, %s2295_s18 }
 0x328   : > { %v1174_v56 = vld [vmem:[%s3206_s26] sm:$0x3] }
 0x329   : > { %v1179_v4 = vrot.slane %v1174_v56, %v2881_v47  ;;  %v1183_v57 = vrot.slane %v1174_v56, %v2883_v48  ;;  %s3062_s22 = scalar_lea.hbm %s3207_s10, %s2921_s5  ;;  %p2298_p13 = pneg %p2297_p11 }
 0x32a   : > { %p2304_p2 = por %p2303_p7, %p2302_p3 }
 0x32c   : > { %p2305_p6 = pnand %p2304_p2, %p2298_p13 }
 0x334   : > { %v1252_v17 = vpop.f32.mrb[4].mxu0 }
 0x335   : > { %v1253_v58 = vadd.f32 %v1252_v17, %v1179_v4  ;;  %v1254_v59 = vpop.f32.mrb[5].mxu0 }
 0x336   : > { %v1255_v3 = vadd.f32 %v1254_v59, %v1183_v57 }
 0x337   : > { %1263 = vst [vmem:[%s630_s3] sm:$0xff] %v1253_v58  ;;  %v1258_v63 = vpop.f32.mrb[4].mxu1 }
 0x338   : > { %1264 = vst [vmem:[%s630_s3 + $0x8] sm:$0xff] %v1255_v3  ;;  %v1259_v7 = vadd.f32 %v1258_v63, %v1179_v4  ;;  %v1260_v62 = vpop.f32.mrb[5].mxu1 }
 0x339   : > { %v1261_v47 = vadd.f32 %v1260_v62, %v1183_v57 }
 0x33a   : > { %1265 = vst [vmem:[%s630_s3 + $0x10] sm:$0xff] %v1259_v7 }
 0x33b   : > { %1266 = vst [vmem:[%s630_s3 + $0x18] sm:$0xff] %v1261_v47 }
 0x33c   : > { %2308 = shalt.err (!%p2305_p6)
}
 0x33d   : > { %s2309_s5 = scalar_lea.hbm %s3062_s22, 512  ;;  %s2313_s20 = scalar_lea.hbm %s3207_s10, 1024 }
 0x33e   : > { %p2310_p9 = scmp.ne.s32.totalorder %s3062_s22, %s2309_s5  ;;  %p2314_p5 = scmp.lt.u32.totalorder %s3062_s22, %s3207_s10 }
 0x33f   : > { %p2315_p8 = scmp.lt.u32.totalorder %s2313_s20, %s2309_s5  ;;  %p2317_p0 = scmp.lt.u32.totalorder %s2309_s5, %s3062_s22 }
 0x340   : > { %p2311_p10 = pnand %p2310_p9, %p3201_p12 }
 0x341   : > { %p2316_p1 = por %p2315_p8, %p2314_p5 }
 0x342   : > { %p2312_p4 = pneg %p2311_p10 }
 0x343   : > { %p2318_p11 = por %p2317_p0, %p2316_p1 }
 0x345   : > { %p2319_p13 = pnand %p2318_p11, %p2312_p4 }
 0x347   : > { %2322 = shalt.err (!%p2319_p13)
}
 0x348   : > { %1927 = dma.vmem_to_hbm [thread:$0]  (%p3201_p12), %s3056_s12, 512, %s3062_s22, %s3023_s16, %s2392_s13, %s2392_s13, %s2393_s9  }
 0x349 PF: > { %s3208_s25 = sld [smem:[#allocation26_spill]]  ;;  %s3209_s26 = sld [smem:[#allocation31_spill]] }
 0x34a   : > { %s3210_s3 = sld [smem:[#allocation27_spill]] }
 0x34f   : > { %s1399_s23 = sand.u32 1, %s3208_s25   ;;  %p3211_p3 = scmp.ne.s32.totalorder %s3209_s26, 0 }
 0x350   : > { %p3212_p7 = scmp.ge.s32.totalorder %s3210_s3, 2  ;;  %s1400_s1 = scalar_lea.sflag [#allocation4], %s1399_s23 }
 0x352   : > { %p1954_p2 = pnand %p3212_p7, %p3211_p3 }
 0x354   : > { %2356 = dma.done.wait (!%p1954_p2), %s1400_s1, 512  }
 0x355   : > { %2358 = vsyncadd (!%p1954_p2), %s1400_s1, 4294966784  ;;  %s3213_s19 = sadd.s32 4294967294, %s3210_s3  }
 0x356   : > { %s1408_s18 = sand.u32 1, %s3213_s19  }
 0x357   : > { %s1409_s29 = scalar_lea.sflag [#allocation15], %s1408_s18 }
 0x358   : > { %2360 = dma.done.wait (!%p1954_p2), %s1409_s29, 1024  }
 0x359   : > { %2362 = vsyncadd (!%p1954_p2), %s1409_s29, 4294966272  ;;  %s1427_s17 = scalar_lea.sflag [#allocation18], %s1399_s23 }
 0x35a   : > { %2364 = dma.done.wait (!%p1954_p2), %s1427_s17, 512  }
 0x35b   : > { %2366 = vsyncadd (!%p1954_p2), %s1427_s17, 4294966784  ;;  %s3214_s16 = sld [smem:[#allocation28_spill]]  ;;  %s3215_s13 = sld [smem:[#allocation29_spill]] }
 0x35c   : > { %s3216_s29 = smov %s2373_s30  ;;  %s3217_s30 = smov %s2377_s15 }
 0x361   : > { %p39_p12 = scmp.ge.s32.totalorder %s3214_s16, 4   ;;  %s3218_s15 = smov %s3215_s13 }
 0x363   :  { %41 = sbr.rel (!%p39_p12) target bundleno = 25 (0x19), region = 194 }
 0x36a   :  { %1432 = vsyncpa [#allocation3], 1 }
 0x36b   :  { %1434 = vsyncpa [#allocation3 + $0x1], 1 }
 0x36c   :  { %1435 = vsyncpa [#allocation6], 1 }
 0x36d   :  { %1437 = vsyncpa [#allocation6 + $0x1], 1 }
 0x36e   :  { %1438 = vsyncpa [#allocation9], 1 }
 0x36f   :  { %1439 = vsyncpa [#allocation12], 1 }
 0x370   :  { %1440 = vsyncpa [#allocation4], 1 }
 0x371   :  { %1442 = vsyncpa [#allocation4 + $0x1], 1 }
 0x372   :  { %1443 = vsyncpa [#allocation15], 1 }
 0x373   :  { %1445 = vsyncpa [#allocation15 + $0x1], 1 }
 0x374   :  { %1446 = vsyncpa [#allocation18], 1 }
 0x375   :  { %1448 = vsyncpa [#allocation18 + $0x1], 1 }

// kernel: tpu_custom_call.1
= control target key start
LH: loop header
LB: loop body
LE: loop exit
PB: predicated region body
PF: predicated region fallthrough
CT: control target
= control target key end

     0   :  { %s3109_s0 = inlined_call_operand.hbm [shape: f32[32,256], index: 0, kind: input, shape index: {}]   ;;  %s3110_s1 = inlined_call_operand.hbm [shape: f32[32,256], index: 1, kind: input, shape index: {}]   ;;  %s3111_s2 = inlined_call_operand.hbm [shape: f32[32,256], index: 2, kind: input, shape index: {}]   ;;  %s3112_s3 = inlined_call_operand.vmem [shape: f32[1,256], index: 3, kind: input, shape index: {}]   ;;  %s3113_s4 = inlined_call_operand.vmem [shape: f32[1,256], index: 4, kind: input, shape index: {}]   ;;  %s3114_s5 = inlined_call_operand.hbm [shape: f32[256,256], index: 5, kind: input, shape index: {}]   ;;  %s3115_s6 = inlined_call_operand.hbm [shape: f32[256,256], index: 6, kind: input, shape index: {}]   ;;  %s3116_s7 = inlined_call_operand.hbm [shape: f32[256,256], index: 7, kind: input, shape index: {}]   ;;  %s3117_s8 = inlined_call_operand.vmem [shape: f32[1,256], index: 8, kind: input, shape index: {}]   ;;  %s3118_s9 = inlined_call_operand.vmem [shape: f32[1,256], index: 9, kind: input, shape index: {}]   ;;  %s3119_s10 = inlined_call_operand.vmem [shape: f32[1,256], index: 10, kind: input, shape index: {}]   ;;  %s3120_s11 = inlined_call_operand.hbm [shape: f32[32,256], index: 11, kind: output, shape index: {0}]   ;;  %s3121_s12 = inlined_call_operand.hbm [shape: f32[32,256], index: 12, kind: output, shape index: {1}]   ;;  %s3122_s13 = inlined_call_operand.hbm [shape: f32[32,256], index: 13, kind: output, shape index: {2}]   ;;  %s3123_s14 = inlined_call_operand.hbm [shape: f32[32,256], index: 14, kind: output, shape index: {3}]  }
   0x1   :  { %3154 = sst [smem:[#allocation32_spill]] %s3110_s1 }
   0x2   :  { %3155 = sst [smem:[#allocation33_spill]] %s3112_s3 }
   0x3   :  { %3156 = sst [smem:[#allocation34_spill]] %s3113_s4 }
   0x4   :  { %3157 = sst [smem:[#allocation35_spill]] %s3114_s5 }
   0x5   :  { %3158 = sst [smem:[#allocation36_spill]] %s3117_s8 }
   0x6   :  { %3159 = sst [smem:[#allocation37_spill]] %s3118_s9 }
   0x7   :  { %3160 = sst [smem:[#allocation38_spill]] %s3119_s10 }
   0x8   :  { %3161 = sst [smem:[#allocation39_spill]] %s3120_s11 }
   0x9   :  { %3162 = sst [smem:[#allocation40_spill]] %s3121_s12 }
   0xa   :  { %3163 = sst [smem:[#allocation41_spill]] %s3122_s13 }
   0xb   :  { %3164 = sst [smem:[#allocation42_spill]] %s3123_s14 }
   0xc   :  { %20 = vsyncpa [#allocation3], 0 }
   0xd   :  { %22 = vsyncpa [#allocation3 + $0x1], 0 }
   0xe   :  { %23 = vsyncpa [#allocation6], 0 }
   0xf   :  { %25 = vsyncpa [#allocation6 + $0x1], 0 }
  0x10   :  { %26 = vsyncpa [#allocation9], 0 }
  0x11   :  { %27 = vsyncpa [#allocation12], 0 }
  0x12   :  { %28 = vsyncpa [#allocation4], 0 }
  0x13   :  { %30 = vsyncpa [#allocation4 + $0x1], 0 }
  0x14   :  { %31 = vsyncpa [#allocation15], 0 }
  0x15   :  { %33 = vsyncpa [#allocation15 + $0x1], 0 }
  0x16   :  { %34 = vsyncpa [#allocation18], 0 }
  0x17   :  { %36 = vsyncpa [#allocation18 + $0x1], 0  ;;  %s2472_s29 = smov 0   ;;  %s2474_s30 = smov 0  }
  0x18   :  { %s2476_s15 = smov 0   ;;  %s2478_s16 = smov 0  }
  0x19 LB: > { %3165 = sst [smem:[#allocation26_spill]] %s2369_s29  ;;  %s2493_s17 = sadd.s32 4294967295, %s2381_s16   ;;  %s2381_s16 = sphi %s2478_s16, %s3214_s16   ;;  %s2377_s15 = sphi %s2476_s15, %s3218_s15   ;;  %s2373_s30 = sphi %s2474_s30, %s3217_s30   ;;  %s2369_s29 = sphi %s2472_s29, %s3216_s29  }
  0x1a   : > { %3166 = sst [smem:[#allocation27_spill]] %s2381_s16  ;;  %s3124_s18 = sadd.s32 4294967294, %s2381_s16  }
  0x1b   : > { %s2497_s19 = sadd.s32 1, %s2381_s16   ;;  %s49_s20 = sadd.s32 1, %s2377_s15 }
  0x1c   : > { %3167 = sst [smem:[#allocation28_spill]] %s2497_s19  ;;  %s46_s21 = ssub.s32 %s2381_s16, %s2497_s19 }
  0x1d   : > { %p56_p0 = scmp.ne.s32.totalorder %s2377_s15, %s2373_s30  ;;  %p47_p1 = scmp.eq.s32.totalorder %s46_s21, 0 }
  0x1e   : > { %p57_p2 = scmp.eq.s32.totalorder %s2381_s16, 0  ;;  %p62_p3 = scmp.ne.s32.totalorder %s2373_s30, %s2369_s29 }
  0x1f   : > { %p3132_p4 = scmp.eq.s32.totalorder %s2493_s17, 0  ;;  %p306_p7 = scmp.eq.s32.totalorder %s2493_s17, 1 }
  0x20   : > { %s2509_s22 = scalar_select %p47_p1, %s2377_s15, %s49_s20  }
  0x21   : > { %p2511_p5 = por %p57_p2, %p56_p0  ;;  %p2517_p6 = por %p3132_p4, %p62_p3 }
  0x22   : > { %3168 = sst [smem:[#allocation29_spill]] %s2509_s22  ;;  %p312_p8 = scmp.eq.s32.totalorder %s3124_s18, 1 }
  0x23   : > { %s3169_s23 = scalar_select %p2511_p5, 1, 0 }
  0x24   : > { %s3170_s24 = scalar_select %p2517_p6, 1, 0 }
  0x25   : > { %p1623_p9 = scmp.ge.s32.totalorder %s2381_s16, 1  ;;  %p397_p10 = scmp.lt.s32.totalorder %s2381_s16, 3 }
  0x26   : > { %p2526_p11 = por %p306_p7, %p56_p0  ;;  %p2530_p12 = por %p312_p8, %p62_p3 }
  0x27   : > { %p2534_p13 = pnand %p1623_p9, %p397_p10  ;;  %s2383_s28 = smov [#allocation8]  }
  0x28   : > { %s3171_s25 = scalar_select %p2526_p11, 1, 0 }
  0x29   : > { %s3173_s26 = scalar_select %p2530_p12, 1, 0 }
  0x2a   : > { %3172 = sst [smem:[#allocation30_spill]] %s3171_s25  ;;  %p1933_p1 = pneg %p2534_p13 }
  0x2b   : > { %3174 = sst [smem:[#allocation31_spill]] %s3173_s26  ;;  %s415_s20 = sshll.u32 %s2383_s28, 4  ;;  %s416_s20 = int_to_ptr.vmem [resolvable:$true] %s415_s20 }
  0x2c   : > { %s3175_s27 = scalar_select %p2534_p13, 1, 0 }
  0x2d   : > { %p2542_p2 = pnand %p1933_p1, %p3132_p4  ;;  %s3131_s18 = sand.u32 1, %s2377_s15  }
  0x2e   : > { %s2551_s22 = sshll.u32 %s3131_s18, 5  ;;  %s3177_s5 = sld [smem:[#allocation35_spill]] }
  0x2f   : > { %s3176_s21 = scalar_select %p2542_p2, 1, 0 }
  0x30   : > { %p2561_p8 = pneg %p2542_p2 }
  0x32   : > { %s3178_s28 = scalar_select %p2561_p8, 1, 0 }
  0x34   : > { %s2037_s29 = scalar_lea.hbm %s3177_s5, 8192 }
  0x35   : > { %p2038_p7 = scmp.ne.s32.totalorder %s3177_s5, %s2037_s29  ;;  %p2044_p1 = scmp.lt.u32.totalorder %s2037_s29, %s3177_s5 }
  0x37   : > { %p2040_p9 = pnand %p2561_p8, %p2038_p7 }
  0x39   : > { %p2041_p10 = pneg %p2040_p9 }
  0x3b   : > { %p2046_p0 = pnand %p2044_p1, %p2041_p10 }
  0x3d   : > { %2049 = shalt.err (!%p2046_p0)
}
  0x3e   : > { %s2050_s19 = scalar_lea.vmem %s416_s20, 8192  ;;  %p2058_p11 = scmp.lt.s32.totalorder %s416_s20, %s416_s20 }
  0x3f   : > { %p2051_p4 = scmp.ne.s32.totalorder %s416_s20, %s2050_s19  ;;  %p2059_p6 = scmp.lt.s32.totalorder %s2050_s19, %s2050_s19 }
  0x41   : > { %p2053_p3 = pnand %p2051_p4, %p2561_p8  ;;  %p2060_p13 = por %p2059_p6, %p2058_p11 }
  0x43   : > { %p2054_p12 = pneg %p2053_p3 }
  0x45   : > { %p2061_p5 = pnand %p2060_p13, %p2054_p12 }
  0x47   : > { %2064 = shalt.err (!%p2061_p5)
}
  0x48   : > { %s3137_s10 = smov 256   ;;  %s3139_s12 = smov 16  }
  0x49   : > { %1936 = dma.hbm_to_vmem [thread:$0]  (!%p2542_p2), %s3177_s5, 8192, %s416_s20, [#allocation9], %s3137_s10, %s3137_s10, %s3139_s12  }
  0x4a   : > { %s2581_s18 = sshll.u32 %s2381_s16, 9  ;;  %p3179_p4 = scmp.ne.s32.totalorder %s3169_s23, 0 }
  0x4b   : > { %p3180_p5 = scmp.lt.s32.totalorder %s2381_s16, 2  ;;  %s486_s19 = sand.u32 1, %s2381_s16  }
  0x4c   : > { %s3182_s1 = sld [smem:[#allocation32_spill]]  ;;  %s490_s20 = scalar_lea.vmem [#allocation5], %s2551_s22 }
  0x4d   : > { %p2587_p6 = pnand %p3180_p5, %p3179_p4  ;;  %s498_s13 = sshll.u32 %s490_s20, 4  ;;  %s2599_s13 = int_to_ptr.vmem [resolvable:$true] %s498_s13 }
  0x4e   : > { %s2601_s23 = scalar_lea.sflag [#allocation6], %s486_s19 }
  0x4f   : > { %s3181_s26 = scalar_select %p2587_p6, 1, 0 }
  0x50   : > { %p2607_p12 = pneg %p2587_p6 }
  0x52   : > { %s2596_s8 = scalar_lea.hbm %s3182_s1, %s2581_s18  ;;  %s2070_s12 = scalar_lea.hbm %s3182_s1, 1024 }
  0x53   : > { %s2065_s29 = scalar_lea.hbm %s2596_s8, 512  ;;  %p2071_p3 = scmp.lt.u32.totalorder %s2596_s8, %s3182_s1 }
  0x54   : > { %p2066_p11 = scmp.ne.s32.totalorder %s2596_s8, %s2065_s29  ;;  %p2072_p7 = scmp.lt.u32.totalorder %s2070_s12, %s2065_s29 }
  0x55   : > { %s3183_s10 = scalar_select %p2607_p12, 1, 0 }
  0x56   : > { %p2068_p13 = pnand %p2607_p12, %p2066_p11  ;;  %p2073_p9 = por %p2072_p7, %p2071_p3 }
  0x57   : > { %p2074_p10 = scmp.lt.u32.totalorder %s2065_s29, %s2596_s8 }
  0x58   : > { %p2069_p0 = pneg %p2068_p13 }
  0x59   : > { %p2075_p1 = por %p2074_p10, %p2073_p9 }
  0x5b   : > { %p2076_p4 = pnand %p2075_p1, %p2069_p0 }
  0x5d   : > { %2079 = shalt.err (!%p2076_p4)
}
  0x5e   : > { %s2080_s19 = scalar_lea.vmem %s2599_s13, 512  ;;  %s2386_s9 = smov [#allocation5]  }
  0x5f   : > { %p2081_p5 = scmp.ne.s32.totalorder %s2599_s13, %s2080_s19  ;;  %s2085_s11 = sshll.u32 %s2386_s9, 4  ;;  %s2086_s11 = int_to_ptr.vmem [resolvable:$false] %s2085_s11 }
  0x60   : > { %s2087_s5 = scalar_lea.vmem %s2086_s11, 1024  ;;  %p2088_p2 = scmp.lt.s32.totalorder %s2599_s13, %s2086_s11 }
  0x61   : > { %p2083_p11 = pnand %p2081_p5, %p2607_p12  ;;  %p2089_p8 = scmp.lt.s32.totalorder %s2087_s5, %s2080_s19 }
  0x63   : > { %p2084_p13 = pneg %p2083_p11  ;;  %p2090_p3 = por %p2089_p8, %p2088_p2 }
  0x65   : > { %p2091_p7 = pnand %p2090_p3, %p2084_p13 }
  0x67   : > { %2094 = shalt.err (!%p2091_p7)
}
  0x68   : > { %s3184_s12 = smov 16   ;;  %s3185_s29 = smov 256  }
  0x69   : > { %1949 = dma.hbm_to_vmem [thread:$0]  (!%p2587_p6), %s2596_s8, 512, %s2599_s13, %s2601_s23, %s3185_s29, %s3185_s29, %s3184_s12  }
  0x6a   : > { %s2387_s20 = smov [#allocation10]   ;;  %s2388_s9 = smov [#allocation11]  }
  0x6b   : > { %s428_s1 = sshll.u32 %s2387_s20, 4  ;;  %s441_s16 = sshll.u32 %s2388_s9, 4  ;;  %s429_s1 = int_to_ptr.vmem [resolvable:$true] %s428_s1  ;;  %s442_s16 = int_to_ptr.vmem [resolvable:$true] %s441_s16 }
  0x6c   : > { %s2095_s5 = scalar_lea.hbm %s3115_s6, 8192  ;;  %p3186_p8 = scmp.ne.s32.totalorder %s3178_s28, 0 }
  0x6d   : > { %p2096_p2 = scmp.ne.s32.totalorder %s3115_s6, %s2095_s5  ;;  %p2102_p10 = scmp.lt.u32.totalorder %s2095_s5, %s3115_s6 }
  0x6f   : > { %p2098_p0 = pnand %p2096_p2, %p3186_p8 }
  0x71   : > { %p2099_p9 = pneg %p2098_p0 }
  0x73   : > { %p2104_p1 = pnand %p2102_p10, %p2099_p9 }
  0x75   : > { %2107 = shalt.err (!%p2104_p1)
}
  0x76   : > { %s2108_s8 = scalar_lea.vmem %s429_s1, 8192  ;;  %p2116_p13 = scmp.lt.s32.totalorder %s429_s1, %s429_s1 }
  0x77   : > { %p2109_p4 = scmp.ne.s32.totalorder %s429_s1, %s2108_s8  ;;  %p2117_p3 = scmp.lt.s32.totalorder %s2108_s8, %s2108_s8 }
  0x79   : > { %p2111_p5 = pnand %p2109_p4, %p3186_p8  ;;  %p2118_p7 = por %p2117_p3, %p2116_p13 }
  0x7b   : > { %p2112_p11 = pneg %p2111_p5 }
  0x7d   : > { %p2119_p6 = pnand %p2118_p7, %p2112_p11 }
  0x7f   : > { %2122 = shalt.err (!%p2119_p6)
}
  0x80   : > { %p3187_p2 = scmp.ne.s32.totalorder %s3176_s21, 0  ;;  %s2123_s13 = scalar_lea.hbm %s3116_s7, 8192 }
  0x81   : > { %p2124_p0 = scmp.ne.s32.totalorder %s3116_s7, %s2123_s13  ;;  %p2130_p10 = scmp.lt.u32.totalorder %s2123_s13, %s3116_s7 }
  0x82   : > { %1939 = dma.hbm_to_vmem [thread:$0]  (!%p3187_p2), %s3115_s6, 8192, %s429_s1, [#allocation9], %s3185_s29, %s3185_s29, %s3184_s12  }
  0x83   : > { %p2126_p6 = pnand %p2124_p0, %p3186_p8 }
  0x85   : > { %p2127_p9 = pneg %p2126_p6 }
  0x87   : > { %p2132_p1 = pnand %p2130_p10, %p2127_p9 }
  0x89   : > { %2135 = shalt.err (!%p2132_p1)
}
  0x8a   : > { %s2136_s5 = scalar_lea.vmem %s442_s16, 8192  ;;  %p2144_p13 = scmp.lt.s32.totalorder %s442_s16, %s442_s16 }
  0x8b   : > { %p2137_p4 = scmp.ne.s32.totalorder %s442_s16, %s2136_s5  ;;  %p2145_p3 = scmp.lt.s32.totalorder %s2136_s5, %s2136_s5 }
  0x8d   : > { %p2139_p5 = pnand %p2137_p4, %p3186_p8  ;;  %p2146_p7 = por %p2145_p3, %p2144_p13 }
  0x8f   : > { %p2140_p11 = pneg %p2139_p5 }
  0x91   : > { %p2147_p12 = pnand %p2146_p7, %p2140_p11 }
  0x93   : > { %2150 = shalt.err (!%p2147_p12)
}
  0x94   : > { %1942 = dma.hbm_to_vmem [thread:$0]  (!%p3187_p2), %s3116_s7, 8192, %s442_s16, [#allocation12], %s3185_s29, %s3185_s29, %s3184_s12  }
  0x95   : > { %s2680_s4 = scalar_lea.hbm %s3109_s0, %s2581_s18  ;;  %s468_s21 = scalar_lea.vmem [#allocation2], %s2551_s22 }
  0x96   : > { %s476_s14 = sshll.u32 %s468_s21, 4  ;;  %s2689_s20 = scalar_lea.hbm %s3111_s2, %s2581_s18  ;;  %s2683_s14 = int_to_ptr.vmem [resolvable:$true] %s476_s14 }
  0x97   : > { %s3188_s9 = sand.u32 1, %s2377_s15   ;;  %s2151_s11 = scalar_lea.hbm %s2680_s4, 512 }
  0x98   : > { %s2693_s16 = scalar_lea.sflag [#allocation3], %s3188_s9  ;;  %p2152_p12 = scmp.ne.s32.totalorder %s2680_s4, %s2151_s11 }
  0x99   : > { %p3189_p8 = scmp.ne.s32.totalorder %s3183_s10, 0  ;;  %s2156_s1 = scalar_lea.hbm %s3109_s0, 1024 }
  0x9a   : > { %p2157_p6 = scmp.lt.u32.totalorder %s2680_s4, %s3109_s0  ;;  %p2158_p9 = scmp.lt.u32.totalorder %s2156_s1, %s2151_s11 }
  0x9b   : > { %p2154_p2 = pnand %p2152_p12, %p3189_p8  ;;  %p2160_p1 = scmp.lt.u32.totalorder %s2151_s11, %s2680_s4 }
  0x9c   : > { %p2159_p10 = por %p2158_p9, %p2157_p6 }
  0x9d   : > { %p2155_p0 = pneg %p2154_p2 }
  0x9e   : > { %p2161_p4 = por %p2160_p1, %p2159_p10 }
  0xa0   : > { %p2162_p5 = pnand %p2161_p4, %p2155_p0 }
  0xa2   : > { %2165 = shalt.err (!%p2162_p5)
}
  0xa3   : > { %s2166_s18 = scalar_lea.vmem %s2683_s14, 512  ;;  %s2389_s3 = smov [#allocation2]  }
  0xa4   : > { %p2167_p11 = scmp.ne.s32.totalorder %s2683_s14, %s2166_s18  ;;  %s2171_s21 = sshll.u32 %s2389_s3, 4  ;;  %s2172_s21 = int_to_ptr.vmem [resolvable:$false] %s2171_s21 }
  0xa5   : > { %s2173_s25 = scalar_lea.vmem %s2172_s21, 1024  ;;  %p2174_p7 = scmp.lt.s32.totalorder %s2683_s14, %s2172_s21 }
  0xa6   : > { %p2169_p13 = pnand %p2167_p11, %p3189_p8  ;;  %p2175_p12 = scmp.lt.s32.totalorder %s2173_s25, %s2166_s18 }
  0xa8   : > { %p2170_p3 = pneg %p2169_p13  ;;  %p2176_p2 = por %p2175_p12, %p2174_p7 }
  0xaa   : > { %p2177_p6 = pnand %p2176_p2, %p2170_p3 }
  0xac   : > { %2180 = shalt.err (!%p2177_p6)
}
  0xad   : > { %p3190_p0 = scmp.ne.s32.totalorder %s3181_s26, 0  ;;  %s512_s13 = scalar_lea.vmem [#allocation7], %s2551_s22 }
  0xae   : > { %s520_s9 = sshll.u32 %s512_s13, 4  ;;  %s2181_s11 = scalar_lea.hbm %s2689_s20, 512  ;;  %s2721_s9 = int_to_ptr.vmem [resolvable:$true] %s520_s9 }
  0xaf   : > { %1946 = dma.hbm_to_vmem [thread:$0]  (!%p3190_p0), %s2680_s4, 512, %s2683_s14, %s2693_s16, %s3185_s29, %s3185_s29, %s3184_s12  }
  0xb0   : > { %p2182_p9 = scmp.ne.s32.totalorder %s2689_s20, %s2181_s11  ;;  %s2186_s1 = scalar_lea.hbm %s3111_s2, 1024 }
  0xb1   : > { %p2187_p4 = scmp.lt.u32.totalorder %s2689_s20, %s3111_s2  ;;  %p2188_p5 = scmp.lt.u32.totalorder %s2186_s1, %s2181_s11 }
  0xb2   : > { %p2184_p10 = pnand %p2182_p9, %p3189_p8  ;;  %p2190_p13 = scmp.lt.u32.totalorder %s2181_s11, %s2689_s20 }
  0xb3   : > { %p2189_p11 = por %p2188_p5, %p2187_p4 }
  0xb4   : > { %p2185_p1 = pneg %p2184_p10 }
  0xb5   : > { %p2191_p3 = por %p2190_p13, %p2189_p11 }
  0xb7   : > { %p2192_p7 = pnand %p2191_p3, %p2185_p1 }
  0xb9   : > { %2195 = shalt.err (!%p2192_p7)
}
  0xba   : > { %s2196_s22 = scalar_lea.vmem %s2721_s9, 512  ;;  %s2390_s4 = smov [#allocation7]  }
  0xbb   : > { %p2197_p12 = scmp.ne.s32.totalorder %s2721_s9, %s2196_s22  ;;  %s2201_s14 = sshll.u32 %s2390_s4, 4  ;;  %s2202_s14 = int_to_ptr.vmem [resolvable:$false] %s2201_s14 }
  0xbc   : > { %s2203_s16 = scalar_lea.vmem %s2202_s14, 1024  ;;  %p2204_p9 = scmp.lt.s32.totalorder %s2721_s9, %s2202_s14 }
  0xbd   : > { %p2199_p2 = pnand %p2197_p12, %p3189_p8  ;;  %p2205_p10 = scmp.lt.s32.totalorder %s2203_s16, %s2196_s22 }
  0xbf   : > { %p2200_p6 = pneg %p2199_p2  ;;  %p2206_p4 = por %p2205_p10, %p2204_p9 }
  0xc1   : > { %p2207_p5 = pnand %p2206_p4, %p2200_p6 }
  0xc3   : > { %2210 = shalt.err (!%p2207_p5)
}
  0xc4   : > { %1952 = dma.hbm_to_vmem [thread:$0]  (!%p3190_p0), %s2689_s20, 512, %s2721_s9, %s2601_s23, %s3185_s29, %s3185_s29, %s3184_s12  }
  0xc5   : > { %p3191_p8 = scmp.ne.s32.totalorder %s3175_s27, 0 }
  0xc6   : > { %s2751_s10 = sand.u32 (!%p3191_p8), 1, %s2373_s30   ;;  %p3192_p1 = scmp.ne.s32.totalorder (!%p3191_p8), %s3170_s24, 0 }
  0xc7   : > { %532 = sbr.rel (%p3191_p8) target bundleno = 841 (0x349), region = 64  ;;  %s2754_s18 = sshll.u32 (!%p3191_p8), %s2751_s10, 5 }
  0xc8   : > { %s535_s26 = scalar_lea.sflag (!%p3191_p8), [#allocation3], %s2751_s10  ;;  %s538_s3 = scalar_lea.vmem (!%p3191_p8), [#allocation2], %s2754_s18 }
  0xce   : > { %2340 = dma.done.wait (%p3192_p1), %s535_s26, 512  }
  0xcf   : > { %2342 = vsyncadd (%p3192_p1), %s535_s26, 4294966784  ;;  %s543_s27 = sand.u32 1, %s2493_s17   ;;  %s547_s12 = scalar_lea.vmem [#allocation5], %s2754_s18 }
  0xd0   : > { %s544_s23 = scalar_lea.sflag [#allocation6], %s543_s27 }
  0xd1   : > { %2344 = dma.done.wait (%p3192_p1), %s544_s23, 1024  }
  0xd2   : > { %2346 = vsyncadd (%p3192_p1), %s544_s23, 4294966272  ;;  %s556_s29 = scalar_lea.vmem [#allocation7], %s2754_s18  ;;  %p3193_p0 = scmp.eq.s32.totalorder %s2493_s17, 0 }
  0xd4   : > { %2348 = dma.done.wait (%p3193_p0), [#allocation9], 16384   ;;  %p3194_p11 = pmov %p3193_p0 }
  0xd5   : > { %p3195_p13 = pmov %p3193_p0 }
  0xd6   : > { %2350 = vsyncadd (%p3194_p11), [#allocation9], 4294950912 }
  0xd7   : > { %2352 = dma.done.wait (%p3195_p13), [#allocation12], 8192   ;;  %p3196_p3 = pmov %p3193_p0 }
  0xd8   : > { %v2779_v0 = vld [vmem:[%s538_s3] sm:$0xff]  ;;  %v2781_v1 = vld [vmem:[%s538_s3 + $0x8] sm:$0xff]  ;;  %v2783_v2 = vld [vmem:[%s538_s3 + $0x10] sm:$0xff]  ;;  %s3197_s21 = sld [smem:[#allocation33_spill]]  ;;  %s3198_s9 = sld [smem:[#allocation34_spill]] }
  0xd9   : > { %2354 = vsyncadd (%p3196_p3), [#allocation12], 4294959104  ;;  %v649_v3 = vadd.f32 %v2781_v1, %v2779_v0  ;;  %v2787_v4 = vld [vmem:[%s538_s3 + $0x18] sm:$0xff]  ;;  %v2789_v5 = vld [vmem:[%s547_s12] sm:$0xff]  ;;  %s2912_s11 = scalar_lea.vmem [#allocation17], %s2754_s18  ;;  %s3199_s19 = sld [smem:[#allocation30_spill]] }
  0xda   : > { %v2791_v6 = vld [vmem:[%s547_s12 + $0x8] sm:$0xff]  ;;  %v652_v7 = vadd.f32 %v2787_v4, %v2783_v2  ;;  %v2795_v8 = vld [vmem:[%s547_s12 + $0x10] sm:$0xff]  ;;  %v2797_v9 = vld [vmem:[%s547_s12 + $0x18] sm:$0xff]  ;;  %s2921_s5 = sshll.u32 %s2493_s17, 9  ;;  %s3200_s28 = sld [smem:[#allocation42_spill]] }
  0xdb   : > { %650 = vadd.xlane.f32.xlu0 %v649_v3  ;;  %v700_v10 = vadd.f32 %v2791_v6, %v2789_v5  ;;  %v703_v11 = vadd.f32 %v2797_v9, %v2795_v8  ;;  %v2803_v12 = vld [vmem:[%s556_s29] sm:$0xff]  ;;  %v2805_v13 = vld [vmem:[%s556_s29 + $0x8] sm:$0xff]  ;;  %v2807_v14 = vld [vmem:[%s556_s29 + $0x10] sm:$0xff]  ;;  %s1384_s4 = sshll.u32 %s2912_s11, 4  ;;  %s1319_s14 = scalar_lea.sflag [#allocation18], %s2751_s10  ;;  %s2930_s4 = int_to_ptr.vmem [resolvable:$true] %s1384_s4 }
  0xdc   : > { %653 = vadd.xlane.f32.xlu1 %v652_v7  ;;  %v2809_v15 = vld [vmem:[%s556_s29 + $0x18] sm:$0xff]  ;;  %v750_v16 = vadd.f32 %v2805_v13, %v2803_v12  ;;  %v797_v18 = vld [vmem:[#allocation8 + $0x8] sm:$0xff]  ;;  %v796_v20 = vld [vmem:[#allocation8] sm:$0xff]  ;;  %s2211_s16 = scalar_lea.vmem %s2930_s4, 512  ;;  %s2391_s26 = smov [#allocation17]  }
  0xdd   : > { %v753_v17 = vadd.f32 %v2809_v15, %v2807_v14  ;;  %v799_v19 = vld [vmem:[#allocation8 + $0x18] sm:$0xff]  ;;  %v798_v22 = vld [vmem:[#allocation8 + $0x10] sm:$0xff]  ;;  %v801_v23 = vld [vmem:[#allocation8 + $0x28] sm:$0xff]  ;;  %p2212_p7 = scmp.ne.s32.totalorder %s2930_s4, %s2211_s16  ;;  %s2215_s3 = sshll.u32 %s2391_s26, 4  ;;  %s2216_s3 = int_to_ptr.vmem [resolvable:$false] %s2215_s3 }
  0xde   : > { %v1683_v21 = vpack.c.bf16 %v799_v19, %v797_v18  ;;  %v803_v24 = vld [vmem:[#allocation8 + $0x38] sm:$0xff]  ;;  %v1685_v25 = vpack.c.bf16 %v798_v22, %v796_v20  ;;  %v954_v27 = vld [vmem:[#allocation10 + $0x8] sm:$0xff]  ;;  %v800_v29 = vld [vmem:[#allocation8 + $0x20] sm:$0xff]  ;;  %s2217_s23 = scalar_lea.vmem %s2216_s3, 1024  ;;  %p2218_p9 = scmp.lt.s32.totalorder %s2930_s4, %s2216_s3 }
  0xdf   : > { %701 = vadd.xlane.f32.xlu0 %v700_v10  ;;  %v1687_v26 = vpack.c.bf16 %v803_v24, %v801_v23  ;;  %v956_v28 = vld [vmem:[#allocation10 + $0x18] sm:$0xff]  ;;  %v802_v31 = vld [vmem:[#allocation8 + $0x30] sm:$0xff]  ;;  %v953_v32 = vld [vmem:[#allocation10] sm:$0xff]  ;;  %p3201_p12 = scmp.ne.s32.totalorder %s3199_s19, 0  ;;  %p2219_p10 = scmp.lt.s32.totalorder %s2217_s23, %s2211_s16 }
  0xe0   : > { %704 = vadd.xlane.f32.xlu1 %v703_v11  ;;  %1684 = vmatprep.subr.bf16.mxu0 %v1683_v21  ;;  %v1747_v30 = vpack.c.bf16 %v956_v28, %v954_v27  ;;  %v955_v33 = vld [vmem:[#allocation10 + $0x10] sm:$0xff]  ;;  %v1689_v34 = vpack.c.bf16 %v802_v31, %v800_v29  ;;  %v805_v36 = vld [vmem:[#allocation8 + $0x48] sm:$0xff]  ;;  %v807_v37 = vld [vmem:[#allocation8 + $0x58] sm:$0xff]  ;;  %s2927_s22 = scalar_lea.hbm %s3200_s28, %s2921_s5 }
  0xe1   : > { %1686 = vmatpush1.bf16.msra.mxu0 %v1685_v25  ;;  %v1749_v35 = vpack.c.bf16 %v955_v33, %v953_v32  ;;  %v958_v38 = vld [vmem:[#allocation10 + $0x28] sm:$0xff]  ;;  %v1691_v39 = vpack.c.bf16 %v807_v37, %v805_v36  ;;  %v960_v40 = vld [vmem:[#allocation10 + $0x38] sm:$0xff]  ;;  %v804_v41 = vld [vmem:[#allocation8 + $0x40] sm:$0xff]  ;;  %p2213_p2 = pnand %p2212_p7, %p3201_p12  ;;  %p2220_p4 = por %p2219_p10, %p2218_p9 }
  0xe2   : > { %1688 = vmatprep.subr.bf16.mxu0 %v1687_v26  ;;  %1748 = vmatprep.subr.bf16.mxu1 %v1747_v30  ;;  %v806_v42 = vld [vmem:[#allocation8 + $0x50] sm:$0xff]  ;;  %v1751_v43 = vpack.c.bf16 %v960_v40, %v958_v38  ;;  %v957_v44 = vld [vmem:[#allocation10 + $0x20] sm:$0xff]  ;;  %v809_v46 = vld [vmem:[#allocation8 + $0x68] sm:$0xff] }
  0xe3   : > { %751 = vadd.xlane.f32.xlu0 %v750_v16  ;;  %1750 = vmatpush1.bf16.msra.mxu1 %v1749_v35  ;;  %v959_v45 = vld [vmem:[#allocation10 + $0x30] sm:$0xff]  ;;  %v811_v48 = vld [vmem:[#allocation8 + $0x78] sm:$0xff]  ;;  %v962_v49 = vld [vmem:[#allocation10 + $0x48] sm:$0xff]  ;;  %v1693_v51 = vpack.c.bf16 %v806_v42, %v804_v41  ;;  %p2214_p6 = pneg %p2213_p2 }
  0xe4   : > { %754 = vadd.xlane.f32.xlu1 %v753_v17  ;;  %v1753_v47 = vpack.c.bf16 %v959_v45, %v957_v44  ;;  %v964_v50 = vld [vmem:[#allocation10 + $0x58] sm:$0xff]  ;;  %1752 = vmatprep.subr.bf16.mxu1 %v1751_v43  ;;  %v808_v53 = vld [vmem:[#allocation8 + $0x60] sm:$0xff]  ;;  %v1695_v55 = vpack.c.bf16 %v811_v48, %v809_v46  ;;  %v810_v56 = vld [vmem:[#allocation8 + $0x70] sm:$0xff] }
  0xe5   : > { %1690 = vmatpush1.bf16.msra.mxu0 %v1689_v34  ;;  %v1755_v52 = vpack.c.bf16 %v964_v50, %v962_v49  ;;  %v961_v54 = vld [vmem:[#allocation10 + $0x40] sm:$0xff]  ;;  %v963_v57 = vld [vmem:[#allocation10 + $0x50] sm:$0xff]  ;;  %v813_v58 = vld [vmem:[#allocation8 + $0x88] sm:$0xff]  ;;  %v1697_v10 = vpack.c.bf16 %v810_v56, %v808_v53  ;;  %p2221_p5 = pnand %p2220_p4, %p2214_p6 }
  0xe6   : > { %1692 = vmatprep.subr.bf16.mxu0 %v1691_v39  ;;  %v1757_v59 = vpack.c.bf16 %v963_v57, %v961_v54  ;;  %v815_v60 = vld [vmem:[#allocation8 + $0x98] sm:$0xff]  ;;  %v966_v61 = vld [vmem:[#allocation10 + $0x68] sm:$0xff]  ;;  %v965_v3 = vld [vmem:[#allocation10 + $0x60] sm:$0xff] }
  0xe7   : > { %1754 = vmatpush1.bf16.msra.mxu1 %v1753_v47  ;;  %v968_v62 = vld [vmem:[#allocation10 + $0x78] sm:$0xff]  ;;  %v967_v7 = vld [vmem:[#allocation10 + $0x70] sm:$0xff]  ;;  %v970_v11 = vld [vmem:[#allocation10 + $0x88] sm:$0xff]  ;;  %v1699_v16 = vpack.c.bf16 %v815_v60, %v813_v58 }
  0xe8   : > { %1756 = vmatprep.subr.bf16.mxu1 %v1755_v52  ;;  %v1759_v63 = vpack.c.bf16 %v968_v62, %v966_v61  ;;  %v812_v17 = vld [vmem:[#allocation8 + $0x80] sm:$0xff]  ;;  %v814_v18 = vld [vmem:[#allocation8 + $0x90] sm:$0xff]  ;;  %v972_v19 = vld [vmem:[#allocation10 + $0x98] sm:$0xff]  ;;  %v1761_v20 = vpack.c.bf16 %v967_v7, %v965_v3 }
  0xe9   : > { %1694 = vmatpush1.bf16.msra.mxu0 %v1693_v51  ;;  %v817_v21 = vld [vmem:[#allocation8 + $0xa8] sm:$0xff]  ;;  %v819_v22 = vld [vmem:[#allocation8 + $0xb8] sm:$0xff]  ;;  %v1763_v23 = vpack.c.bf16 %v972_v19, %v970_v11  ;;  %v969_v24 = vld [vmem:[#allocation10 + $0x80] sm:$0xff]  ;;  %v1701_v26 = vpack.c.bf16 %v814_v18, %v812_v17 }
  0xea   : > { %1696 = vmatprep.subr.bf16.mxu0 %v1695_v55  ;;  %v971_v25 = vld [vmem:[#allocation10 + $0x90] sm:$0xff]  ;;  %v974_v27 = vld [vmem:[#allocation10 + $0xa8] sm:$0xff]  ;;  %v976_v28 = vld [vmem:[#allocation10 + $0xb8] sm:$0xff]  ;;  %v1703_v29 = vpack.c.bf16 %v819_v22, %v817_v21 }
  0xeb   : > { %1758 = vmatpush1.bf16.msra.mxu1 %v1757_v59  ;;  %v816_v30 = vld [vmem:[#allocation8 + $0xa0] sm:$0xff]  ;;  %v818_v31 = vld [vmem:[#allocation8 + $0xb0] sm:$0xff]  ;;  %v1765_v32 = vpack.c.bf16 %v971_v25, %v969_v24  ;;  %v821_v33 = vld [vmem:[#allocation8 + $0xc8] sm:$0xff]  ;;  %v1767_v35 = vpack.c.bf16 %v976_v28, %v974_v27 }
  0xec   : > { %1760 = vmatprep.subr.bf16.mxu1 %v1759_v63  ;;  %v823_v34 = vld [vmem:[#allocation8 + $0xd8] sm:$0xff]  ;;  %v973_v36 = vld [vmem:[#allocation10 + $0xa0] sm:$0xff]  ;;  %v975_v37 = vld [vmem:[#allocation10 + $0xb0] sm:$0xff]  ;;  %v1705_v38 = vpack.c.bf16 %v818_v31, %v816_v30 }
  0xed   : > { %1698 = vmatpush1.bf16.msra.mxu0 %v1697_v10  ;;  %v978_v39 = vld [vmem:[#allocation10 + $0xc8] sm:$0xff]  ;;  %v980_v40 = vld [vmem:[#allocation10 + $0xd8] sm:$0xff]  ;;  %v1707_v41 = vpack.c.bf16 %v823_v34, %v821_v33  ;;  %v820_v42 = vld [vmem:[#allocation8 + $0xc0] sm:$0xff]  ;;  %v1769_v44 = vpack.c.bf16 %v975_v37, %v973_v36 }
  0xee   : > { %1700 = vmatprep.subr.bf16.mxu0 %v1699_v16  ;;  %v822_v43 = vld [vmem:[#allocation8 + $0xd0] sm:$0xff]  ;;  %v825_v45 = vld [vmem:[#allocation8 + $0xe8] sm:$0xff]  ;;  %v827_v46 = vld [vmem:[#allocation8 + $0xf8] sm:$0xff]  ;;  %v1771_v47 = vpack.c.bf16 %v980_v40, %v978_v39 }
  0xef   : > { %1762 = vmatpush1.bf16.msra.mxu1 %v1761_v20  ;;  %v977_v48 = vld [vmem:[#allocation10 + $0xc0] sm:$0xff]  ;;  %v979_v49 = vld [vmem:[#allocation10 + $0xd0] sm:$0xff]  ;;  %v1709_v50 = vpack.c.bf16 %v822_v43, %v820_v42  ;;  %v1711_v51 = vpack.c.bf16 %v827_v46, %v825_v45  ;;  %v829_v34 = vld [vmem:[#allocation8 + $0x108] sm:$0xff] }
  0xf0   : > { %1764 = vmatprep.subr.bf16.mxu1 %v1763_v23  ;;  %v824_v52 = vld [vmem:[#allocation8 + $0xe0] sm:$0xff]  ;;  %v826_v53 = vld [vmem:[#allocation8 + $0xf0] sm:$0xff]  ;;  %v1773_v54 = vpack.c.bf16 %v979_v49, %v977_v48  ;;  %v982_v36 = vld [vmem:[#allocation10 + $0xe8] sm:$0xff] }
  0xf1   : > { %1702 = vmatpush1.bf16.msra.mxu0 %v1701_v26  ;;  %v1713_v55 = vpack.c.bf16 %v826_v53, %v824_v52  ;;  %v828_v39 = vld [vmem:[#allocation8 + $0x100] sm:$0xff]  ;;  %v830_v40 = vld [vmem:[#allocation8 + $0x110] sm:$0xff]  ;;  %v833_v46 = vld [vmem:[#allocation8 + $0x128] sm:$0xff] }
  0xf2   : > { %1704 = vmatprep.subr.bf16.mxu0 %v1703_v29  ;;  %v1717_v42 = vpack.c.bf16 %v830_v40, %v828_v39  ;;  %v981_v43 = vld [vmem:[#allocation10 + $0xe0] sm:$0xff]  ;;  %v986_v48 = vld [vmem:[#allocation10 + $0x108] sm:$0xff]  ;;  %v834_v52 = vld [vmem:[#allocation8 + $0x130] sm:$0xff] }
  0xf3   : > { %1766 = vmatpush1.bf16.msra.mxu1 %v1765_v32  ;;  %v997_v39 = vld [vmem:[#allocation10 + $0x160] sm:$0xff]  ;;  %v999_v40 = vld [vmem:[#allocation10 + $0x170] sm:$0xff] }
  0xf4   : > { %1768 = vmatprep.subr.bf16.mxu1 %v1767_v35  ;;  %v831_v35 = vld [vmem:[#allocation8 + $0x118] sm:$0xff] }
  0xf5   : > { %1706 = vmatpush1.bf16.msra.mxu0 %v1705_v38  ;;  %v1715_v37 = vpack.c.bf16 %v831_v35, %v829_v34  ;;  %v984_v38 = vld [vmem:[#allocation10 + $0xf8] sm:$0xff]  ;;  %v844_v35 = vld [vmem:[#allocation8 + $0x180] sm:$0xff] }
  0xf6   : > { %1708 = vmatprep.subr.bf16.mxu0 %v1707_v41  ;;  %v1775_v41 = vpack.c.bf16 %v984_v38, %v982_v36  ;;  %v1000_v34 = vld [vmem:[#allocation10 + $0x178] sm:$0xff]  ;;  %v846_v36 = vld [vmem:[#allocation8 + $0x190] sm:$0xff] }
  0xf7   : > { %1770 = vmatpush1.bf16.msra.mxu1 %v1769_v44  ;;  %v983_v44 = vld [vmem:[#allocation10 + $0xf0] sm:$0xff]  ;;  %v1733_v38 = vpack.c.bf16 %v846_v36, %v844_v35 }
  0xf8   : > { %1772 = vmatprep.subr.bf16.mxu1 %v1771_v47  ;;  %v1777_v45 = vpack.c.bf16 %v983_v44, %v981_v43  ;;  %v835_v47 = vld [vmem:[#allocation8 + $0x138] sm:$0xff]  ;;  %v1002_v44 = vld [vmem:[#allocation10 + $0x188] sm:$0xff] }
  0xf9   : > { %1710 = vmatpush1.bf16.msra.mxu0 %v1709_v50  ;;  %v1719_v49 = vpack.c.bf16 %v835_v47, %v833_v46  ;;  %v988_v50 = vld [vmem:[#allocation10 + $0x118] sm:$0xff]  ;;  %v848_v47 = vld [vmem:[#allocation8 + $0x1a0] sm:$0xff] }
  0xfa   : > { %1712 = vmatprep.subr.bf16.mxu0 %v1711_v51  ;;  %v832_v51 = vld [vmem:[#allocation8 + $0x120] sm:$0xff]  ;;  %v1779_v53 = vpack.c.bf16 %v988_v50, %v986_v48  ;;  %v851_v43 = vld [vmem:[#allocation8 + $0x1b8] sm:$0xff]  ;;  %v850_v48 = vld [vmem:[#allocation8 + $0x1b0] sm:$0xff] }
  0xfb   : > { %1774 = vmatpush1.bf16.msra.mxu1 %v1773_v54  ;;  %v1721_v54 = vpack.c.bf16 %v834_v52, %v832_v51  ;;  %v1004_v46 = vld [vmem:[#allocation10 + $0x198] sm:$0xff]  ;;  %v1737_v50 = vpack.c.bf16 %v850_v48, %v848_v47  ;;  %v1001_v51 = vld [vmem:[#allocation10 + $0x180] sm:$0xff]  ;;  %v1003_v52 = vld [vmem:[#allocation10 + $0x190] sm:$0xff] }
  0xfc   : > { %1776 = vmatprep.subr.bf16.mxu1 %v1775_v41  ;;  %v1793_v41 = vpack.c.bf16 %v999_v40, %v997_v39 }
  0xfd   : > { %1714 = vmatpush1.bf16.msra.mxu0 %v1713_v55  ;;  %v985_v55 = vld [vmem:[#allocation10 + $0x100] sm:$0xff] }
  0xfe   : > { %1716 = vmatprep.subr.bf16.mxu0 %v1715_v37 }
  0xff   : > { %1778 = vmatpush1.bf16.msra.mxu1 %v1777_v45 }
 0x100   : > { %1780 = vmatprep.subr.bf16.mxu1 %v1779_v53  ;;  %v1797_v53 = vpack.c.bf16 %v1003_v52, %v1001_v51 }
 0x101   : > { %1718 = vmatpush1.bf16.msra.mxu0 %v1717_v42  ;;  %v849_v42 = vld [vmem:[#allocation8 + $0x1a8] sm:$0xff] }
 0x102   : > { %1720 = vmatprep.subr.bf16.mxu0 %v1719_v49  ;;  %v1735_v45 = vpack.c.bf16 %v851_v43, %v849_v42  ;;  %v1795_v49 = vpack.c.bf16 %v1004_v46, %v1002_v44 }
 0x105   : > { %1722 = vmatpush1.bf16.msra.mxu0 %v1721_v54  ;;  %v853_v54 = vld [vmem:[#allocation8 + $0x1c8] sm:$0xff] }
 0x168   : > { %v651_v56 = vpop.xlane.xlu0 %650 }
 0x169   : > { %v656_v57 = vmul.f32 0.00390625, %v651_v56  ;;  %v654_v58 = vpop.xlane.xlu1 %653  ;;  %v987_v56 = vld [vmem:[#allocation10 + $0x110] sm:$0xff] }
 0x16a   : > { %v657_v59 = vmul.f32 0.00390625, %v654_v58  ;;  %v837_v58 = vld [vmem:[#allocation8 + $0x148] sm:$0xff] }
 0x16b   : > { %v2816_v60 = vsub.f32 %v2779_v0, %v656_v57  ;;  %v2819_v61 = vsub.f32 %v2781_v1, %v656_v57  ;;  %v1781_v57 = vpack.c.bf16 %v987_v56, %v985_v55  ;;  %v855_v55 = vld [vmem:[#allocation8 + $0x1d8] sm:$0xff]  ;;  %v1006_v56 = vld [vmem:[#allocation10 + $0x1a8] sm:$0xff] }
 0x16c   : > { %v2822_v62 = vsub.f32 %v2783_v2, %v657_v59  ;;  %v2825_v63 = vsub.f32 %v2787_v4, %v657_v59  ;;  %v702_v3 = vpop.xlane.xlu0 %701  ;;  %v839_v59 = vld [vmem:[#allocation8 + $0x158] sm:$0xff] }
 0x16d   : > { %v706_v7 = vmul.f32 0.00390625, %v702_v3  ;;  %v705_v10 = vpop.xlane.xlu1 %704  ;;  %v662_v11 = vmul.f32 %v2816_v60, %v2816_v60  ;;  %v663_v16 = vmul.f32 %v2819_v61, %v2819_v61  ;;  %v990_v3 = vld [vmem:[#allocation10 + $0x128] sm:$0xff]  ;;  %1782 = vmatpush1.bf16.msra.mxu1 %v1781_v57  ;;  %v1739_v57 = vpack.c.bf16 %v855_v55, %v853_v54 }
 0x16e   : > { %v707_v0 = vmul.f32 0.00390625, %v705_v10  ;;  %v664_v1 = vmul.f32 %v2822_v62, %v2822_v62  ;;  %v665_v2 = vmul.f32 %v2825_v63, %v2825_v63  ;;  %v992_v10 = vld [vmem:[#allocation10 + $0x138] sm:$0xff] }
 0x16f   : > { %v2836_v17 = vsub.f32 %v2789_v5, %v706_v7  ;;  %v2839_v4 = vsub.f32 %v2791_v6, %v706_v7  ;;  %v666_v18 = vadd.f32 %v663_v16, %v662_v11  ;;  %v1723_v7 = vpack.c.bf16 %v839_v59, %v837_v58  ;;  %v836_v11 = vld [vmem:[#allocation8 + $0x140] sm:$0xff]  ;;  %v838_v16 = vld [vmem:[#allocation8 + $0x150] sm:$0xff]  ;;  %v1008_v58 = vld [vmem:[#allocation10 + $0x1b8] sm:$0xff] }
 0x170   : > { %v2842_v19 = vsub.f32 %v2795_v8, %v707_v0  ;;  %v2845_v20 = vsub.f32 %v2797_v9, %v707_v0  ;;  %v752_v21 = vpop.xlane.xlu0 %751  ;;  %v669_v24 = vadd.f32 %v665_v2, %v664_v1  ;;  %v1783_v0 = vpack.c.bf16 %v992_v10, %v990_v3  ;;  %v989_v2 = vld [vmem:[#allocation10 + $0x120] sm:$0xff]  ;;  %v854_v3 = vld [vmem:[#allocation8 + $0x1d0] sm:$0xff] }
 0x171   : > { %v756_v22 = vmul.f32 0.00390625, %v752_v21  ;;  %667 = vadd.xlane.f32.xlu0 %v666_v18  ;;  %v755_v23 = vpop.xlane.xlu1 %754  ;;  %v712_v25 = vmul.f32 %v2836_v17, %v2836_v17  ;;  %v713_v5 = vmul.f32 %v2839_v4, %v2839_v4  ;;  %v1725_v1 = vpack.c.bf16 %v838_v16, %v836_v11  ;;  %v991_v18 = vld [vmem:[#allocation10 + $0x130] sm:$0xff]  ;;  %1724 = vmatprep.subr.bf16.mxu0 %v1723_v7  ;;  %v852_v59 = vld [vmem:[#allocation8 + $0x1c0] sm:$0xff] }
 0x172   : > { %v757_v6 = vmul.f32 0.00390625, %v755_v23  ;;  %v714_v26 = vmul.f32 %v2842_v19, %v2842_v19  ;;  %v715_v8 = vmul.f32 %v2845_v20, %v2845_v20  ;;  %v1785_v21 = vpack.c.bf16 %v991_v18, %v989_v2  ;;  %1784 = vmatprep.subr.bf16.mxu1 %v1783_v0  ;;  %v843_v23 = vld [vmem:[#allocation8 + $0x178] sm:$0xff]  ;;  %v1005_v11 = vld [vmem:[#allocation10 + $0x1a0] sm:$0xff]  ;;  %v1007_v16 = vld [vmem:[#allocation10 + $0x1b0] sm:$0xff] }
 0x173   : > { %v2856_v9 = vsub.f32 %v2803_v12, %v756_v22  ;;  %v2859_v27 = vsub.f32 %v2805_v13, %v756_v22  ;;  %v716_v28 = vadd.f32 %v713_v5, %v712_v25  ;;  %1726 = vmatpush1.bf16.msra.mxu0 %v1725_v1  ;;  %v841_v22 = vld [vmem:[#allocation8 + $0x168] sm:$0xff]  ;;  %v996_v5 = vld [vmem:[#allocation10 + $0x158] sm:$0xff]  ;;  %v1799_v7 = vpack.c.bf16 %v1008_v58, %v1006_v56 }
 0x174   : > { %v2862_v29 = vsub.f32 %v2807_v14, %v757_v6  ;;  %v2865_v30 = vsub.f32 %v2809_v15, %v757_v6  ;;  %v719_v31 = vadd.f32 %v715_v8, %v714_v26  ;;  %1786 = vmatpush1.bf16.msra.mxu1 %v1785_v21  ;;  %v1727_v25 = vpack.c.bf16 %v843_v23, %v841_v22  ;;  %v840_v6 = vld [vmem:[#allocation8 + $0x160] sm:$0xff]  ;;  %v842_v26 = vld [vmem:[#allocation8 + $0x170] sm:$0xff]  ;;  %v857_v1 = vld [vmem:[#allocation8 + $0x1e8] sm:$0xff] }
 0x175   : > { %670 = vadd.xlane.f32.xlu0 %v669_v24  ;;  %717 = vadd.xlane.f32.xlu1 %v716_v28  ;;  %v762_v32 = vmul.f32 %v2856_v9, %v2856_v9  ;;  %v763_v12 = vmul.f32 %v2859_v27, %v2859_v27  ;;  %v994_v24 = vld [vmem:[#allocation10 + $0x148] sm:$0xff]  ;;  %v1729_v28 = vpack.c.bf16 %v842_v26, %v840_v6  ;;  %v859_v2 = vld [vmem:[#allocation8 + $0x1f8] sm:$0xff]  ;;  %v856_v23 = vld [vmem:[#allocation8 + $0x1e0] sm:$0xff] }
 0x176   : > { %v764_v13 = vmul.f32 %v2862_v29, %v2862_v29  ;;  %v765_v33 = vmul.f32 %v2865_v30, %v2865_v30  ;;  %v1787_v8 = vpack.c.bf16 %v996_v5, %v994_v24  ;;  %1728 = vmatprep.subr.bf16.mxu0 %v1727_v25  ;;  %v1741_v10 = vpack.c.bf16 %v854_v3, %v852_v59  ;;  %v1010_v18 = vld [vmem:[#allocation10 + $0x1c8] sm:$0xff]  ;;  %v1012_v22 = vld [vmem:[#allocation10 + $0x1d8] sm:$0xff]  ;;  %v858_v24 = vld [vmem:[#allocation8 + $0x1f0] sm:$0xff] }
 0x177   : > { %v766_v14 = vadd.f32 %v763_v12, %v762_v32  ;;  %v995_v32 = vld [vmem:[#allocation10 + $0x150] sm:$0xff]  ;;  %1730 = vmatpush1.bf16.msra.mxu0 %v1729_v28  ;;  %v1801_v0 = vpack.c.bf16 %v1007_v16, %v1005_v11  ;;  %v1743_v21 = vpack.c.bf16 %v859_v2, %v857_v1  ;;  %v1803_v25 = vpack.c.bf16 %v1012_v22, %v1010_v18  ;;  %v1009_v6 = vld [vmem:[#allocation10 + $0x1c0] sm:$0xff]  ;;  %v1014_v28 = vld [vmem:[#allocation10 + $0x1e8] sm:$0xff] }
 0x178   : > { %v769_v15 = vadd.f32 %v765_v33, %v764_v13  ;;  %1788 = vmatprep.subr.bf16.mxu1 %v1787_v8  ;;  %v845_v13 = vld [vmem:[#allocation8 + $0x188] sm:$0xff]  ;;  %v847_v33 = vld [vmem:[#allocation8 + $0x198] sm:$0xff]  ;;  %v1745_v5 = vpack.c.bf16 %v858_v24, %v856_v23  ;;  %v1011_v26 = vld [vmem:[#allocation10 + $0x1d0] sm:$0xff]  ;;  %v862_v24 = vlaneseq }
 0x179   : > { %720 = vadd.xlane.f32.xlu1 %v719_v31  ;;  %767 = vadd.xlane.f32.xlu0 %v766_v14  ;;  %v993_v31 = vld [vmem:[#allocation10 + $0x140] sm:$0xff]  ;;  %v998_v14 = vld [vmem:[#allocation10 + $0x168] sm:$0xff]  ;;  %v1805_v8 = vpack.c.bf16 %v1011_v26, %v1009_v6 }
 0x17a   : > { %v1789_v12 = vpack.c.bf16 %v995_v32, %v993_v31  ;;  %v1791_v37 = vpack.c.bf16 %v1000_v34, %v998_v14  ;;  %v1016_v31 = vld [vmem:[#allocation10 + $0x1f8] sm:$0xff]  ;;  %v1111_v32 = vld [vmem:[#allocation11 + $0x8] sm:$0xff]  ;;  %v1015_v14 = vld [vmem:[#allocation10 + $0x1f0] sm:$0xff] }
 0x17c   : > { %1790 = vmatpush1.bf16.msra.mxu1 %v1789_v12  ;;  %v1807_v12 = vpack.c.bf16 %v1016_v31, %v1014_v28 }
 0x17d   : > { %770 = vadd.xlane.f32.xlu1 %v769_v15  ;;  %v1731_v15 = vpack.c.bf16 %v847_v33, %v845_v13  ;;  %1792 = vmatprep.subr.bf16.mxu1 %v1791_v37  ;;  %v1113_v13 = vld [vmem:[#allocation11 + $0x18] sm:$0xff]  ;;  %v1013_v33 = vld [vmem:[#allocation10 + $0x1e0] sm:$0xff] }
 0x17e   : > { %v1809_v34 = vpack.c.bf16 %v1015_v14, %v1013_v33  ;;  %v1112_v33 = vld [vmem:[#allocation11 + $0x10] sm:$0xff] }
 0x17f   : > { %1732 = vmatprep.subr.bf16.mxu0 %v1731_v15  ;;  %v1811_v15 = vpack.c.bf16 %v1113_v13, %v1111_v32  ;;  %v1110_v13 = vld [vmem:[#allocation11] sm:$0xff] }
 0x180   : > { %1734 = vmatpush1.bf16.msra.mxu0 %v1733_v38  ;;  %1794 = vmatpush1.bf16.msra.mxu1 %v1793_v41 }
 0x181   : > { %1736 = vmatprep.subr.bf16.mxu0 %v1735_v45  ;;  %1796 = vmatprep.subr.bf16.mxu1 %v1795_v49 }
 0x184   : > { %1738 = vmatpush1.bf16.msra.mxu0 %v1737_v50  ;;  %1798 = vmatpush1.bf16.msra.mxu1 %v1797_v53 }
 0x185   : > { %1740 = vmatprep.subr.bf16.mxu0 %v1739_v57  ;;  %1800 = vmatprep.subr.bf16.mxu1 %v1799_v7 }
 0x188   : > { %1742 = vmatpush1.bf16.msra.mxu0 %v1741_v10  ;;  %1802 = vmatpush1.bf16.msra.mxu1 %v1801_v0 }
 0x189   : > { %1744 = vmatprep.subr.bf16.mxu0 %v1743_v21  ;;  %1804 = vmatprep.subr.bf16.mxu1 %v1803_v25 }
 0x18c   : > { %1746 = vmatpush1.bf16.msra.mxu0 %v1745_v5  ;;  %1806 = vmatpush1.bf16.msra.mxu1 %v1805_v8 }
 0x18d   : > { %1808 = vmatprep.subr.bf16.mxu1 %v1807_v12  ;;  %1812 = vmatprep.subr.bf16.mxu0 %v1811_v15 }
 0x190   : > { %1810 = vmatpush1.bf16.msra.mxu1 %v1809_v34  ;;  %v1117_v34 = vld [vmem:[#allocation11 + $0x38] sm:$0xff] }
 0x191   : > { %1875 = vmatprep.subr.bf16.mxu1 %v1811_v15  ;;  %v1115_v15 = vld [vmem:[#allocation11 + $0x28] sm:$0xff] }
 0x1fe   : > { %v668_v35 = vpop.xlane.xlu0 %667 }
 0x1ff   : > { %v672_v36 = vmul.f32 0.003921569, %v668_v35 }
 0x201   : > { %2013 = vrsqrt.f32 %v672_v36  ;;  %vm676_vm0 = vcmp.eq.f32.partialorder %v672_v36, inf  ;;  %v679_v49 = vand.u32 2147483648, %v672_v36  ;;  %vm678_vm1 = vcmp.eq.f32.partialorder %v672_v36, 0.0 }
 0x202   : > { %v718_v37 = vpop.xlane.xlu1 %717  ;;  %v671_v38 = vpop.xlane.xlu0 %670 }
 0x203   : > { %v722_v39 = vmul.f32 0.003921569, %v718_v37  ;;  %v673_v40 = vmul.f32 0.003921569, %v671_v38  ;;  %v863_v37 = vshrl.u32 %v862_v24, 7  ;;  %v1129_v24 = vld [vmem:[#allocation11 + $0x98] sm:$0xff] }
 0x205   : > { %2015 = vrsqrt.f32 %v722_v39  ;;  %vm683_vm2 = vcmp.eq.f32.partialorder %v673_v40, inf  ;;  %v686_v54 = vand.u32 2147483648, %v673_v40  ;;  %vm685_vm3 = vcmp.eq.f32.partialorder %v673_v40, 0.0 }
 0x206   : > { %2017 = vrsqrt.f32 %v673_v40  ;;  %v721_v41 = vpop.xlane.xlu1 %720  ;;  %v768_v42 = vpop.xlane.xlu0 %767  ;;  %vm726_vm4 = vcmp.eq.f32.partialorder %v722_v39, inf  ;;  %vm728_vm5 = vcmp.eq.f32.partialorder %v722_v39, 0.0  ;;  %v729_v58 = vand.u32 2147483648, %v722_v39 }
 0x207   : > { %v723_v43 = vmul.f32 0.003921569, %v721_v41  ;;  %v772_v44 = vmul.f32 0.003921569, %v768_v42  ;;  %v1815_v41 = vpack.c.bf16 %v1117_v34, %v1115_v15  ;;  %v1114_v42 = vld [vmem:[#allocation11 + $0x20] sm:$0xff]  ;;  %v1132_v34 = vld [vmem:[#allocation11 + $0xb0] sm:$0xff] }
 0x208   : > { %v1130_v15 = vld [vmem:[#allocation11 + $0xa0] sm:$0xff] }
 0x209   : > { %2019 = vrsqrt.f32 %v723_v43  ;;  %vm733_vm6 = vcmp.eq.f32.partialorder %v723_v43, inf  ;;  %v736_v59 = vand.u32 2147483648, %v723_v43  ;;  %vm776_vm7 = vcmp.eq.f32.partialorder %v772_v44, inf }
 0x20a   : > { %2021 = vrsqrt.f32 %v772_v44  ;;  %v771_v45 = vpop.xlane.xlu1 %770  ;;  %v779_v10 = vand.u32 2147483648, %v772_v44  ;;  %vm735_vm8 = vcmp.eq.f32.partialorder %v723_v43, 0.0  ;;  %vm778_vm9 = vcmp.eq.f32.partialorder %v772_v44, 0.0 }
 0x20b   : > { %v2014_v46 = vpop.eup %2013  ;;  %v773_v47 = vmul.f32 0.003921569, %v771_v45  ;;  %v1119_v45 = vld [vmem:[#allocation11 + $0x48] sm:$0xff] }
 0x20c   : > { %v675_v48 = vmul.f32 %v2014_v46, %v672_v36  ;;  %v1121_v46 = vld [vmem:[#allocation11 + $0x58] sm:$0xff] }
 0x20d   : > { %2023 = vrsqrt.f32 %v773_v47  ;;  %vm783_vm10 = vcmp.eq.f32.partialorder %v773_v47, inf  ;;  %v786_v6 = vand.u32 2147483648, %v773_v47  ;;  %vm785_vm11 = vcmp.eq.f32.partialorder %v773_v47, 0.0 }
 0x20e   : > { %v677_v50 = vsel %vm676_vm0, %v672_v36, %v675_v48  ;;  %v2883_v48 = vsub.s32 1, %v863_v37 }
 0x20f   : > { %v2016_v51 = vpop.eup %2015  ;;  %v680_v52 = vsel %vm678_vm1, %v679_v49, %v677_v50  ;;  %v1267_v50 = vld [vmem:[%s3197_s21] sm:$0x3] }
 0x210   : > { %v2018_v53 = vpop.eup %2017  ;;  %v688_v55 = vadd.f32 1e-06, %v680_v52  ;;  %v725_v56 = vmul.f32 %v2016_v51, %v722_v39  ;;  %v1118_v51 = vld [vmem:[#allocation11 + $0x40] sm:$0xff]  ;;  %v1120_v52 = vld [vmem:[#allocation11 + $0x50] sm:$0xff] }
 0x211   : > { %v682_v57 = vmul.f32 %v2018_v53, %v673_v40 }
 0x212   : > { %2025 = vrcp.f32 %v688_v55  ;;  %v727_v3 = vsel %vm726_vm4, %v722_v39, %v725_v56  ;;  %v1283_v56 = vld [vmem:[%s3198_s9] sm:$0x3] }
 0x213   : > { %v2020_v7 = vpop.eup %2019  ;;  %v684_v11 = vsel %vm683_vm2, %v673_v40, %v682_v57  ;;  %v730_v16 = vsel %vm728_vm5, %v729_v58, %v727_v3  ;;  %v1813_v40 = vpack.c.bf16 %v1112_v33, %v1110_v13  ;;  %v1276_v58 = vrot.slane %v1267_v50, %v2883_v48  ;;  %v1123_v3 = vld [vmem:[#allocation11 + $0x68] sm:$0xff] }
 0x214   : > { %v2022_v0 = vpop.eup %2021  ;;  %v732_v1 = vmul.f32 %v2020_v7, %v723_v43  ;;  %v687_v2 = vsel %vm685_vm3, %v686_v54, %v684_v11  ;;  %v738_v18 = vadd.f32 1e-06, %v730_v16 }
 0x215   : > { %v775_v21 = vmul.f32 %v2022_v0, %v772_v44  ;;  %v689_v22 = vadd.f32 1e-06, %v687_v2 }
 0x216   : > { %2027 = vrcp.f32 %v738_v18  ;;  %v734_v23 = vsel %vm733_vm6, %v723_v43, %v732_v1  ;;  %v1116_v43 = vld [vmem:[#allocation11 + $0x30] sm:$0xff]  ;;  %v1292_v1 = vrot.slane %v1283_v56, %v2883_v48  ;;  %v1122_v18 = vld [vmem:[#allocation11 + $0x60] sm:$0xff] }
 0x217   : > { %v2024_v25 = vpop.eup %2023  ;;  %v777_v5 = vsel %vm776_vm7, %v772_v44, %v775_v21  ;;  %2029 = vrcp.f32 %v689_v22  ;;  %v737_v26 = vsel %vm735_vm8, %v736_v59, %v734_v23  ;;  %v1817_v55 = vpack.c.bf16 %v1116_v43, %v1114_v42  ;;  %v1124_v21 = vld [vmem:[#allocation11 + $0x70] sm:$0xff]  ;;  %v1141_v42 = vld [vmem:[#allocation11 + $0xf8] sm:$0xff] }
 0x218   : > { %v782_v8 = vmul.f32 %v2024_v25, %v773_v47  ;;  %v739_v28 = vadd.f32 1e-06, %v737_v26  ;;  %v780_v31 = vsel %vm778_vm9, %v779_v10, %v777_v5  ;;  %v1821_v59 = vpack.c.bf16 %v1120_v52, %v1118_v51  ;;  %v1142_v51 = vld [vmem:[#allocation11 + $0x100] sm:$0xff]  ;;  %v1144_v52 = vld [vmem:[#allocation11 + $0x110] sm:$0xff] }
 0x219   : > { %v788_v32 = vadd.f32 1e-06, %v780_v31  ;;  %v1126_v31 = vld [vmem:[#allocation11 + $0x80] sm:$0xff] }
 0x21a   : > { %v784_v12 = vsel %vm783_vm10, %v773_v47, %v782_v8  ;;  %2031 = vrcp.f32 %v739_v28  ;;  %v2881_v47 = vsub.s32 0, %v863_v37  ;;  %v1833_v37 = vpack.c.bf16 %v1132_v34, %v1130_v15  ;;  %v1170_v15 = vld [vmem:[#allocation11 + $0x1e0] sm:$0xff]  ;;  %v1172_v34 = vld [vmem:[#allocation11 + $0x1f0] sm:$0xff] }
 0x21b   : > { %v787_v14 = vsel %vm785_vm11, %v786_v6, %v784_v12  ;;  %2033 = vrcp.f32 %v788_v32  ;;  %v1825_v6 = vpack.c.bf16 %v1124_v21, %v1122_v18  ;;  %v1128_v32 = vld [vmem:[#allocation11 + $0x90] sm:$0xff]  ;;  %v1159_v18 = vld [vmem:[#allocation11 + $0x188] sm:$0xff]  ;;  %v1161_v21 = vld [vmem:[#allocation11 + $0x198] sm:$0xff] }
 0x21c   : > { %v2026_v35 = vpop.eup %2025  ;;  %v789_v36 = vadd.f32 1e-06, %v787_v14  ;;  %v1288_v10 = vrot.slane %v1283_v56, %v2881_v47  ;;  %v1829_v33 = vpack.c.bf16 %v1128_v32, %v1126_v31 }
 0x21d   : > { %v693_v38 = vmul.f32 %v2026_v35, %v2819_v61  ;;  %v692_v39 = vmul.f32 %v2026_v35, %v2816_v60  ;;  %v1135_v35 = vld [vmem:[#allocation11 + $0xc8] sm:$0xff] }
 0x21e   : > { %2035 = vrcp.f32 %v789_v36  ;;  %v1137_v36 = vld [vmem:[#allocation11 + $0xd8] sm:$0xff] }
 0x21f   : > { %936 = vmatprep.mubr.f32.mxu0 %v693_v38  ;;  %v1835_v38 = vpack.c.bf16 %v1137_v36, %v1135_v35  ;;  %v1873_v35 = vpack.c.bf16 %v1172_v34, %v1170_v15 }
 0x220   : > { %v2028_v44 = vpop.eup %2027  ;;  %937 = vmatmul.mubr.f32.vlgmr.msra.gmra.mrb[0].mxu0 %v692_v39  ;;  %v1134_v39 = vld [vmem:[#allocation11 + $0xc0] sm:$0xff] }
 0x221   : > { %v2030_v49 = vpop.eup %2029  ;;  %1814 = vmatpush1.bf16.msra.mxu0 %v1813_v40  ;;  %v743_v61 = vmul.f32 %v2028_v44, %v2839_v4  ;;  %v742_v60 = vmul.f32 %v2028_v44, %v2836_v17  ;;  %v1819_v4 = vpack.c.bf16 %v1121_v46, %v1119_v45  ;;  %v1272_v17 = vrot.slane %v1267_v50, %v2881_v47  ;;  %v1138_v45 = vld [vmem:[#allocation11 + $0xe0] sm:$0xff]  ;;  %v1140_v46 = vld [vmem:[#allocation11 + $0xf0] sm:$0xff] }
 0x222   : > { %v695_v53 = vmul.f32 %v2030_v49, %v2825_v63  ;;  %1816 = vmatprep.subr.bf16.mxu0 %v1815_v41  ;;  %v694_v54 = vmul.f32 %v2030_v49, %v2822_v62  ;;  %v1125_v63 = vld [vmem:[#allocation11 + $0x78] sm:$0xff]  ;;  %v1143_v49 = vld [vmem:[#allocation11 + $0x108] sm:$0xff] }
 0x223   : > { %1093 = vmatprep.mubr.f32.mxu1 %v743_v61  ;;  %v1823_v2 = vpack.c.bf16 %v1125_v63, %v1123_v3  ;;  %v1145_v61 = vld [vmem:[#allocation11 + $0x118] sm:$0xff]  ;;  %v1150_v63 = vld [vmem:[#allocation11 + $0x140] sm:$0xff] }
 0x224   : > { %v2032_v57 = vpop.eup %2031  ;;  %942 = vmatprep.mubr.f32.mxu0 %v695_v53  ;;  %1094 = vmatmul.mubr.f32.vlgmr.msra.gmra.mrb[0].mxu1 %v742_v60  ;;  %v1841_v60 = vpack.c.bf16 %v1140_v46, %v1138_v45  ;;  %v1843_v50 = vpack.c.bf16 %v1145_v61, %v1143_v49  ;;  %v1147_v53 = vld [vmem:[#allocation11 + $0x128] sm:$0xff] }
 0x225   : > { %v2034_v7 = vpop.eup %2033  ;;  %943 = vmatmul.mubr.f32.gmra.mrb[2].mxu0 %v694_v54  ;;  %1891 = vmatpush1.bf16.msra.mxu1 %v1813_v40  ;;  %v745_v62 = vmul.f32 %v2032_v57, %v2845_v20  ;;  %v744_v11 = vmul.f32 %v2032_v57, %v2842_v19  ;;  %v1127_v19 = vld [vmem:[#allocation11 + $0x88] sm:$0xff]  ;;  %v1136_v40 = vld [vmem:[#allocation11 + $0xd0] sm:$0xff]  ;;  %v1149_v54 = vld [vmem:[#allocation11 + $0x138] sm:$0xff] }
 0x226   : > { %1818 = vmatpush1.bf16.msra.mxu0 %v1817_v55  ;;  %1876 = vmatprep.subr.bf16.mxu1 %v1815_v41  ;;  %v2901_v16 = vmul.f32 %v2034_v7, %v2856_v9  ;;  %v793_v0 = vmul.f32 %v2034_v7, %v2859_v27  ;;  %v1827_v28 = vpack.c.bf16 %v1129_v24, %v1127_v19  ;;  %v1139_v41 = vld [vmem:[#allocation11 + $0xe8] sm:$0xff]  ;;  %v1148_v57 = vld [vmem:[#allocation11 + $0x130] sm:$0xff] }
 0x227   : > { %1099 = vmatprep.mubr.f32.mxu1 %v745_v62  ;;  %1820 = vmatprep.subr.bf16.mxu0 %v1819_v4  ;;  %v1837_v43 = vpack.c.bf16 %v1136_v40, %v1134_v39  ;;  %v1839_v44 = vpack.c.bf16 %v1141_v42, %v1139_v41  ;;  %v1847_v56 = vpack.c.bf16 %v1149_v54, %v1147_v53  ;;  %v1152_v7 = vld [vmem:[#allocation11 + $0x150] sm:$0xff]  ;;  %v1155_v62 = vld [vmem:[#allocation11 + $0x168] sm:$0xff] }
 0x228   : > { %v2036_v22 = vpop.eup %2035  ;;  %1250 = vmatprep.mubr.f32.mxu0 %v793_v0  ;;  %v1279_v20 = vmul.f32 %v1272_v17, %v2901_v16  ;;  %v1280_v23 = vmul.f32 %v1276_v58, %v793_v0  ;;  %1100 = vmatmul.mubr.f32.gmra.mrb[2].mxu1 %v744_v11  ;;  %v1853_v11 = vpack.c.bf16 %v1152_v7, %v1150_v63  ;;  %v1160_v19 = vld [vmem:[#allocation11 + $0x190] sm:$0xff]  ;;  %v1163_v24 = vld [vmem:[#allocation11 + $0x1a8] sm:$0xff] }
 0x229   : > { %v2907_v9 = vmul.f32 %v2036_v22, %v2862_v29  ;;  %1892 = vmatpush1.bf16.msra.mxu1 %v1817_v55  ;;  %v795_v27 = vmul.f32 %v2036_v22, %v2865_v30  ;;  %v1131_v29 = vld [vmem:[#allocation11 + $0xa8] sm:$0xff]  ;;  %v1133_v30 = vld [vmem:[#allocation11 + $0xb8] sm:$0xff]  ;;  %v1845_v55 = vpack.c.bf16 %v1144_v52, %v1142_v51 }
 0x22a   : > { %v1295_v25 = vadd.f32 %v1288_v10, %v1279_v20  ;;  %v1296_v5 = vadd.f32 %v1292_v1, %v1280_v23  ;;  %1822 = vmatpush1.bf16.msra.mxu0 %v1821_v59  ;;  %1877 = vmatprep.subr.bf16.mxu1 %v1819_v4  ;;  %v1831_v14 = vpack.c.bf16 %v1133_v30, %v1131_v29  ;;  %v1146_v4 = vld [vmem:[#allocation11 + $0x120] sm:$0xff]  ;;  %v1168_v30 = vld [vmem:[#allocation11 + $0x1d0] sm:$0xff] }
 0x22b   : > { %v1281_v26 = vmul.f32 %v1272_v17, %v2907_v9  ;;  %1824 = vmatprep.subr.bf16.mxu0 %v1823_v2  ;;  %1256 = vmatprep.mubr.f32.mxu1 %v795_v27  ;;  %v1282_v8 = vmul.f32 %v1276_v58, %v795_v27  ;;  %v1151_v17 = vld [vmem:[#allocation11 + $0x148] sm:$0xff]  ;;  %v1153_v58 = vld [vmem:[#allocation11 + $0x158] sm:$0xff]  ;;  %v1859_v20 = vpack.c.bf16 %v1161_v21, %v1159_v18  ;;  %v1158_v23 = vld [vmem:[#allocation11 + $0x180] sm:$0xff] }
 0x22c   : > { %1299 = vst [vmem:[%s2912_s11] sm:$0xff] %v1295_v25  ;;  %1300 = vst [vmem:[%s2912_s11 + $0x8] sm:$0xff] %v1296_v5  ;;  %v1851_v3 = vpack.c.bf16 %v1153_v58, %v1151_v17  ;;  %v1165_v27 = vld [vmem:[#allocation11 + $0x1b8] sm:$0xff]  ;;  %v1861_v25 = vpack.c.bf16 %v1160_v19, %v1158_v23  ;;  %v1166_v29 = vld [vmem:[#allocation11 + $0x1c0] sm:$0xff] }
 0x22d   : > { %v1297_v12 = vadd.f32 %v1288_v10, %v1281_v26  ;;  %v1298_v13 = vadd.f32 %v1292_v1, %v1282_v8  ;;  %1893 = vmatpush1.bf16.msra.mxu1 %v1821_v59  ;;  %v1849_v59 = vpack.c.bf16 %v1148_v57, %v1146_v4  ;;  %v1157_v10 = vld [vmem:[#allocation11 + $0x178] sm:$0xff]  ;;  %v1154_v1 = vld [vmem:[#allocation11 + $0x160] sm:$0xff]  ;;  %v1863_v5 = vpack.c.bf16 %v1165_v27, %v1163_v24  ;;  %v1164_v26 = vld [vmem:[#allocation11 + $0x1b0] sm:$0xff] }
 0x22e   : > { %1826 = vmatpush1.bf16.msra.mxu0 %v1825_v6  ;;  %1878 = vmatprep.subr.bf16.mxu1 %v1823_v2  ;;  %v1855_v0 = vpack.c.bf16 %v1157_v10, %v1155_v62  ;;  %v1156_v2 = vld [vmem:[#allocation11 + $0x170] sm:$0xff]  ;;  %v1167_v8 = vld [vmem:[#allocation11 + $0x1c8] sm:$0xff] }
 0x22f   : > { %1301 = vst [vmem:[%s2912_s11 + $0x10] sm:$0xff] %v1297_v12  ;;  %1302 = vst [vmem:[%s2912_s11 + $0x18] sm:$0xff] %v1298_v13  ;;  %1828 = vmatprep.subr.bf16.mxu0 %v1827_v28  ;;  %v1857_v22 = vpack.c.bf16 %v1156_v2, %v1154_v1  ;;  %v1171_v12 = vld [vmem:[#allocation11 + $0x1e8] sm:$0xff]  ;;  %v1173_v13 = vld [vmem:[#allocation11 + $0x1f8] sm:$0xff] }
 0x231   : > { %1894 = vmatpush1.bf16.msra.mxu1 %v1825_v6  ;;  %v1162_v6 = vld [vmem:[#allocation11 + $0x1a0] sm:$0xff] }
 0x232   : > { %1830 = vmatpush1.bf16.msra.mxu0 %v1829_v33  ;;  %1879 = vmatprep.subr.bf16.mxu1 %v1827_v28  ;;  %v1169_v28 = vld [vmem:[#allocation11 + $0x1d8] sm:$0xff]  ;;  %v1865_v31 = vpack.c.bf16 %v1164_v26, %v1162_v6 }
 0x233   : > { %1832 = vmatprep.subr.bf16.mxu0 %v1831_v14  ;;  %v1867_v32 = vpack.c.bf16 %v1169_v28, %v1167_v8 }
 0x235   : > { %1895 = vmatpush1.bf16.msra.mxu1 %v1829_v33  ;;  %v1869_v33 = vpack.c.bf16 %v1168_v30, %v1166_v29 }
 0x236   : > { %1834 = vmatpush1.bf16.msra.mxu0 %v1833_v37  ;;  %1880 = vmatprep.subr.bf16.mxu1 %v1831_v14  ;;  %v1871_v14 = vpack.c.bf16 %v1173_v13, %v1171_v12 }
 0x237   : > { %1836 = vmatprep.subr.bf16.mxu0 %v1835_v38 }
 0x239   : > { %1896 = vmatpush1.bf16.msra.mxu1 %v1833_v37 }
 0x23a   : > { %1838 = vmatpush1.bf16.msra.mxu0 %v1837_v43  ;;  %1881 = vmatprep.subr.bf16.mxu1 %v1835_v38 }
 0x23b   : > { %1840 = vmatprep.subr.bf16.mxu0 %v1839_v44 }
 0x23d   : > { %1897 = vmatpush1.bf16.msra.mxu1 %v1837_v43 }
 0x23e   : > { %1842 = vmatpush1.bf16.msra.mxu0 %v1841_v60  ;;  %1882 = vmatprep.subr.bf16.mxu1 %v1839_v44 }
 0x23f   : > { %1844 = vmatprep.subr.bf16.mxu0 %v1843_v50 }
 0x241   : > { %1898 = vmatpush1.bf16.msra.mxu1 %v1841_v60 }
 0x242   : > { %1846 = vmatpush1.bf16.msra.mxu0 %v1845_v55  ;;  %1883 = vmatprep.subr.bf16.mxu1 %v1843_v50 }
 0x243   : > { %1848 = vmatprep.subr.bf16.mxu0 %v1847_v56 }
 0x245   : > { %1899 = vmatpush1.bf16.msra.mxu1 %v1845_v55 }
 0x246   : > { %1850 = vmatpush1.bf16.msra.mxu0 %v1849_v59  ;;  %1884 = vmatprep.subr.bf16.mxu1 %v1847_v56 }
 0x247   : > { %1852 = vmatprep.subr.bf16.mxu0 %v1851_v3 }
 0x249   : > { %1900 = vmatpush1.bf16.msra.mxu1 %v1849_v59 }
 0x24a   : > { %1854 = vmatpush1.bf16.msra.mxu0 %v1853_v11  ;;  %1885 = vmatprep.subr.bf16.mxu1 %v1851_v3 }
 0x24b   : > { %1856 = vmatprep.subr.bf16.mxu0 %v1855_v0 }
 0x24d   : > { %1901 = vmatpush1.bf16.msra.mxu1 %v1853_v11 }
 0x24e   : > { %1858 = vmatpush1.bf16.msra.mxu0 %v1857_v22  ;;  %1886 = vmatprep.subr.bf16.mxu1 %v1855_v0 }
 0x24f   : > { %1860 = vmatprep.subr.bf16.mxu0 %v1859_v20 }
 0x251   : > { %1902 = vmatpush1.bf16.msra.mxu1 %v1857_v22 }
 0x252   : > { %1862 = vmatpush1.bf16.msra.mxu0 %v1861_v25  ;;  %1887 = vmatprep.subr.bf16.mxu1 %v1859_v20 }
 0x253   : > { %1864 = vmatprep.subr.bf16.mxu0 %v1863_v5 }
 0x255   : > { %1903 = vmatpush1.bf16.msra.mxu1 %v1861_v25 }
 0x256   : > { %1866 = vmatpush1.bf16.msra.mxu0 %v1865_v31  ;;  %1888 = vmatprep.subr.bf16.mxu1 %v1863_v5 }
 0x257   : > { %1868 = vmatprep.subr.bf16.mxu0 %v1867_v32 }
 0x259   : > { %1904 = vmatpush1.bf16.msra.mxu1 %v1865_v31 }
 0x25a   : > { %1870 = vmatpush1.bf16.msra.mxu0 %v1869_v33  ;;  %1889 = vmatprep.subr.bf16.mxu1 %v1867_v32 }
 0x25b   : > { %1872 = vmatprep.subr.bf16.mxu0 %v1871_v14 }
 0x25d   : > { %1905 = vmatpush1.bf16.msra.mxu1 %v1869_v33 }
 0x25e   : > { %1874 = vmatpush1.bf16.msra.mxu0 %v1873_v35  ;;  %1890 = vmatprep.subr.bf16.mxu1 %v1871_v14 }
 0x261   : > { %1251 = vmatmul.mubr.f32.vlgmr.msra.gmra.mrb[4].mxu0 %v2901_v16  ;;  %1906 = vmatpush1.bf16.msra.mxu1 %v1873_v35 }
 0x264   : > { %1257 = vmatmul.mubr.f32.vlgmr.msra.gmra.mrb[4].mxu1 %v2907_v9 }
 0x265   : > { %2224 = shalt.err (!%p2221_p5)
}
 0x266   : > { %s2225_s12 = scalar_lea.hbm %s2927_s22, 512  ;;  %s2229_s20 = scalar_lea.hbm %s3200_s28, 1024 }
 0x267   : > { %p2226_p8 = scmp.ne.s32.totalorder %s2927_s22, %s2225_s12  ;;  %p2230_p11 = scmp.lt.u32.totalorder %s2927_s22, %s3200_s28 }
 0x268   : > { %p2231_p13 = scmp.lt.u32.totalorder %s2229_s20, %s2225_s12  ;;  %p2233_p7 = scmp.lt.u32.totalorder %s2225_s12, %s2927_s22 }
 0x269   : > { %p2227_p1 = pnand %p2226_p8, %p3201_p12 }
 0x26a   : > { %p2232_p3 = por %p2231_p13, %p2230_p11 }
 0x26b   : > { %p2228_p0 = pneg %p2227_p1 }
 0x26c   : > { %p2234_p2 = por %p2233_p7, %p2232_p3 }
 0x26e   : > { %p2235_p6 = pnand %p2234_p2, %p2228_p0 }
 0x270   : > { %2238 = shalt.err (!%p2235_p6)
}
 0x271   : > { %s2392_s13 = smov 256   ;;  %s2393_s9 = smov 16  }
 0x272   : > { %1928 = dma.vmem_to_hbm [thread:$0]  (%p3201_p12), %s2930_s4, 512, %s2927_s22, %s1319_s14, %s2392_s13, %s2392_s13, %s2393_s9  }
 0x273   : > { %s3202_s8 = sld [smem:[#allocation36_spill]]  ;;  %s3203_s3 = sld [smem:[#allocation37_spill]] }
 0x274   : > { %s616_s22 = scalar_lea.vmem [#allocation13], %s2754_s18  ;;  %s2971_s14 = scalar_lea.vmem [#allocation14], %s2754_s18 }
 0x275   : > { %s1333_s4 = sshll.u32 %s616_s22, 4  ;;  %s1350_s23 = sshll.u32 %s2971_s14, 4  ;;  %s2974_s4 = int_to_ptr.vmem [resolvable:$true] %s1333_s4  ;;  %s2983_s23 = int_to_ptr.vmem [resolvable:$true] %s1350_s23 }
 0x276   : > { %s3204_s24 = sld [smem:[#allocation39_spill]]  ;;  %s3205_s11 = sld [smem:[#allocation40_spill]] }
 0x277   : > { %s2239_s16 = scalar_lea.vmem %s2974_s4, 512  ;;  %s2394_s26 = smov [#allocation13]  }
 0x278   : > { %p2240_p9 = scmp.ne.s32.totalorder %s2974_s4, %s2239_s16 }
 0x279   : > { %v860_v16 = vld [vmem:[%s3202_s8] sm:$0x3]  ;;  %s1304_s8 = scalar_lea.sflag [#allocation4], %s2751_s10 }
 0x27a   : > { %v865_v9 = vrot.slane %v860_v16, %v2881_v47  ;;  %v869_v36 = vrot.slane %v860_v16, %v2883_v48  ;;  %v1017_v37 = vld [vmem:[%s3203_s3] sm:$0x3]  ;;  %p2241_p10 = pnand %p2240_p9, %p3201_p12  ;;  %s2243_s3 = sshll.u32 %s2394_s26, 4  ;;  %s2244_s3 = int_to_ptr.vmem [resolvable:$false] %s2243_s3 }
 0x27b   : > { %v1022_v41 = vrot.slane %v1017_v37, %v2881_v47  ;;  %v1026_v43 = vrot.slane %v1017_v37, %v2883_v48  ;;  %s2245_s12 = scalar_lea.vmem %s2244_s3, 1024  ;;  %p2246_p5 = scmp.lt.s32.totalorder %s2974_s4, %s2244_s3 }
 0x27c   : > { %s2981_s20 = scalar_lea.hbm %s3204_s24, %s2921_s5  ;;  %s2990_s1 = scalar_lea.hbm %s3205_s11, %s2921_s5 }
 0x27d   : > { %p2242_p4 = pneg %p2241_p10  ;;  %p2247_p8 = scmp.lt.s32.totalorder %s2245_s12, %s2239_s16 }
 0x27f   : > { %p2248_p1 = por %p2247_p8, %p2246_p5 }
 0x281   : > { %p2249_p0 = pnand %p2248_p1, %p2242_p4 }
 0x2f3   : > { %v938_v38 = vpop.f32.mrb[0].mxu0 }
 0x2f4   : > { %v939_v39 = vadd.f32 %v938_v38, %v865_v9  ;;  %v940_v40 = vpop.f32.mrb[1].mxu0 }
 0x2f5   : > { %v941_v42 = vadd.f32 %v940_v40, %v869_v36 }
 0x2f6   : > { %949 = vst [vmem:[%s616_s22] sm:$0xff] %v939_v39 }
 0x2f7   : > { %950 = vst [vmem:[%s616_s22 + $0x8] sm:$0xff] %v941_v42  ;;  %v1095_v44 = vpop.f32.mrb[0].mxu1 }
 0x2f8   : > { %v944_v45 = vpop.f32.mrb[2].mxu0  ;;  %v1096_v46 = vadd.f32 %v1095_v44, %v1022_v41  ;;  %v1097_v49 = vpop.f32.mrb[1].mxu1 }
 0x2f9   : > { %v945_v61 = vadd.f32 %v944_v45, %v865_v9  ;;  %v946_v60 = vpop.f32.mrb[3].mxu0  ;;  %v1098_v50 = vadd.f32 %v1097_v49, %v1026_v43 }
 0x2fa   : > { %1106 = vst [vmem:[%s2971_s14] sm:$0xff] %v1096_v46  ;;  %v947_v51 = vadd.f32 %v946_v60, %v869_v36 }
 0x2fb   : > { %951 = vst [vmem:[%s616_s22 + $0x10] sm:$0xff] %v945_v61  ;;  %1107 = vst [vmem:[%s2971_s14 + $0x8] sm:$0xff] %v1098_v50  ;;  %v1101_v52 = vpop.f32.mrb[2].mxu1 }
 0x2fc   : > { %952 = vst [vmem:[%s616_s22 + $0x18] sm:$0xff] %v947_v51  ;;  %v1102_v53 = vadd.f32 %v1101_v52, %v1022_v41  ;;  %v1103_v54 = vpop.f32.mrb[3].mxu1 }
 0x2fd   : > { %v1104_v55 = vadd.f32 %v1103_v54, %v1026_v43 }
 0x2fe   : > { %2252 = shalt.err (!%p2249_p0)
}
 0x2ff   : > { %s2253_s22 = scalar_lea.hbm %s2981_s20, 512  ;;  %s2257_s25 = scalar_lea.hbm %s3204_s24, 1024 }
 0x300   : > { %p2254_p11 = scmp.ne.s32.totalorder %s2981_s20, %s2253_s22  ;;  %p2258_p7 = scmp.lt.u32.totalorder %s2981_s20, %s3204_s24 }
 0x301   : > { %p2259_p2 = scmp.lt.u32.totalorder %s2257_s25, %s2253_s22  ;;  %p2261_p9 = scmp.lt.u32.totalorder %s2253_s22, %s2981_s20 }
 0x302   : > { %p2255_p13 = pnand %p2254_p11, %p3201_p12 }
 0x303   : > { %p2260_p6 = por %p2259_p2, %p2258_p7 }
 0x304   : > { %p2256_p3 = pneg %p2255_p13 }
 0x305   : > { %p2262_p10 = por %p2261_p9, %p2260_p6 }
 0x307   : > { %p2263_p4 = pnand %p2262_p10, %p2256_p3 }
 0x309   : > { %2266 = shalt.err (!%p2263_p4)
}
 0x30a   : > { %1925 = dma.vmem_to_hbm [thread:$0]  (%p3201_p12), %s2974_s4, 512, %s2981_s20, %s1304_s8, %s2392_s13, %s2392_s13, %s2393_s9  }
 0x30b   : > { %1108 = vst [vmem:[%s2971_s14 + $0x10] sm:$0xff] %v1102_v53  ;;  %1109 = vst [vmem:[%s2971_s14 + $0x18] sm:$0xff] %v1104_v55  ;;  %s3023_s16 = scalar_lea.sflag [#allocation15], %s543_s27  ;;  %s2267_s12 = scalar_lea.vmem %s2983_s23, 512 }
 0x30c   : > { %p2268_p5 = scmp.ne.s32.totalorder %s2983_s23, %s2267_s12  ;;  %s2395_s10 = smov [#allocation14]  }
 0x30d   : > { %s2271_s22 = sshll.u32 %s2395_s10, 4  ;;  %s2272_s22 = int_to_ptr.vmem [resolvable:$false] %s2271_s22 }
 0x30e   : > { %p2269_p8 = pnand %p2268_p5, %p3201_p12  ;;  %s2273_s29 = scalar_lea.vmem %s2272_s22, 1024 }
 0x30f   : > { %p2274_p0 = scmp.lt.s32.totalorder %s2983_s23, %s2272_s22  ;;  %p2275_p11 = scmp.lt.s32.totalorder %s2273_s29, %s2267_s12 }
 0x310   : > { %p2270_p1 = pneg %p2269_p8 }
 0x311   : > { %p2276_p13 = por %p2275_p11, %p2274_p0 }
 0x313   : > { %p2277_p3 = pnand %p2276_p13, %p2270_p1 }
 0x315   : > { %2280 = shalt.err (!%p2277_p3)
}
 0x316   : > { %s2281_s17 = scalar_lea.hbm %s2990_s1, 512  ;;  %s2285_s14 = scalar_lea.hbm %s3205_s11, 1024 }
 0x317   : > { %p2282_p7 = scmp.ne.s32.totalorder %s2990_s1, %s2281_s17  ;;  %p2286_p9 = scmp.lt.u32.totalorder %s2990_s1, %s3205_s11 }
 0x318   : > { %p2287_p10 = scmp.lt.u32.totalorder %s2285_s14, %s2281_s17  ;;  %p2289_p5 = scmp.lt.u32.totalorder %s2281_s17, %s2990_s1 }
 0x319   : > { %p2283_p2 = pnand %p2282_p7, %p3201_p12 }
 0x31a   : > { %p2288_p4 = por %p2287_p10, %p2286_p9 }
 0x31b   : > { %p2284_p6 = pneg %p2283_p2 }
 0x31c   : > { %p2290_p8 = por %p2289_p5, %p2288_p4 }
 0x31e   : > { %p2291_p1 = pnand %p2290_p8, %p2284_p6 }
 0x320   : > { %2294 = shalt.err (!%p2291_p1)
}
 0x321   : > { %1926 = dma.vmem_to_hbm [thread:$0]  (%p3201_p12), %s2983_s23, 512, %s2990_s1, %s3023_s16, %s2392_s13, %s2392_s13, %s2393_s9  }
 0x322   : > { %s3206_s26 = sld [smem:[#allocation38_spill]]  ;;  %s630_s3 = scalar_lea.vmem [#allocation16], %s2754_s18 }
 0x323   : > { %s1367_s12 = sshll.u32 %s630_s3, 4  ;;  %s3207_s10 = sld [smem:[#allocation41_spill]]  ;;  %s3056_s12 = int_to_ptr.vmem [resolvable:$true] %s1367_s12 }
 0x324   : > { %s2295_s18 = scalar_lea.vmem %s3056_s12, 512  ;;  %s2396_s29 = smov [#allocation16]  }
 0x325   : > { %p2296_p0 = scmp.ne.s32.totalorder %s3056_s12, %s2295_s18  ;;  %s2299_s17 = sshll.u32 %s2396_s29, 4  ;;  %s2300_s17 = int_to_ptr.vmem [resolvable:$false] %s2299_s17 }
 0x326   : > { %s2301_s27 = scalar_lea.vmem %s2300_s17, 1024  ;;  %p2302_p3 = scmp.lt.s32.totalorder %s3056_s12, %s2300_s17 }
 0x327   : > { %p2297_p11 = pnand %p2296_p0, %p3201_p12  ;;  %p2303_p7 = scmp.lt.s32.totalorder %s2301_s27, %s2295_s18 }
 0x328   : > { %v1174_v56 = vld [vmem:[%s3206_s26] sm:$0x3] }
 0x329   : > { %v1179_v4 = vrot.slane %v1174_v56, %v2881_v47  ;;  %v1183_v57 = vrot.slane %v1174_v56, %v2883_v48  ;;  %s3062_s22 = scalar_lea.hbm %s3207_s10, %s2921_s5  ;;  %p2298_p13 = pneg %p2297_p11 }
 0x32a   : > { %p2304_p2 = por %p2303_p7, %p2302_p3 }
 0x32c   : > { %p2305_p6 = pnand %p2304_p2, %p2298_p13 }
 0x334   : > { %v1252_v17 = vpop.f32.mrb[4].mxu0 }
 0x335   : > { %v1253_v58 = vadd.f32 %v1252_v17, %v1179_v4  ;;  %v1254_v59 = vpop.f32.mrb[5].mxu0 }
 0x336   : > { %v1255_v3 = vadd.f32 %v1254_v59, %v1183_v57 }
 0x337   : > { %1263 = vst [vmem:[%s630_s3] sm:$0xff] %v1253_v58  ;;  %v1258_v63 = vpop.f32.mrb[4].mxu1 }
 0x338   : > { %1264 = vst [vmem:[%s630_s3 + $0x8] sm:$0xff] %v1255_v3  ;;  %v1259_v7 = vadd.f32 %v1258_v63, %v1179_v4  ;;  %v1260_v62 = vpop.f32.mrb[5].mxu1 }
 0x339   : > { %v1261_v47 = vadd.f32 %v1260_v62, %v1183_v57 }
 0x33a   : > { %1265 = vst [vmem:[%s630_s3 + $0x10] sm:$0xff] %v1259_v7 }
 0x33b   : > { %1266 = vst [vmem:[%s630_s3 + $0x18] sm:$0xff] %v1261_v47 }
 0x33c   : > { %2308 = shalt.err (!%p2305_p6)
}
 0x33d   : > { %s2309_s5 = scalar_lea.hbm %s3062_s22, 512  ;;  %s2313_s20 = scalar_lea.hbm %s3207_s10, 1024 }
 0x33e   : > { %p2310_p9 = scmp.ne.s32.totalorder %s3062_s22, %s2309_s5  ;;  %p2314_p5 = scmp.lt.u32.totalorder %s3062_s22, %s3207_s10 }
 0x33f   : > { %p2315_p8 = scmp.lt.u32.totalorder %s2313_s20, %s2309_s5  ;;  %p2317_p0 = scmp.lt.u32.totalorder %s2309_s5, %s3062_s22 }
 0x340   : > { %p2311_p10 = pnand %p2310_p9, %p3201_p12 }
 0x341   : > { %p2316_p1 = por %p2315_p8, %p2314_p5 }
 0x342   : > { %p2312_p4 = pneg %p2311_p10 }
 0x343   : > { %p2318_p11 = por %p2317_p0, %p2316_p1 }
 0x345   : > { %p2319_p13 = pnand %p2318_p11, %p2312_p4 }
 0x347   : > { %2322 = shalt.err (!%p2319_p13)
}
 0x348   : > { %1927 = dma.vmem_to_hbm [thread:$0]  (%p3201_p12), %s3056_s12, 512, %s3062_s22, %s3023_s16, %s2392_s13, %s2392_s13, %s2393_s9  }
 0x349 PF: > { %s3208_s25 = sld [smem:[#allocation26_spill]]  ;;  %s3209_s26 = sld [smem:[#allocation31_spill]] }
 0x34a   : > { %s3210_s3 = sld [smem:[#allocation27_spill]] }
 0x34f   : > { %s1399_s23 = sand.u32 1, %s3208_s25   ;;  %p3211_p3 = scmp.ne.s32.totalorder %s3209_s26, 0 }
 0x350   : > { %p3212_p7 = scmp.ge.s32.totalorder %s3210_s3, 2  ;;  %s1400_s1 = scalar_lea.sflag [#allocation4], %s1399_s23 }
 0x352   : > { %p1954_p2 = pnand %p3212_p7, %p3211_p3 }
 0x354   : > { %2356 = dma.done.wait (!%p1954_p2), %s1400_s1, 512  }
 0x355   : > { %2358 = vsyncadd (!%p1954_p2), %s1400_s1, 4294966784  ;;  %s3213_s19 = sadd.s32 4294967294, %s3210_s3  }
 0x356   : > { %s1408_s18 = sand.u32 1, %s3213_s19  }
 0x357   : > { %s1409_s29 = scalar_lea.sflag [#allocation15], %s1408_s18 }
 0x358   : > { %2360 = dma.done.wait (!%p1954_p2), %s1409_s29, 1024  }
 0x359   : > { %2362 = vsyncadd (!%p1954_p2), %s1409_s29, 4294966272  ;;  %s1427_s17 = scalar_lea.sflag [#allocation18], %s1399_s23 }
 0x35a   : > { %2364 = dma.done.wait (!%p1954_p2), %s1427_s17, 512  }
 0x35b   : > { %2366 = vsyncadd (!%p1954_p2), %s1427_s17, 4294966784  ;;  %s3214_s16 = sld [smem:[#allocation28_spill]]  ;;  %s3215_s13 = sld [smem:[#allocation29_spill]] }
 0x35c   : > { %s3216_s29 = smov %s2373_s30  ;;  %s3217_s30 = smov %s2377_s15 }
 0x361   : > { %p39_p12 = scmp.ge.s32.totalorder %s3214_s16, 4   ;;  %s3218_s15 = smov %s3215_s13 }
 0x363   :  { %41 = sbr.rel (!%p39_p12) target bundleno = 25 (0x19), region = 194 }
 0x36a   :  { %1432 = vsyncpa [#allocation3], 1 }
 0x36b   :  { %1434 = vsyncpa [#allocation3 + $0x1], 1 }
 0x36c   :  { %1435 = vsyncpa [#allocation6], 1 }
 0x36d   :  { %1437 = vsyncpa [#allocation6 + $0x1], 1 }
 0x36e   :  { %1438 = vsyncpa [#allocation9], 1 }
 0x36f   :  { %1439 = vsyncpa [#allocation12], 1 }
 0x370   :  { %1440 = vsyncpa [#allocation4], 1 }
 0x371   :  { %1442 = vsyncpa [#allocation4 + $0x1], 1 }
 0x372   :  { %1443 = vsyncpa [#allocation15], 1 }
 0x373   :  { %1445 = vsyncpa [#allocation15 + $0x1], 1 }
 0x374   :  { %1446 = vsyncpa [#allocation18], 1 }
 0x375   :  { %1448 = vsyncpa [#allocation18 + $0x1], 1 }

</bundles_post_ra>
